<compile_context>
chip_gen: v7x
topology: tpu7x:2x2x1
jax: 0.10.0
libtpu: 0.0.40
codegen_flags: <defaults>
</compile_context>

<pallas_src>
import functools

import numpy as np
import jax
import jax.numpy as jnp
from jax import lax
from jax.experimental import pallas as pl
from jax.experimental.pallas import tpu as pltpu


# --------------------------- host-side weight packing ---------------------------

def _banded_conv_weights(w, w_in):
    """w: (Co, Ci, KH, KW) -> (KH, Ci*W_in, Co*OW) block-Toeplitz slabs.

    Conv in layout A[h, c*W_in + w] becomes  Y = sum_kh A[kh:kh+OH, :] @ slab[kh]
    with Y[oh, o*OW + ow] = conv output.
    """
    co, ci, kh_tot, kw_tot = w.shape
    ow = w_in - kw_tot + 1
    slab = np.zeros((kh_tot, ci * w_in, co * ow), np.float32)
    cols0 = np.arange(co) * ow
    for kh in range(kh_tot):
        for c in range(ci):
            for kw in range(kw_tot):
                for owi in range(ow):
                    slab[kh, c * w_in + owi + kw, cols0 + owi] = w[:, c, kh, kw]
    return slab


def _pool_row_select(oh):
    """(2, OH//2, OH): [0] picks even rows, [1] picks odd rows."""
    p = np.zeros((2, oh // 2, oh), np.float32)
    j = np.arange(oh // 2)
    p[0, j, 2 * j] = 1.0
    p[1, j, 2 * j + 1] = 1.0
    return p


def _pool_col_select(co, ow):
    """(2, Co*OW, Co*(OW//2)): lane selection of even/odd ow within each channel block."""
    p = np.zeros((2, co * ow, co * (ow // 2)), np.float32)
    k = np.arange(ow // 2)
    for o in range(co):
        p[0, o * ow + 2 * k, o * (ow // 2) + k] = 1.0
        p[1, o * ow + 2 * k + 1, o * (ow // 2) + k] = 1.0
    return p


_PACK_ORDER = ["w1big", "b1big", "p1r", "p1c",
               "w2big", "b2big", "p2r", "p2c",
               "wf1", "bf1", "wf2", "bf2", "wf3", "bf3"]


def pack_params(params):
    """One-time repack of torch-layout params into kernel-friendly layouts."""
    n = lambda a: np.asarray(a, np.float32)
    c1w, c1b = n(params["conv1_w"]), n(params["conv1_b"])
    c2w, c2b = n(params["conv2_w"]), n(params["conv2_b"])
    f1w, f1b = n(params["fc1_w"]), n(params["fc1_b"])
    f2w, f2b = n(params["fc2_w"]), n(params["fc2_b"])
    f3w, f3b = n(params["fc3_w"]), n(params["fc3_b"])

    packed = {
        "w1big": _banded_conv_weights(c1w, 32),        # (5, 96, 168)
        "b1big": np.repeat(c1b, 28)[None, :],          # (1, 168)
        "p1r": _pool_row_select(28),                   # (2, 14, 28)
        "p1c": _pool_col_select(6, 28),                # (2, 168, 84)
        "w2big": _banded_conv_weights(c2w, 14),        # (5, 84, 160)
        "b2big": np.repeat(c2b, 10)[None, :],          # (1, 160)
        "p2r": _pool_row_select(10),                   # (2, 5, 10)
        "p2c": _pool_col_select(16, 10),               # (2, 160, 80)
    }

    # fc1: fold the torch NCHW flatten (f = c*25 + h*5 + w) into 5 per-row slabs
    # so feat never has to be materialized: h1 = sum_h a2[h:h+1,:] @ wf1[h].
    wf1 = np.zeros((5, 80, 128), np.float32)           # lane layout: o*5 + w
    for h in range(5):
        for o in range(16):
            for w_ in range(5):
                wf1[h, o * 5 + w_, :120] = f1w[:, o * 25 + h * 5 + w_]
    bf1 = np.zeros((1, 128), np.float32); bf1[0, :120] = f1b
    wf2 = np.zeros((128, 128), np.float32); wf2[:120, :84] = f2w.T
    bf2 = np.zeros((1, 128), np.float32); bf2[0, :84] = f2b
    wf3 = np.zeros((128, 10), np.float32); wf3[:84, :] = f3w.T
    bf3 = f3b[None, :].astype(np.float32)

    packed.update({"wf1": wf1, "bf1": bf1, "wf2": wf2, "bf2": bf2,
                   "wf3": wf3, "bf3": bf3})
    return {k: jnp.asarray(v) for k, v in packed.items()}


# --------------------------------- Pallas kernel --------------------------------

def _net5_fused_kernel(x_ref, w1_ref, b1_ref, p1r_ref, p1c_ref,
                       w2_ref, b2_ref, p2r_ref, p2c_ref,
                       wf1_ref, bf1_ref, wf2_ref, bf2_ref, wf3_ref, bf3_ref,
                       out_ref, *, bt):
    f32 = jnp.float32
    for i in range(bt):                                   # unrolled batch tile
        x_img = x_ref[i]                                  # (32, 96) = (H, C*W)

        # ----- conv1 + bias + relu: (28, 168), lane = o*28 + ow -----
        y1 = jnp.dot(x_img[0:28, :], w1_ref[0], preferred_element_type=f32)
        for kh in range(1, 5):
            y1 += jnp.dot(x_img[kh:kh + 28, :], w1_ref[kh],
                          preferred_element_type=f32)
        y1 = jnp.maximum(y1 + b1_ref[...], 0.0)

        # ----- maxpool 2x2 (rows then lanes) via 0/1 selection matmuls -----
        r1 = jnp.maximum(jnp.dot(p1r_ref[0], y1, preferred_element_type=f32),
                         jnp.dot(p1r_ref[1], y1, preferred_element_type=f32))
        a1 = jnp.maximum(jnp.dot(r1, p1c_ref[0], preferred_element_type=f32),
                         jnp.dot(r1, p1c_ref[1], preferred_element_type=f32))
        # a1: (14, 84) = (H, C*W) for conv2

        # ----- conv2 + bias + relu: (10, 160), lane = o*10 + ow -----
        y2 = jnp.dot(a1[0:10, :], w2_ref[0], preferred_element_type=f32)
        for kh in range(1, 5):
            y2 += jnp.dot(a1[kh:kh + 10, :], w2_ref[kh],
                          preferred_element_type=f32)
        y2 = jnp.maximum(y2 + b2_ref[...], 0.0)

        r2 = jnp.maximum(jnp.dot(p2r_ref[0], y2, preferred_element_type=f32),
                         jnp.dot(p2r_ref[1], y2, preferred_element_type=f32))
        a2 = jnp.maximum(jnp.dot(r2, p2c_ref[0], preferred_element_type=f32),
                         jnp.dot(r2, p2c_ref[1], preferred_element_type=f32))
        # a2: (5, 80), lane = o*5 + w

        # ----- fc1 (torch flatten folded into per-row weight slabs) -----
        h1 = jnp.dot(a2[0:1, :], wf1_ref[0], preferred_element_type=f32)
        for hh in range(1, 5):
            h1 += jnp.dot(a2[hh:hh + 1, :], wf1_ref[hh],
                          preferred_element_type=f32)
        h1 = jnp.maximum(h1 + bf1_ref[...], 0.0)           # (1, 128), pad lanes stay 0

        # ----- fc2 + relu, fc3 -----
        h2 = jnp.maximum(jnp.dot(h1, wf2_ref[...], preferred_element_type=f32)
                         + bf2_ref[...], 0.0)              # (1, 128)
        logits = jnp.dot(h2, wf3_ref[...], preferred_element_type=f32) \
            + bf3_ref[...]                                  # (1, 10)
        out_ref[i] = logits


# ---------------------------------- wrapper -------------------------------------

def _full_spec(arr):
    nd = arr.ndim
    return pl.BlockSpec(arr.shape, lambda i, _nd=nd: (0,) * _nd)


def net5_forward(packed, x, *, bt=4):
    """x: (B, 3, 32, 32) NCHW float32 -> (B, 10) logits."""
    B = x.shape[0]
    bt = max(1, min(bt, B))
    pad = (-B) % bt
    if pad:
        x = jnp.concatenate([x, jnp.zeros((pad,) + x.shape[1:], x.dtype)], axis=0)
    bp = B + pad

    # NCHW -> per-image (H, C*W) layout; only host-side layout glue in the net.
    xl = jnp.transpose(x, (0, 2, 1, 3)).reshape(bp, 32, 96).astype(jnp.float32)

    wargs = [packed[k] for k in _PACK_ORDER]
    in_specs = [pl.BlockSpec((bt, 32, 96), lambda i: (i, 0, 0))] \
        + [_full_spec(a) for a in wargs]
    out_specs = pl.BlockSpec((bt, 1, 10), lambda i: (i, 0, 0))

    out = pl.pallas_call(
        functools.partial(_net5_fused_kernel, bt=bt),
        out_shape=jax.ShapeDtypeStruct((bp, 1, 10), jnp.float32),
        grid=(bp // bt,),
        in_specs=in_specs,
        out_specs=out_specs,
        compiler_params=pltpu.CompilerParams(
            dimension_semantics=("parallel",)),
    )(xl, *wargs)
    return out.reshape(bp, 10)[:B]


# ------------------------------ pure-JAX reference -------------------------------

def net5_reference(params, x):
    dn = ("NCHW", "OIHW", "NCHW")
    y = lax.conv_general_dilated(x, params["conv1_w"], (1, 1), "VALID",
                                 dimension_numbers=dn,
                                 precision=lax.Precision.HIGHEST)
    y = jnp.maximum(y + params["conv1_b"][None, :, None, None], 0.0)
    y = lax.reduce_window(y, -jnp.inf, lax.max, (1, 1, 2, 2), (1, 1, 2, 2), "VALID")
    y = lax.conv_general_dilated(y, params["conv2_w"], (1, 1), "VALID",
                                 dimension_numbers=dn,
                                 precision=lax.Precision.HIGHEST)
    y = jnp.maximum(y + params["conv2_b"][None, :, None, None], 0.0)
    y = lax.reduce_window(y, -jnp.inf, lax.max, (1, 1, 2, 2), (1, 1, 2, 2), "VALID")
    y = y.reshape(y.shape[0], -1)                           # torch .view(-1, 400)
    y = jnp.maximum(y @ params["fc1_w"].T + params["fc1_b"], 0.0)
    y = jnp.maximum(y @ params["fc2_w"].T + params["fc2_b"], 0.0)
    return y @ params["fc3_w"].T + params["fc3_b"]


# ----------------------------------- params --------------------------------------

def init_params(key):
    ks = jax.random.split(key, 10)
    s = 0.1
    return {
        "conv1_w": s * jax.random.normal(ks[0], (6, 3, 5, 5), jnp.float32),
        "conv1_b": s * jax.random.normal(ks[1], (6,), jnp.float32),
        "conv2_w": s * jax.random.normal(ks[2], (16, 6, 5, 5), jnp.float32),
        "conv2_b": s * jax.random.normal(ks[3], (16,), jnp.float32),
        "fc1_w": s * jax.random.normal(ks[4], (120, 16 * 5 * 5), jnp.float32),
        "fc1_b": s * jax.random.normal(ks[5], (120,), jnp.float32),
        "fc2_w": s * jax.random.normal(ks[6], (84, 120), jnp.float32),
        "fc2_b": s * jax.random.normal(ks[7], (84,), jnp.float32),
        "fc3_w": s * jax.random.normal(ks[8], (10, 84), jnp.float32),
        "fc3_b": s * jax.random.normal(ks[9], (10,), jnp.float32),
    }


if __name__ == "__main__":
    key = jax.random.PRNGKey(0)
    pkey, xkey = jax.random.split(key)
    params = init_params(pkey)
    packed = pack_params(params)

    # 32x32 spatial is required by fc1 (16*5*5); batch 4 tiled by bt=2 -> grid (2,).
    x = jax.random.normal(xkey, (4, 3, 32, 32), jnp.float32)

    fwd = jax.jit(lambda p, xx: net5_forward(p, xx, bt=2))
    out = jax.block_until_ready(fwd(packed, x))
    assert out.shape == (4, 10) and out.dtype == jnp.float32

    ref = jax.block_until_ready(jax.jit(net5_reference)(params, x))
    err = float(jnp.max(jnp.abs(out - ref)))
    assert err < 3e-2, f"kernel/reference mismatch: max abs err = {err}"

    print("KERNEL_OK")
</pallas_src>

<mosaic_0001>
module attributes {stable_mosaic.version = 11 : i64} {
  func.func @_net5_fused_kernel(%arg0: i32, %arg1: memref<2x32x96xf32, #tpu.memory_space<vmem>>, %arg2: memref<5x96x168xf32, #tpu.memory_space<vmem>>, %arg3: memref<1x168xf32, #tpu.memory_space<vmem>>, %arg4: memref<2x14x28xf32, #tpu.memory_space<vmem>>, %arg5: memref<2x168x84xf32, #tpu.memory_space<vmem>>, %arg6: memref<5x84x160xf32, #tpu.memory_space<vmem>>, %arg7: memref<1x160xf32, #tpu.memory_space<vmem>>, %arg8: memref<2x5x10xf32, #tpu.memory_space<vmem>>, %arg9: memref<2x160x80xf32, #tpu.memory_space<vmem>>, %arg10: memref<5x80x128xf32, #tpu.memory_space<vmem>>, %arg11: memref<1x128xf32, #tpu.memory_space<vmem>>, %arg12: memref<128x128xf32, #tpu.memory_space<vmem>>, %arg13: memref<1x128xf32, #tpu.memory_space<vmem>>, %arg14: memref<128x10xf32, #tpu.memory_space<vmem>>, %arg15: memref<1x10xf32, #tpu.memory_space<vmem>>, %arg16: memref<2x1x10xf32, #tpu.memory_space<vmem>>) attributes {dimension_semantics = [#tpu.dimension_semantics<parallel>], iteration_bounds = array<i64: 2>, scalar_prefetch = 0 : i64, scratch_operands = 0 : i64, tpu.core_type = #tpu.core_type<tc>, window_params = [{transform_indices = @transform_0, window_bounds = array<i64: 2, 32, 96>}, {pipeline_mode = #tpu.pipeline_mode<synchronous>, transform_indices = @transform_1, window_bounds = array<i64: 5, 96, 168>}, {pipeline_mode = #tpu.pipeline_mode<synchronous>, transform_indices = @transform_2, window_bounds = array<i64: 1, 168>}, {pipeline_mode = #tpu.pipeline_mode<synchronous>, transform_indices = @transform_3, window_bounds = array<i64: 2, 14, 28>}, {pipeline_mode = #tpu.pipeline_mode<synchronous>, transform_indices = @transform_4, window_bounds = array<i64: 2, 168, 84>}, {pipeline_mode = #tpu.pipeline_mode<synchronous>, transform_indices = @transform_5, window_bounds = array<i64: 5, 84, 160>}, {pipeline_mode = #tpu.pipeline_mode<synchronous>, transform_indices = @transform_6, window_bounds = array<i64: 1, 160>}, {pipeline_mode = #tpu.pipeline_mode<synchronous>, transform_indices = @transform_7, window_bounds = array<i64: 2, 5, 10>}, {pipeline_mode = #tpu.pipeline_mode<synchronous>, transform_indices = @transform_8, window_bounds = array<i64: 2, 160, 80>}, {pipeline_mode = #tpu.pipeline_mode<synchronous>, transform_indices = @transform_9, window_bounds = array<i64: 5, 80, 128>}, {pipeline_mode = #tpu.pipeline_mode<synchronous>, transform_indices = @transform_10, window_bounds = array<i64: 1, 128>}, {pipeline_mode = #tpu.pipeline_mode<synchronous>, transform_indices = @transform_11, window_bounds = array<i64: 128, 128>}, {pipeline_mode = #tpu.pipeline_mode<synchronous>, transform_indices = @transform_12, window_bounds = array<i64: 1, 128>}, {pipeline_mode = #tpu.pipeline_mode<synchronous>, transform_indices = @transform_13, window_bounds = array<i64: 128, 10>}, {pipeline_mode = #tpu.pipeline_mode<synchronous>, transform_indices = @transform_14, window_bounds = array<i64: 1, 10>}, {transform_indices = @transform_15, window_bounds = array<i64: 2, 1, 10>}]} {
    %c0 = arith.constant 0 : index
    %c0_0 = arith.constant 0 : index
    %c0_1 = arith.constant 0 : index
    %0 = vector.load %arg1[%c0, %c0_0, %c0_1] : memref<2x32x96xf32, #tpu.memory_space<vmem>>, vector<1x32x96xf32>
    %1 = vector.shape_cast %0 : vector<1x32x96xf32> to vector<32x96xf32>
    %2 = vector.extract_strided_slice %1 {offsets = [0, 0], sizes = [28, 96], strides = [1, 1]} : vector<32x96xf32> to vector<28x96xf32>
    %c0_2 = arith.constant 0 : index
    %c0_3 = arith.constant 0 : index
    %c0_4 = arith.constant 0 : index
    %3 = vector.load %arg2[%c0_2, %c0_3, %c0_4] : memref<5x96x168xf32, #tpu.memory_space<vmem>>, vector<1x96x168xf32>
    %4 = vector.shape_cast %3 : vector<1x96x168xf32> to vector<96x168xf32>
    %cst = arith.constant dense<0.000000e+00> : vector<28x168xf32>
    %5 = tpu.matmul %2, %4, %cst {dimension_numbers = #tpu.dot_dimension_numbers<[1], [0], [0], [1], [0, 0, 1, 1], [], []>} : vector<28x96xf32>, vector<96x168xf32>, vector<28x168xf32> -> vector<28x168xf32>
    %6 = vector.extract_strided_slice %1 {offsets = [1, 0], sizes = [28, 96], strides = [1, 1]} : vector<32x96xf32> to vector<28x96xf32>
    %c1 = arith.constant 1 : index
    %c0_5 = arith.constant 0 : index
    %c0_6 = arith.constant 0 : index
    %7 = vector.load %arg2[%c1, %c0_5, %c0_6] : memref<5x96x168xf32, #tpu.memory_space<vmem>>, vector<1x96x168xf32>
    %8 = vector.shape_cast %7 : vector<1x96x168xf32> to vector<96x168xf32>
    %cst_7 = arith.constant dense<0.000000e+00> : vector<28x168xf32>
    %9 = tpu.matmul %6, %8, %cst_7 {dimension_numbers = #tpu.dot_dimension_numbers<[1], [0], [0], [1], [0, 0, 1, 1], [], []>} : vector<28x96xf32>, vector<96x168xf32>, vector<28x168xf32> -> vector<28x168xf32>
    %10 = arith.addf %5, %9 : vector<28x168xf32>
    %11 = vector.extract_strided_slice %1 {offsets = [2, 0], sizes = [28, 96], strides = [1, 1]} : vector<32x96xf32> to vector<28x96xf32>
    %c2 = arith.constant 2 : index
    %c0_8 = arith.constant 0 : index
    %c0_9 = arith.constant 0 : index
    %12 = vector.load %arg2[%c2, %c0_8, %c0_9] : memref<5x96x168xf32, #tpu.memory_space<vmem>>, vector<1x96x168xf32>
    %13 = vector.shape_cast %12 : vector<1x96x168xf32> to vector<96x168xf32>
    %cst_10 = arith.constant dense<0.000000e+00> : vector<28x168xf32>
    %14 = tpu.matmul %11, %13, %cst_10 {dimension_numbers = #tpu.dot_dimension_numbers<[1], [0], [0], [1], [0, 0, 1, 1], [], []>} : vector<28x96xf32>, vector<96x168xf32>, vector<28x168xf32> -> vector<28x168xf32>
    %15 = arith.addf %10, %14 : vector<28x168xf32>
    %16 = vector.extract_strided_slice %1 {offsets = [3, 0], sizes = [28, 96], strides = [1, 1]} : vector<32x96xf32> to vector<28x96xf32>
    %c3 = arith.constant 3 : index
    %c0_11 = arith.constant 0 : index
    %c0_12 = arith.constant 0 : index
    %17 = vector.load %arg2[%c3, %c0_11, %c0_12] : memref<5x96x168xf32, #tpu.memory_space<vmem>>, vector<1x96x168xf32>
    %18 = vector.shape_cast %17 : vector<1x96x168xf32> to vector<96x168xf32>
    %cst_13 = arith.constant dense<0.000000e+00> : vector<28x168xf32>
    %19 = tpu.matmul %16, %18, %cst_13 {dimension_numbers = #tpu.dot_dimension_numbers<[1], [0], [0], [1], [0, 0, 1, 1], [], []>} : vector<28x96xf32>, vector<96x168xf32>, vector<28x168xf32> -> vector<28x168xf32>
    %20 = arith.addf %15, %19 : vector<28x168xf32>
    %21 = vector.extract_strided_slice %1 {offsets = [4, 0], sizes = [28, 96], strides = [1, 1]} : vector<32x96xf32> to vector<28x96xf32>
    %c4 = arith.constant 4 : index
    %c0_14 = arith.constant 0 : index
    %c0_15 = arith.constant 0 : index
    %22 = vector.load %arg2[%c4, %c0_14, %c0_15] : memref<5x96x168xf32, #tpu.memory_space<vmem>>, vector<1x96x168xf32>
    %23 = vector.shape_cast %22 : vector<1x96x168xf32> to vector<96x168xf32>
    %cst_16 = arith.constant dense<0.000000e+00> : vector<28x168xf32>
    %24 = tpu.matmul %21, %23, %cst_16 {dimension_numbers = #tpu.dot_dimension_numbers<[1], [0], [0], [1], [0, 0, 1, 1], [], []>} : vector<28x96xf32>, vector<96x168xf32>, vector<28x168xf32> -> vector<28x168xf32>
    %25 = arith.addf %20, %24 : vector<28x168xf32>
    %c0_17 = arith.constant 0 : index
    %c0_18 = arith.constant 0 : index
    %26 = vector.load %arg3[%c0_17, %c0_18] : memref<1x168xf32, #tpu.memory_space<vmem>>, vector<1x168xf32>
    %27 = vector.broadcast %26 : vector<1x168xf32> to vector<28x168xf32>
    %28 = arith.addf %25, %27 : vector<28x168xf32>
    %cst_19 = arith.constant 0.000000e+00 : f32
    %29 = vector.broadcast %cst_19 : f32 to vector<28x168xf32>
    %30 = arith.maximumf %28, %29 : vector<28x168xf32>
    %c0_20 = arith.constant 0 : index
    %c0_21 = arith.constant 0 : index
    %c0_22 = arith.constant 0 : index
    %31 = vector.load %arg4[%c0_20, %c0_21, %c0_22] : memref<2x14x28xf32, #tpu.memory_space<vmem>>, vector<1x14x28xf32>
    %32 = vector.shape_cast %31 : vector<1x14x28xf32> to vector<14x28xf32>
    %cst_23 = arith.constant dense<0.000000e+00> : vector<14x168xf32>
    %33 = tpu.matmul %32, %30, %cst_23 {dimension_numbers = #tpu.dot_dimension_numbers<[1], [0], [0], [1], [0, 0, 1, 1], [], []>} : vector<14x28xf32>, vector<28x168xf32>, vector<14x168xf32> -> vector<14x168xf32>
    %c1_24 = arith.constant 1 : index
    %c0_25 = arith.constant 0 : index
    %c0_26 = arith.constant 0 : index
    %34 = vector.load %arg4[%c1_24, %c0_25, %c0_26] : memref<2x14x28xf32, #tpu.memory_space<vmem>>, vector<1x14x28xf32>
    %35 = vector.shape_cast %34 : vector<1x14x28xf32> to vector<14x28xf32>
    %cst_27 = arith.constant dense<0.000000e+00> : vector<14x168xf32>
    %36 = tpu.matmul %35, %30, %cst_27 {dimension_numbers = #tpu.dot_dimension_numbers<[1], [0], [0], [1], [0, 0, 1, 1], [], []>} : vector<14x28xf32>, vector<28x168xf32>, vector<14x168xf32> -> vector<14x168xf32>
    %37 = arith.maximumf %33, %36 : vector<14x168xf32>
    %c0_28 = arith.constant 0 : index
    %c0_29 = arith.constant 0 : index
    %c0_30 = arith.constant 0 : index
    %38 = vector.load %arg5[%c0_28, %c0_29, %c0_30] : memref<2x168x84xf32, #tpu.memory_space<vmem>>, vector<1x168x84xf32>
    %39 = vector.shape_cast %38 : vector<1x168x84xf32> to vector<168x84xf32>
    %cst_31 = arith.constant dense<0.000000e+00> : vector<14x84xf32>
    %40 = tpu.matmul %37, %39, %cst_31 {dimension_numbers = #tpu.dot_dimension_numbers<[1], [0], [0], [1], [0, 0, 1, 1], [], []>} : vector<14x168xf32>, vector<168x84xf32>, vector<14x84xf32> -> vector<14x84xf32>
    %c1_32 = arith.constant 1 : index
    %c0_33 = arith.constant 0 : index
    %c0_34 = arith.constant 0 : index
    %41 = vector.load %arg5[%c1_32, %c0_33, %c0_34] : memref<2x168x84xf32, #tpu.memory_space<vmem>>, vector<1x168x84xf32>
    %42 = vector.shape_cast %41 : vector<1x168x84xf32> to vector<168x84xf32>
    %cst_35 = arith.constant dense<0.000000e+00> : vector<14x84xf32>
    %43 = tpu.matmul %37, %42, %cst_35 {dimension_numbers = #tpu.dot_dimension_numbers<[1], [0], [0], [1], [0, 0, 1, 1], [], []>} : vector<14x168xf32>, vector<168x84xf32>, vector<14x84xf32> -> vector<14x84xf32>
    %44 = arith.maximumf %40, %43 : vector<14x84xf32>
    %45 = vector.extract_strided_slice %44 {offsets = [0, 0], sizes = [10, 84], strides = [1, 1]} : vector<14x84xf32> to vector<10x84xf32>
    %c0_36 = arith.constant 0 : index
    %c0_37 = arith.constant 0 : index
    %c0_38 = arith.constant 0 : index
    %46 = vector.load %arg6[%c0_36, %c0_37, %c0_38] : memref<5x84x160xf32, #tpu.memory_space<vmem>>, vector<1x84x160xf32>
    %47 = vector.shape_cast %46 : vector<1x84x160xf32> to vector<84x160xf32>
    %cst_39 = arith.constant dense<0.000000e+00> : vector<10x160xf32>
    %48 = tpu.matmul %45, %47, %cst_39 {dimension_numbers = #tpu.dot_dimension_numbers<[1], [0], [0], [1], [0, 0, 1, 1], [], []>} : vector<10x84xf32>, vector<84x160xf32>, vector<10x160xf32> -> vector<10x160xf32>
    %49 = vector.extract_strided_slice %44 {offsets = [1, 0], sizes = [10, 84], strides = [1, 1]} : vector<14x84xf32> to vector<10x84xf32>
    %c1_40 = arith.constant 1 : index
    %c0_41 = arith.constant 0 : index
    %c0_42 = arith.constant 0 : index
    %50 = vector.load %arg6[%c1_40, %c0_41, %c0_42] : memref<5x84x160xf32, #tpu.memory_space<vmem>>, vector<1x84x160xf32>
    %51 = vector.shape_cast %50 : vector<1x84x160xf32> to vector<84x160xf32>
    %cst_43 = arith.constant dense<0.000000e+00> : vector<10x160xf32>
    %52 = tpu.matmul %49, %51, %cst_43 {dimension_numbers = #tpu.dot_dimension_numbers<[1], [0], [0], [1], [0, 0, 1, 1], [], []>} : vector<10x84xf32>, vector<84x160xf32>, vector<10x160xf32> -> vector<10x160xf32>
    %53 = arith.addf %48, %52 : vector<10x160xf32>
    %54 = vector.extract_strided_slice %44 {offsets = [2, 0], sizes = [10, 84], strides = [1, 1]} : vector<14x84xf32> to vector<10x84xf32>
    %c2_44 = arith.constant 2 : index
    %c0_45 = arith.constant 0 : index
    %c0_46 = arith.constant 0 : index
    %55 = vector.load %arg6[%c2_44, %c0_45, %c0_46] : memref<5x84x160xf32, #tpu.memory_space<vmem>>, vector<1x84x160xf32>
    %56 = vector.shape_cast %55 : vector<1x84x160xf32> to vector<84x160xf32>
    %cst_47 = arith.constant dense<0.000000e+00> : vector<10x160xf32>
    %57 = tpu.matmul %54, %56, %cst_47 {dimension_numbers = #tpu.dot_dimension_numbers<[1], [0], [0], [1], [0, 0, 1, 1], [], []>} : vector<10x84xf32>, vector<84x160xf32>, vector<10x160xf32> -> vector<10x160xf32>
    %58 = arith.addf %53, %57 : vector<10x160xf32>
    %59 = vector.extract_strided_slice %44 {offsets = [3, 0], sizes = [10, 84], strides = [1, 1]} : vector<14x84xf32> to vector<10x84xf32>
    %c3_48 = arith.constant 3 : index
    %c0_49 = arith.constant 0 : index
    %c0_50 = arith.constant 0 : index
    %60 = vector.load %arg6[%c3_48, %c0_49, %c0_50] : memref<5x84x160xf32, #tpu.memory_space<vmem>>, vector<1x84x160xf32>
    %61 = vector.shape_cast %60 : vector<1x84x160xf32> to vector<84x160xf32>
    %cst_51 = arith.constant dense<0.000000e+00> : vector<10x160xf32>
    %62 = tpu.matmul %59, %61, %cst_51 {dimension_numbers = #tpu.dot_dimension_numbers<[1], [0], [0], [1], [0, 0, 1, 1], [], []>} : vector<10x84xf32>, vector<84x160xf32>, vector<10x160xf32> -> vector<10x160xf32>
    %63 = arith.addf %58, %62 : vector<10x160xf32>
    %64 = vector.extract_strided_slice %44 {offsets = [4, 0], sizes = [10, 84], strides = [1, 1]} : vector<14x84xf32> to vector<10x84xf32>
    %c4_52 = arith.constant 4 : index
    %c0_53 = arith.constant 0 : index
    %c0_54 = arith.constant 0 : index
    %65 = vector.load %arg6[%c4_52, %c0_53, %c0_54] : memref<5x84x160xf32, #tpu.memory_space<vmem>>, vector<1x84x160xf32>
    %66 = vector.shape_cast %65 : vector<1x84x160xf32> to vector<84x160xf32>
    %cst_55 = arith.constant dense<0.000000e+00> : vector<10x160xf32>
    %67 = tpu.matmul %64, %66, %cst_55 {dimension_numbers = #tpu.dot_dimension_numbers<[1], [0], [0], [1], [0, 0, 1, 1], [], []>} : vector<10x84xf32>, vector<84x160xf32>, vector<10x160xf32> -> vector<10x160xf32>
    %68 = arith.addf %63, %67 : vector<10x160xf32>
    %c0_56 = arith.constant 0 : index
    %c0_57 = arith.constant 0 : index
    %69 = vector.load %arg7[%c0_56, %c0_57] : memref<1x160xf32, #tpu.memory_space<vmem>>, vector<1x160xf32>
    %70 = vector.broadcast %69 : vector<1x160xf32> to vector<10x160xf32>
    %71 = arith.addf %68, %70 : vector<10x160xf32>
    %cst_58 = arith.constant 0.000000e+00 : f32
    %72 = vector.broadcast %cst_58 : f32 to vector<10x160xf32>
    %73 = arith.maximumf %71, %72 : vector<10x160xf32>
    %c0_59 = arith.constant 0 : index
    %c0_60 = arith.constant 0 : index
    %c0_61 = arith.constant 0 : index
    %74 = vector.load %arg8[%c0_59, %c0_60, %c0_61] : memref<2x5x10xf32, #tpu.memory_space<vmem>>, vector<1x5x10xf32>
    %75 = vector.shape_cast %74 : vector<1x5x10xf32> to vector<5x10xf32>
    %cst_62 = arith.constant dense<0.000000e+00> : vector<5x160xf32>
    %76 = tpu.matmul %75, %73, %cst_62 {dimension_numbers = #tpu.dot_dimension_numbers<[1], [0], [0], [1], [0, 0, 1, 1], [], []>} : vector<5x10xf32>, vector<10x160xf32>, vector<5x160xf32> -> vector<5x160xf32>
    %c1_63 = arith.constant 1 : index
    %c0_64 = arith.constant 0 : index
    %c0_65 = arith.constant 0 : index
    %77 = vector.load %arg8[%c1_63, %c0_64, %c0_65] : memref<2x5x10xf32, #tpu.memory_space<vmem>>, vector<1x5x10xf32>
    %78 = vector.shape_cast %77 : vector<1x5x10xf32> to vector<5x10xf32>
    %cst_66 = arith.constant dense<0.000000e+00> : vector<5x160xf32>
    %79 = tpu.matmul %78, %73, %cst_66 {dimension_numbers = #tpu.dot_dimension_numbers<[1], [0], [0], [1], [0, 0, 1, 1], [], []>} : vector<5x10xf32>, vector<10x160xf32>, vector<5x160xf32> -> vector<5x160xf32>
    %80 = arith.maximumf %76, %79 : vector<5x160xf32>
    %c0_67 = arith.constant 0 : index
    %c0_68 = arith.constant 0 : index
    %c0_69 = arith.constant 0 : index
    %81 = vector.load %arg9[%c0_67, %c0_68, %c0_69] : memref<2x160x80xf32, #tpu.memory_space<vmem>>, vector<1x160x80xf32>
    %82 = vector.shape_cast %81 : vector<1x160x80xf32> to vector<160x80xf32>
    %cst_70 = arith.constant dense<0.000000e+00> : vector<5x80xf32>
    %83 = tpu.matmul %80, %82, %cst_70 {dimension_numbers = #tpu.dot_dimension_numbers<[1], [0], [0], [1], [0, 0, 1, 1], [], []>} : vector<5x160xf32>, vector<160x80xf32>, vector<5x80xf32> -> vector<5x80xf32>
    %c1_71 = arith.constant 1 : index
    %c0_72 = arith.constant 0 : index
    %c0_73 = arith.constant 0 : index
    %84 = vector.load %arg9[%c1_71, %c0_72, %c0_73] : memref<2x160x80xf32, #tpu.memory_space<vmem>>, vector<1x160x80xf32>
    %85 = vector.shape_cast %84 : vector<1x160x80xf32> to vector<160x80xf32>
    %cst_74 = arith.constant dense<0.000000e+00> : vector<5x80xf32>
    %86 = tpu.matmul %80, %85, %cst_74 {dimension_numbers = #tpu.dot_dimension_numbers<[1], [0], [0], [1], [0, 0, 1, 1], [], []>} : vector<5x160xf32>, vector<160x80xf32>, vector<5x80xf32> -> vector<5x80xf32>
    %87 = arith.maximumf %83, %86 : vector<5x80xf32>
    %88 = vector.extract_strided_slice %87 {offsets = [0, 0], sizes = [1, 80], strides = [1, 1]} : vector<5x80xf32> to vector<1x80xf32>
    %c0_75 = arith.constant 0 : index
    %c0_76 = arith.constant 0 : index
    %c0_77 = arith.constant 0 : index
    %89 = vector.load %arg10[%c0_75, %c0_76, %c0_77] : memref<5x80x128xf32, #tpu.memory_space<vmem>>, vector<1x80x128xf32>
    %90 = vector.shape_cast %89 : vector<1x80x128xf32> to vector<80x128xf32>
    %cst_78 = arith.constant dense<0.000000e+00> : vector<1x128xf32>
    %91 = tpu.matmul %88, %90, %cst_78 {dimension_numbers = #tpu.dot_dimension_numbers<[1], [0], [0], [1], [0, 0, 1, 1], [], []>} : vector<1x80xf32>, vector<80x128xf32>, vector<1x128xf32> -> vector<1x128xf32>
    %92 = vector.extract_strided_slice %87 {offsets = [1, 0], sizes = [1, 80], strides = [1, 1]} : vector<5x80xf32> to vector<1x80xf32>
    %c1_79 = arith.constant 1 : index
    %c0_80 = arith.constant 0 : index
    %c0_81 = arith.constant 0 : index
    %93 = vector.load %arg10[%c1_79, %c0_80, %c0_81] : memref<5x80x128xf32, #tpu.memory_space<vmem>>, vector<1x80x128xf32>
    %94 = vector.shape_cast %93 : vector<1x80x128xf32> to vector<80x128xf32>
    %cst_82 = arith.constant dense<0.000000e+00> : vector<1x128xf32>
    %95 = tpu.matmul %92, %94, %cst_82 {dimension_numbers = #tpu.dot_dimension_numbers<[1], [0], [0], [1], [0, 0, 1, 1], [], []>} : vector<1x80xf32>, vector<80x128xf32>, vector<1x128xf32> -> vector<1x128xf32>
    %96 = arith.addf %91, %95 : vector<1x128xf32>
    %97 = vector.extract_strided_slice %87 {offsets = [2, 0], sizes = [1, 80], strides = [1, 1]} : vector<5x80xf32> to vector<1x80xf32>
    %c2_83 = arith.constant 2 : index
    %c0_84 = arith.constant 0 : index
    %c0_85 = arith.constant 0 : index
    %98 = vector.load %arg10[%c2_83, %c0_84, %c0_85] : memref<5x80x128xf32, #tpu.memory_space<vmem>>, vector<1x80x128xf32>
    %99 = vector.shape_cast %98 : vector<1x80x128xf32> to vector<80x128xf32>
    %cst_86 = arith.constant dense<0.000000e+00> : vector<1x128xf32>
    %100 = tpu.matmul %97, %99, %cst_86 {dimension_numbers = #tpu.dot_dimension_numbers<[1], [0], [0], [1], [0, 0, 1, 1], [], []>} : vector<1x80xf32>, vector<80x128xf32>, vector<1x128xf32> -> vector<1x128xf32>
    %101 = arith.addf %96, %100 : vector<1x128xf32>
    %102 = vector.extract_strided_slice %87 {offsets = [3, 0], sizes = [1, 80], strides = [1, 1]} : vector<5x80xf32> to vector<1x80xf32>
    %c3_87 = arith.constant 3 : index
    %c0_88 = arith.constant 0 : index
    %c0_89 = arith.constant 0 : index
    %103 = vector.load %arg10[%c3_87, %c0_88, %c0_89] : memref<5x80x128xf32, #tpu.memory_space<vmem>>, vector<1x80x128xf32>
    %104 = vector.shape_cast %103 : vector<1x80x128xf32> to vector<80x128xf32>
    %cst_90 = arith.constant dense<0.000000e+00> : vector<1x128xf32>
    %105 = tpu.matmul %102, %104, %cst_90 {dimension_numbers = #tpu.dot_dimension_numbers<[1], [0], [0], [1], [0, 0, 1, 1], [], []>} : vector<1x80xf32>, vector<80x128xf32>, vector<1x128xf32> -> vector<1x128xf32>
    %106 = arith.addf %101, %105 : vector<1x128xf32>
    %107 = vector.extract_strided_slice %87 {offsets = [4, 0], sizes = [1, 80], strides = [1, 1]} : vector<5x80xf32> to vector<1x80xf32>
    %c4_91 = arith.constant 4 : index
    %c0_92 = arith.constant 0 : index
    %c0_93 = arith.constant 0 : index
    %108 = vector.load %arg10[%c4_91, %c0_92, %c0_93] : memref<5x80x128xf32, #tpu.memory_space<vmem>>, vector<1x80x128xf32>
    %109 = vector.shape_cast %108 : vector<1x80x128xf32> to vector<80x128xf32>
    %cst_94 = arith.constant dense<0.000000e+00> : vector<1x128xf32>
    %110 = tpu.matmul %107, %109, %cst_94 {dimension_numbers = #tpu.dot_dimension_numbers<[1], [0], [0], [1], [0, 0, 1, 1], [], []>} : vector<1x80xf32>, vector<80x128xf32>, vector<1x128xf32> -> vector<1x128xf32>
    %111 = arith.addf %106, %110 : vector<1x128xf32>
    %c0_95 = arith.constant 0 : index
    %c0_96 = arith.constant 0 : index
    %112 = vector.load %arg11[%c0_95, %c0_96] : memref<1x128xf32, #tpu.memory_space<vmem>>, vector<1x128xf32>
    %113 = arith.addf %111, %112 : vector<1x128xf32>
    %cst_97 = arith.constant 0.000000e+00 : f32
    %114 = vector.broadcast %cst_97 : f32 to vector<1x128xf32>
    %115 = arith.maximumf %113, %114 : vector<1x128xf32>
    %c0_98 = arith.constant 0 : index
    %c0_99 = arith.constant 0 : index
    %116 = vector.load %arg12[%c0_98, %c0_99] : memref<128x128xf32, #tpu.memory_space<vmem>>, vector<128x128xf32>
    %cst_100 = arith.constant dense<0.000000e+00> : vector<1x128xf32>
    %117 = tpu.matmul %115, %116, %cst_100 {dimension_numbers = #tpu.dot_dimension_numbers<[1], [0], [0], [1], [0, 0, 1, 1], [], []>} : vector<1x128xf32>, vector<128x128xf32>, vector<1x128xf32> -> vector<1x128xf32>
    %c0_101 = arith.constant 0 : index
    %c0_102 = arith.constant 0 : index
    %118 = vector.load %arg13[%c0_101, %c0_102] : memref<1x128xf32, #tpu.memory_space<vmem>>, vector<1x128xf32>
    %119 = arith.addf %117, %118 : vector<1x128xf32>
    %cst_103 = arith.constant 0.000000e+00 : f32
    %120 = vector.broadcast %cst_103 : f32 to vector<1x128xf32>
    %121 = arith.maximumf %119, %120 : vector<1x128xf32>
    %c0_104 = arith.constant 0 : index
    %c0_105 = arith.constant 0 : index
    %122 = vector.load %arg14[%c0_104, %c0_105] : memref<128x10xf32, #tpu.memory_space<vmem>>, vector<128x10xf32>
    %cst_106 = arith.constant dense<0.000000e+00> : vector<1x10xf32>
    %123 = tpu.matmul %121, %122, %cst_106 {dimension_numbers = #tpu.dot_dimension_numbers<[1], [0], [0], [1], [0, 0, 1, 1], [], []>} : vector<1x128xf32>, vector<128x10xf32>, vector<1x10xf32> -> vector<1x10xf32>
    %c0_107 = arith.constant 0 : index
    %c0_108 = arith.constant 0 : index
    %124 = vector.load %arg15[%c0_107, %c0_108] : memref<1x10xf32, #tpu.memory_space<vmem>>, vector<1x10xf32>
    %125 = arith.addf %123, %124 : vector<1x10xf32>
    %c0_109 = arith.constant 0 : index
    %c0_110 = arith.constant 0 : index
    %c0_111 = arith.constant 0 : index
    %126 = vector.load %arg16[%c0_109, %c0_110, %c0_111] : memref<2x1x10xf32, #tpu.memory_space<vmem>>, vector<1x1x10xf32>
    %127 = vector.shape_cast %126 : vector<1x1x10xf32> to vector<1x10xf32>
    %128 = vector.shape_cast %125 : vector<1x10xf32> to vector<1x1x10xf32>
    tpu.vector_store %arg16[%c0_109, %c0_110, %c0_111], %128 {strides = array<i32>} : memref<2x1x10xf32, #tpu.memory_space<vmem>>, vector<1x1x10xf32>,
    %c1_112 = arith.constant 1 : index
    %c0_113 = arith.constant 0 : index
    %c0_114 = arith.constant 0 : index
    %129 = vector.load %arg1[%c1_112, %c0_113, %c0_114] : memref<2x32x96xf32, #tpu.memory_space<vmem>>, vector<1x32x96xf32>
    %130 = vector.shape_cast %129 : vector<1x32x96xf32> to vector<32x96xf32>
    %131 = vector.extract_strided_slice %130 {offsets = [0, 0], sizes = [28, 96], strides = [1, 1]} : vector<32x96xf32> to vector<28x96xf32>
    %c0_115 = arith.constant 0 : index
    %c0_116 = arith.constant 0 : index
    %c0_117 = arith.constant 0 : index
    %132 = vector.load %arg2[%c0_115, %c0_116, %c0_117] : memref<5x96x168xf32, #tpu.memory_space<vmem>>, vector<1x96x168xf32>
    %133 = vector.shape_cast %132 : vector<1x96x168xf32> to vector<96x168xf32>
    %cst_118 = arith.constant dense<0.000000e+00> : vector<28x168xf32>
    %134 = tpu.matmul %131, %133, %cst_118 {dimension_numbers = #tpu.dot_dimension_numbers<[1], [0], [0], [1], [0, 0, 1, 1], [], []>} : vector<28x96xf32>, vector<96x168xf32>, vector<28x168xf32> -> vector<28x168xf32>
    %135 = vector.extract_strided_slice %130 {offsets = [1, 0], sizes = [28, 96], strides = [1, 1]} : vector<32x96xf32> to vector<28x96xf32>
    %c1_119 = arith.constant 1 : index
    %c0_120 = arith.constant 0 : index
    %c0_121 = arith.constant 0 : index
    %136 = vector.load %arg2[%c1_119, %c0_120, %c0_121] : memref<5x96x168xf32, #tpu.memory_space<vmem>>, vector<1x96x168xf32>
    %137 = vector.shape_cast %136 : vector<1x96x168xf32> to vector<96x168xf32>
    %cst_122 = arith.constant dense<0.000000e+00> : vector<28x168xf32>
    %138 = tpu.matmul %135, %137, %cst_122 {dimension_numbers = #tpu.dot_dimension_numbers<[1], [0], [0], [1], [0, 0, 1, 1], [], []>} : vector<28x96xf32>, vector<96x168xf32>, vector<28x168xf32> -> vector<28x168xf32>
    %139 = arith.addf %134, %138 : vector<28x168xf32>
    %140 = vector.extract_strided_slice %130 {offsets = [2, 0], sizes = [28, 96], strides = [1, 1]} : vector<32x96xf32> to vector<28x96xf32>
    %c2_123 = arith.constant 2 : index
    %c0_124 = arith.constant 0 : index
    %c0_125 = arith.constant 0 : index
    %141 = vector.load %arg2[%c2_123, %c0_124, %c0_125] : memref<5x96x168xf32, #tpu.memory_space<vmem>>, vector<1x96x168xf32>
    %142 = vector.shape_cast %141 : vector<1x96x168xf32> to vector<96x168xf32>
    %cst_126 = arith.constant dense<0.000000e+00> : vector<28x168xf32>
    %143 = tpu.matmul %140, %142, %cst_126 {dimension_numbers = #tpu.dot_dimension_numbers<[1], [0], [0], [1], [0, 0, 1, 1], [], []>} : vector<28x96xf32>, vector<96x168xf32>, vector<28x168xf32> -> vector<28x168xf32>
    %144 = arith.addf %139, %143 : vector<28x168xf32>
    %145 = vector.extract_strided_slice %130 {offsets = [3, 0], sizes = [28, 96], strides = [1, 1]} : vector<32x96xf32> to vector<28x96xf32>
    %c3_127 = arith.constant 3 : index
    %c0_128 = arith.constant 0 : index
    %c0_129 = arith.constant 0 : index
    %146 = vector.load %arg2[%c3_127, %c0_128, %c0_129] : memref<5x96x168xf32, #tpu.memory_space<vmem>>, vector<1x96x168xf32>
    %147 = vector.shape_cast %146 : vector<1x96x168xf32> to vector<96x168xf32>
    %cst_130 = arith.constant dense<0.000000e+00> : vector<28x168xf32>
    %148 = tpu.matmul %145, %147, %cst_130 {dimension_numbers = #tpu.dot_dimension_numbers<[1], [0], [0], [1], [0, 0, 1, 1], [], []>} : vector<28x96xf32>, vector<96x168xf32>, vector<28x168xf32> -> vector<28x168xf32>
    %149 = arith.addf %144, %148 : vector<28x168xf32>
    %150 = vector.extract_strided_slice %130 {offsets = [4, 0], sizes = [28, 96], strides = [1, 1]} : vector<32x96xf32> to vector<28x96xf32>
    %c4_131 = arith.constant 4 : index
    %c0_132 = arith.constant 0 : index
    %c0_133 = arith.constant 0 : index
    %151 = vector.load %arg2[%c4_131, %c0_132, %c0_133] : memref<5x96x168xf32, #tpu.memory_space<vmem>>, vector<1x96x168xf32>
    %152 = vector.shape_cast %151 : vector<1x96x168xf32> to vector<96x168xf32>
    %cst_134 = arith.constant dense<0.000000e+00> : vector<28x168xf32>
    %153 = tpu.matmul %150, %152, %cst_134 {dimension_numbers = #tpu.dot_dimension_numbers<[1], [0], [0], [1], [0, 0, 1, 1], [], []>} : vector<28x96xf32>, vector<96x168xf32>, vector<28x168xf32> -> vector<28x168xf32>
    %154 = arith.addf %149, %153 : vector<28x168xf32>
    %c0_135 = arith.constant 0 : index
    %c0_136 = arith.constant 0 : index
    %155 = vector.load %arg3[%c0_135, %c0_136] : memref<1x168xf32, #tpu.memory_space<vmem>>, vector<1x168xf32>
    %156 = vector.broadcast %155 : vector<1x168xf32> to vector<28x168xf32>
    %157 = arith.addf %154, %156 : vector<28x168xf32>
    %cst_137 = arith.constant 0.000000e+00 : f32
    %158 = vector.broadcast %cst_137 : f32 to vector<28x168xf32>
    %159 = arith.maximumf %157, %158 : vector<28x168xf32>
    %c0_138 = arith.constant 0 : index
    %c0_139 = arith.constant 0 : index
    %c0_140 = arith.constant 0 : index
    %160 = vector.load %arg4[%c0_138, %c0_139, %c0_140] : memref<2x14x28xf32, #tpu.memory_space<vmem>>, vector<1x14x28xf32>
    %161 = vector.shape_cast %160 : vector<1x14x28xf32> to vector<14x28xf32>
    %cst_141 = arith.constant dense<0.000000e+00> : vector<14x168xf32>
    %162 = tpu.matmul %161, %159, %cst_141 {dimension_numbers = #tpu.dot_dimension_numbers<[1], [0], [0], [1], [0, 0, 1, 1], [], []>} : vector<14x28xf32>, vector<28x168xf32>, vector<14x168xf32> -> vector<14x168xf32>
    %c1_142 = arith.constant 1 : index
    %c0_143 = arith.constant 0 : index
    %c0_144 = arith.constant 0 : index
    %163 = vector.load %arg4[%c1_142, %c0_143, %c0_144] : memref<2x14x28xf32, #tpu.memory_space<vmem>>, vector<1x14x28xf32>
    %164 = vector.shape_cast %163 : vector<1x14x28xf32> to vector<14x28xf32>
    %cst_145 = arith.constant dense<0.000000e+00> : vector<14x168xf32>
    %165 = tpu.matmul %164, %159, %cst_145 {dimension_numbers = #tpu.dot_dimension_numbers<[1], [0], [0], [1], [0, 0, 1, 1], [], []>} : vector<14x28xf32>, vector<28x168xf32>, vector<14x168xf32> -> vector<14x168xf32>
    %166 = arith.maximumf %162, %165 : vector<14x168xf32>
    %c0_146 = arith.constant 0 : index
    %c0_147 = arith.constant 0 : index
    %c0_148 = arith.constant 0 : index
    %167 = vector.load %arg5[%c0_146, %c0_147, %c0_148] : memref<2x168x84xf32, #tpu.memory_space<vmem>>, vector<1x168x84xf32>
    %168 = vector.shape_cast %167 : vector<1x168x84xf32> to vector<168x84xf32>
    %cst_149 = arith.constant dense<0.000000e+00> : vector<14x84xf32>
    %169 = tpu.matmul %166, %168, %cst_149 {dimension_numbers = #tpu.dot_dimension_numbers<[1], [0], [0], [1], [0, 0, 1, 1], [], []>} : vector<14x168xf32>, vector<168x84xf32>, vector<14x84xf32> -> vector<14x84xf32>
    %c1_150 = arith.constant 1 : index
    %c0_151 = arith.constant 0 : index
    %c0_152 = arith.constant 0 : index
    %170 = vector.load %arg5[%c1_150, %c0_151, %c0_152] : memref<2x168x84xf32, #tpu.memory_space<vmem>>, vector<1x168x84xf32>
    %171 = vector.shape_cast %170 : vector<1x168x84xf32> to vector<168x84xf32>
    %cst_153 = arith.constant dense<0.000000e+00> : vector<14x84xf32>
    %172 = tpu.matmul %166, %171, %cst_153 {dimension_numbers = #tpu.dot_dimension_numbers<[1], [0], [0], [1], [0, 0, 1, 1], [], []>} : vector<14x168xf32>, vector<168x84xf32>, vector<14x84xf32> -> vector<14x84xf32>
    %173 = arith.maximumf %169, %172 : vector<14x84xf32>
    %174 = vector.extract_strided_slice %173 {offsets = [0, 0], sizes = [10, 84], strides = [1, 1]} : vector<14x84xf32> to vector<10x84xf32>
    %c0_154 = arith.constant 0 : index
    %c0_155 = arith.constant 0 : index
    %c0_156 = arith.constant 0 : index
    %175 = vector.load %arg6[%c0_154, %c0_155, %c0_156] : memref<5x84x160xf32, #tpu.memory_space<vmem>>, vector<1x84x160xf32>
    %176 = vector.shape_cast %175 : vector<1x84x160xf32> to vector<84x160xf32>
    %cst_157 = arith.constant dense<0.000000e+00> : vector<10x160xf32>
    %177 = tpu.matmul %174, %176, %cst_157 {dimension_numbers = #tpu.dot_dimension_numbers<[1], [0], [0], [1], [0, 0, 1, 1], [], []>} : vector<10x84xf32>, vector<84x160xf32>, vector<10x160xf32> -> vector<10x160xf32>
    %178 = vector.extract_strided_slice %173 {offsets = [1, 0], sizes = [10, 84], strides = [1, 1]} : vector<14x84xf32> to vector<10x84xf32>
    %c1_158 = arith.constant 1 : index
    %c0_159 = arith.constant 0 : index
    %c0_160 = arith.constant 0 : index
    %179 = vector.load %arg6[%c1_158, %c0_159, %c0_160] : memref<5x84x160xf32, #tpu.memory_space<vmem>>, vector<1x84x160xf32>
    %180 = vector.shape_cast %179 : vector<1x84x160xf32> to vector<84x160xf32>
    %cst_161 = arith.constant dense<0.000000e+00> : vector<10x160xf32>
    %181 = tpu.matmul %178, %180, %cst_161 {dimension_numbers = #tpu.dot_dimension_numbers<[1], [0], [0], [1], [0, 0, 1, 1], [], []>} : vector<10x84xf32>, vector<84x160xf32>, vector<10x160xf32> -> vector<10x160xf32>
    %182 = arith.addf %177, %181 : vector<10x160xf32>
    %183 = vector.extract_strided_slice %173 {offsets = [2, 0], sizes = [10, 84], strides = [1, 1]} : vector<14x84xf32> to vector<10x84xf32>
    %c2_162 = arith.constant 2 : index
    %c0_163 = arith.constant 0 : index
    %c0_164 = arith.constant 0 : index
    %184 = vector.load %arg6[%c2_162, %c0_163, %c0_164] : memref<5x84x160xf32, #tpu.memory_space<vmem>>, vector<1x84x160xf32>
    %185 = vector.shape_cast %184 : vector<1x84x160xf32> to vector<84x160xf32>
    %cst_165 = arith.constant dense<0.000000e+00> : vector<10x160xf32>
    %186 = tpu.matmul %183, %185, %cst_165 {dimension_numbers = #tpu.dot_dimension_numbers<[1], [0], [0], [1], [0, 0, 1, 1], [], []>} : vector<10x84xf32>, vector<84x160xf32>, vector<10x160xf32> -> vector<10x160xf32>
    %187 = arith.addf %182, %186 : vector<10x160xf32>
    %188 = vector.extract_strided_slice %173 {offsets = [3, 0], sizes = [10, 84], strides = [1, 1]} : vector<14x84xf32> to vector<10x84xf32>
    %c3_166 = arith.constant 3 : index
    %c0_167 = arith.constant 0 : index
    %c0_168 = arith.constant 0 : index
    %189 = vector.load %arg6[%c3_166, %c0_167, %c0_168] : memref<5x84x160xf32, #tpu.memory_space<vmem>>, vector<1x84x160xf32>
    %190 = vector.shape_cast %189 : vector<1x84x160xf32> to vector<84x160xf32>
    %cst_169 = arith.constant dense<0.000000e+00> : vector<10x160xf32>
    %191 = tpu.matmul %188, %190, %cst_169 {dimension_numbers = #tpu.dot_dimension_numbers<[1], [0], [0], [1], [0, 0, 1, 1], [], []>} : vector<10x84xf32>, vector<84x160xf32>, vector<10x160xf32> -> vector<10x160xf32>
    %192 = arith.addf %187, %191 : vector<10x160xf32>
    %193 = vector.extract_strided_slice %173 {offsets = [4, 0], sizes = [10, 84], strides = [1, 1]} : vector<14x84xf32> to vector<10x84xf32>
    %c4_170 = arith.constant 4 : index
    %c0_171 = arith.constant 0 : index
    %c0_172 = arith.constant 0 : index
    %194 = vector.load %arg6[%c4_170, %c0_171, %c0_172] : memref<5x84x160xf32, #tpu.memory_space<vmem>>, vector<1x84x160xf32>
    %195 = vector.shape_cast %194 : vector<1x84x160xf32> to vector<84x160xf32>
    %cst_173 = arith.constant dense<0.000000e+00> : vector<10x160xf32>
    %196 = tpu.matmul %193, %195, %cst_173 {dimension_numbers = #tpu.dot_dimension_numbers<[1], [0], [0], [1], [0, 0, 1, 1], [], []>} : vector<10x84xf32>, vector<84x160xf32>, vector<10x160xf32> -> vector<10x160xf32>
    %197 = arith.addf %192, %196 : vector<10x160xf32>
    %c0_174 = arith.constant 0 : index
    %c0_175 = arith.constant 0 : index
    %198 = vector.load %arg7[%c0_174, %c0_175] : memref<1x160xf32, #tpu.memory_space<vmem>>, vector<1x160xf32>
    %199 = vector.broadcast %198 : vector<1x160xf32> to vector<10x160xf32>
    %200 = arith.addf %197, %199 : vector<10x160xf32>
    %cst_176 = arith.constant 0.000000e+00 : f32
    %201 = vector.broadcast %cst_176 : f32 to vector<10x160xf32>
    %202 = arith.maximumf %200, %201 : vector<10x160xf32>
    %c0_177 = arith.constant 0 : index
    %c0_178 = arith.constant 0 : index
    %c0_179 = arith.constant 0 : index
    %203 = vector.load %arg8[%c0_177, %c0_178, %c0_179] : memref<2x5x10xf32, #tpu.memory_space<vmem>>, vector<1x5x10xf32>
    %204 = vector.shape_cast %203 : vector<1x5x10xf32> to vector<5x10xf32>
    %cst_180 = arith.constant dense<0.000000e+00> : vector<5x160xf32>
    %205 = tpu.matmul %204, %202, %cst_180 {dimension_numbers = #tpu.dot_dimension_numbers<[1], [0], [0], [1], [0, 0, 1, 1], [], []>} : vector<5x10xf32>, vector<10x160xf32>, vector<5x160xf32> -> vector<5x160xf32>
    %c1_181 = arith.constant 1 : index
    %c0_182 = arith.constant 0 : index
    %c0_183 = arith.constant 0 : index
    %206 = vector.load %arg8[%c1_181, %c0_182, %c0_183] : memref<2x5x10xf32, #tpu.memory_space<vmem>>, vector<1x5x10xf32>
    %207 = vector.shape_cast %206 : vector<1x5x10xf32> to vector<5x10xf32>
    %cst_184 = arith.constant dense<0.000000e+00> : vector<5x160xf32>
    %208 = tpu.matmul %207, %202, %cst_184 {dimension_numbers = #tpu.dot_dimension_numbers<[1], [0], [0], [1], [0, 0, 1, 1], [], []>} : vector<5x10xf32>, vector<10x160xf32>, vector<5x160xf32> -> vector<5x160xf32>
    %209 = arith.maximumf %205, %208 : vector<5x160xf32>
    %c0_185 = arith.constant 0 : index
    %c0_186 = arith.constant 0 : index
    %c0_187 = arith.constant 0 : index
    %210 = vector.load %arg9[%c0_185, %c0_186, %c0_187] : memref<2x160x80xf32, #tpu.memory_space<vmem>>, vector<1x160x80xf32>
    %211 = vector.shape_cast %210 : vector<1x160x80xf32> to vector<160x80xf32>
    %cst_188 = arith.constant dense<0.000000e+00> : vector<5x80xf32>
    %212 = tpu.matmul %209, %211, %cst_188 {dimension_numbers = #tpu.dot_dimension_numbers<[1], [0], [0], [1], [0, 0, 1, 1], [], []>} : vector<5x160xf32>, vector<160x80xf32>, vector<5x80xf32> -> vector<5x80xf32>
    %c1_189 = arith.constant 1 : index
    %c0_190 = arith.constant 0 : index
    %c0_191 = arith.constant 0 : index
    %213 = vector.load %arg9[%c1_189, %c0_190, %c0_191] : memref<2x160x80xf32, #tpu.memory_space<vmem>>, vector<1x160x80xf32>
    %214 = vector.shape_cast %213 : vector<1x160x80xf32> to vector<160x80xf32>
    %cst_192 = arith.constant dense<0.000000e+00> : vector<5x80xf32>
    %215 = tpu.matmul %209, %214, %cst_192 {dimension_numbers = #tpu.dot_dimension_numbers<[1], [0], [0], [1], [0, 0, 1, 1], [], []>} : vector<5x160xf32>, vector<160x80xf32>, vector<5x80xf32> -> vector<5x80xf32>
    %216 = arith.maximumf %212, %215 : vector<5x80xf32>
    %217 = vector.extract_strided_slice %216 {offsets = [0, 0], sizes = [1, 80], strides = [1, 1]} : vector<5x80xf32> to vector<1x80xf32>
    %c0_193 = arith.constant 0 : index
    %c0_194 = arith.constant 0 : index
    %c0_195 = arith.constant 0 : index
    %218 = vector.load %arg10[%c0_193, %c0_194, %c0_195] : memref<5x80x128xf32, #tpu.memory_space<vmem>>, vector<1x80x128xf32>
    %219 = vector.shape_cast %218 : vector<1x80x128xf32> to vector<80x128xf32>
    %cst_196 = arith.constant dense<0.000000e+00> : vector<1x128xf32>
    %220 = tpu.matmul %217, %219, %cst_196 {dimension_numbers = #tpu.dot_dimension_numbers<[1], [0], [0], [1], [0, 0, 1, 1], [], []>} : vector<1x80xf32>, vector<80x128xf32>, vector<1x128xf32> -> vector<1x128xf32>
    %221 = vector.extract_strided_slice %216 {offsets = [1, 0], sizes = [1, 80], strides = [1, 1]} : vector<5x80xf32> to vector<1x80xf32>
    %c1_197 = arith.constant 1 : index
    %c0_198 = arith.constant 0 : index
    %c0_199 = arith.constant 0 : index
    %222 = vector.load %arg10[%c1_197, %c0_198, %c0_199] : memref<5x80x128xf32, #tpu.memory_space<vmem>>, vector<1x80x128xf32>
    %223 = vector.shape_cast %222 : vector<1x80x128xf32> to vector<80x128xf32>
    %cst_200 = arith.constant dense<0.000000e+00> : vector<1x128xf32>
    %224 = tpu.matmul %221, %223, %cst_200 {dimension_numbers = #tpu.dot_dimension_numbers<[1], [0], [0], [1], [0, 0, 1, 1], [], []>} : vector<1x80xf32>, vector<80x128xf32>, vector<1x128xf32> -> vector<1x128xf32>
    %225 = arith.addf %220, %224 : vector<1x128xf32>
    %226 = vector.extract_strided_slice %216 {offsets = [2, 0], sizes = [1, 80], strides = [1, 1]} : vector<5x80xf32> to vector<1x80xf32>
    %c2_201 = arith.constant 2 : index
    %c0_202 = arith.constant 0 : index
    %c0_203 = arith.constant 0 : index
    %227 = vector.load %arg10[%c2_201, %c0_202, %c0_203] : memref<5x80x128xf32, #tpu.memory_space<vmem>>, vector<1x80x128xf32>
    %228 = vector.shape_cast %227 : vector<1x80x128xf32> to vector<80x128xf32>
    %cst_204 = arith.constant dense<0.000000e+00> : vector<1x128xf32>
    %229 = tpu.matmul %226, %228, %cst_204 {dimension_numbers = #tpu.dot_dimension_numbers<[1], [0], [0], [1], [0, 0, 1, 1], [], []>} : vector<1x80xf32>, vector<80x128xf32>, vector<1x128xf32> -> vector<1x128xf32>
    %230 = arith.addf %225, %229 : vector<1x128xf32>
    %231 = vector.extract_strided_slice %216 {offsets = [3, 0], sizes = [1, 80], strides = [1, 1]} : vector<5x80xf32> to vector<1x80xf32>
    %c3_205 = arith.constant 3 : index
    %c0_206 = arith.constant 0 : index
    %c0_207 = arith.constant 0 : index
    %232 = vector.load %arg10[%c3_205, %c0_206, %c0_207] : memref<5x80x128xf32, #tpu.memory_space<vmem>>, vector<1x80x128xf32>
    %233 = vector.shape_cast %232 : vector<1x80x128xf32> to vector<80x128xf32>
    %cst_208 = arith.constant dense<0.000000e+00> : vector<1x128xf32>
    %234 = tpu.matmul %231, %233, %cst_208 {dimension_numbers = #tpu.dot_dimension_numbers<[1], [0], [0], [1], [0, 0, 1, 1], [], []>} : vector<1x80xf32>, vector<80x128xf32>, vector<1x128xf32> -> vector<1x128xf32>
    %235 = arith.addf %230, %234 : vector<1x128xf32>
    %236 = vector.extract_strided_slice %216 {offsets = [4, 0], sizes = [1, 80], strides = [1, 1]} : vector<5x80xf32> to vector<1x80xf32>
    %c4_209 = arith.constant 4 : index
    %c0_210 = arith.constant 0 : index
    %c0_211 = arith.constant 0 : index
    %237 = vector.load %arg10[%c4_209, %c0_210, %c0_211] : memref<5x80x128xf32, #tpu.memory_space<vmem>>, vector<1x80x128xf32>
    %238 = vector.shape_cast %237 : vector<1x80x128xf32> to vector<80x128xf32>
    %cst_212 = arith.constant dense<0.000000e+00> : vector<1x128xf32>
    %239 = tpu.matmul %236, %238, %cst_212 {dimension_numbers = #tpu.dot_dimension_numbers<[1], [0], [0], [1], [0, 0, 1, 1], [], []>} : vector<1x80xf32>, vector<80x128xf32>, vector<1x128xf32> -> vector<1x128xf32>
    %240 = arith.addf %235, %239 : vector<1x128xf32>
    %c0_213 = arith.constant 0 : index
    %c0_214 = arith.constant 0 : index
    %241 = vector.load %arg11[%c0_213, %c0_214] : memref<1x128xf32, #tpu.memory_space<vmem>>, vector<1x128xf32>
    %242 = arith.addf %240, %241 : vector<1x128xf32>
    %cst_215 = arith.constant 0.000000e+00 : f32
    %243 = vector.broadcast %cst_215 : f32 to vector<1x128xf32>
    %244 = arith.maximumf %242, %243 : vector<1x128xf32>
    %c0_216 = arith.constant 0 : index
    %c0_217 = arith.constant 0 : index
    %245 = vector.load %arg12[%c0_216, %c0_217] : memref<128x128xf32, #tpu.memory_space<vmem>>, vector<128x128xf32>
    %cst_218 = arith.constant dense<0.000000e+00> : vector<1x128xf32>
    %246 = tpu.matmul %244, %245, %cst_218 {dimension_numbers = #tpu.dot_dimension_numbers<[1], [0], [0], [1], [0, 0, 1, 1], [], []>} : vector<1x128xf32>, vector<128x128xf32>, vector<1x128xf32> -> vector<1x128xf32>
    %c0_219 = arith.constant 0 : index
    %c0_220 = arith.constant 0 : index
    %247 = vector.load %arg13[%c0_219, %c0_220] : memref<1x128xf32, #tpu.memory_space<vmem>>, vector<1x128xf32>
    %248 = arith.addf %246, %247 : vector<1x128xf32>
    %cst_221 = arith.constant 0.000000e+00 : f32
    %249 = vector.broadcast %cst_221 : f32 to vector<1x128xf32>
    %250 = arith.maximumf %248, %249 : vector<1x128xf32>
    %c0_222 = arith.constant 0 : index
    %c0_223 = arith.constant 0 : index
    %251 = vector.load %arg14[%c0_222, %c0_223] : memref<128x10xf32, #tpu.memory_space<vmem>>, vector<128x10xf32>
    %cst_224 = arith.constant dense<0.000000e+00> : vector<1x10xf32>
    %252 = tpu.matmul %250, %251, %cst_224 {dimension_numbers = #tpu.dot_dimension_numbers<[1], [0], [0], [1], [0, 0, 1, 1], [], []>} : vector<1x128xf32>, vector<128x10xf32>, vector<1x10xf32> -> vector<1x10xf32>
    %c0_225 = arith.constant 0 : index
    %c0_226 = arith.constant 0 : index
    %253 = vector.load %arg15[%c0_225, %c0_226] : memref<1x10xf32, #tpu.memory_space<vmem>>, vector<1x10xf32>
    %254 = arith.addf %252, %253 : vector<1x10xf32>
    %c1_227 = arith.constant 1 : index
    %c0_228 = arith.constant 0 : index
    %c0_229 = arith.constant 0 : index
    %255 = vector.load %arg16[%c1_227, %c0_228, %c0_229] : memref<2x1x10xf32, #tpu.memory_space<vmem>>, vector<1x1x10xf32>
    %256 = vector.shape_cast %255 : vector<1x1x10xf32> to vector<1x10xf32>
    %257 = vector.shape_cast %254 : vector<1x10xf32> to vector<1x1x10xf32>
    tpu.vector_store %arg16[%c1_227, %c0_228, %c0_229], %257 {strides = array<i32>} : memref<2x1x10xf32, #tpu.memory_space<vmem>>, vector<1x1x10xf32>,
    return
  }
  func.func @transform_0(%arg0: i32) -> (i32, i32, i32) {
    %c0_i32 = arith.constant 0 : i32
    %c0_i32_0 = arith.constant 0 : i32
    %c0_i32_1 = arith.constant 0 : i32
    return %arg0, %c0_i32, %c0_i32_0 : i32, i32, i32
  }
  func.func @transform_1(%arg0: i32) -> (i32, i32, i32) {
    %c0_i32 = arith.constant 0 : i32
    %c0_i32_0 = arith.constant 0 : i32
    %c0_i32_1 = arith.constant 0 : i32
    %c0_i32_2 = arith.constant 0 : i32
    return %c0_i32, %c0_i32_0, %c0_i32_1 : i32, i32, i32
  }
  func.func @transform_2(%arg0: i32) -> (i32, i32) {
    %c0_i32 = arith.constant 0 : i32
    %c0_i32_0 = arith.constant 0 : i32
    %c0_i32_1 = arith.constant 0 : i32
    return %c0_i32, %c0_i32_0 : i32, i32
  }
  func.func @transform_3(%arg0: i32) -> (i32, i32, i32) {
    %c0_i32 = arith.constant 0 : i32
    %c0_i32_0 = arith.constant 0 : i32
    %c0_i32_1 = arith.constant 0 : i32
    %c0_i32_2 = arith.constant 0 : i32
    return %c0_i32, %c0_i32_0, %c0_i32_1 : i32, i32, i32
  }
  func.func @transform_4(%arg0: i32) -> (i32, i32, i32) {
    %c0_i32 = arith.constant 0 : i32
    %c0_i32_0 = arith.constant 0 : i32
    %c0_i32_1 = arith.constant 0 : i32
    %c0_i32_2 = arith.constant 0 : i32
    return %c0_i32, %c0_i32_0, %c0_i32_1 : i32, i32, i32
  }
  func.func @transform_5(%arg0: i32) -> (i32, i32, i32) {
    %c0_i32 = arith.constant 0 : i32
    %c0_i32_0 = arith.constant 0 : i32
    %c0_i32_1 = arith.constant 0 : i32
    %c0_i32_2 = arith.constant 0 : i32
    return %c0_i32, %c0_i32_0, %c0_i32_1 : i32, i32, i32
  }
  func.func @transform_6(%arg0: i32) -> (i32, i32) {
    %c0_i32 = arith.constant 0 : i32
    %c0_i32_0 = arith.constant 0 : i32
    %c0_i32_1 = arith.constant 0 : i32
    return %c0_i32, %c0_i32_0 : i32, i32
  }
  func.func @transform_7(%arg0: i32) -> (i32, i32, i32) {
    %c0_i32 = arith.constant 0 : i32
    %c0_i32_0 = arith.constant 0 : i32
    %c0_i32_1 = arith.constant 0 : i32
    %c0_i32_2 = arith.constant 0 : i32
    return %c0_i32, %c0_i32_0, %c0_i32_1 : i32, i32, i32
  }
  func.func @transform_8(%arg0: i32) -> (i32, i32, i32) {
    %c0_i32 = arith.constant 0 : i32
    %c0_i32_0 = arith.constant 0 : i32
    %c0_i32_1 = arith.constant 0 : i32
    %c0_i32_2 = arith.constant 0 : i32
    return %c0_i32, %c0_i32_0, %c0_i32_1 : i32, i32, i32
  }
  func.func @transform_9(%arg0: i32) -> (i32, i32, i32) {
    %c0_i32 = arith.constant 0 : i32
    %c0_i32_0 = arith.constant 0 : i32
    %c0_i32_1 = arith.constant 0 : i32
    %c0_i32_2 = arith.constant 0 : i32
    return %c0_i32, %c0_i32_0, %c0_i32_1 : i32, i32, i32
  }
  func.func @transform_10(%arg0: i32) -> (i32, i32) {
    %c0_i32 = arith.constant 0 : i32
    %c0_i32_0 = arith.constant 0 : i32
    %c0_i32_1 = arith.constant 0 : i32
    return %c0_i32, %c0_i32_0 : i32, i32
  }
  func.func @transform_11(%arg0: i32) -> (i32, i32) {
    %c0_i32 = arith.constant 0 : i32
    %c0_i32_0 = arith.constant 0 : i32
    %c0_i32_1 = arith.constant 0 : i32
    return %c0_i32, %c0_i32_0 : i32, i32
  }
  func.func @transform_12(%arg0: i32) -> (i32, i32) {
    %c0_i32 = arith.constant 0 : i32
    %c0_i32_0 = arith.constant 0 : i32
    %c0_i32_1 = arith.constant 0 : i32
    return %c0_i32, %c0_i32_0 : i32, i32
  }
  func.func @transform_13(%arg0: i32) -> (i32, i32) {
    %c0_i32 = arith.constant 0 : i32
    %c0_i32_0 = arith.constant 0 : i32
    %c0_i32_1 = arith.constant 0 : i32
    return %c0_i32, %c0_i32_0 : i32, i32
  }
  func.func @transform_14(%arg0: i32) -> (i32, i32) {
    %c0_i32 = arith.constant 0 : i32
    %c0_i32_0 = arith.constant 0 : i32
    %c0_i32_1 = arith.constant 0 : i32
    return %c0_i32, %c0_i32_0 : i32, i32
  }
  func.func @transform_15(%arg0: i32) -> (i32, i32, i32) {
    %c0_i32 = arith.constant 0 : i32
    %c0_i32_0 = arith.constant 0 : i32
    %c0_i32_1 = arith.constant 0 : i32
    return %arg0, %c0_i32, %c0_i32_0 : i32, i32, i32
  }
}

</mosaic_0001>

<bundles_post_ra>
// kernel: _lambda_.1
= control target key start
LH: loop header
LB: loop body
LE: loop exit
PB: predicated region body
PF: predicated region fallthrough
CT: control target
= control target key end

     0   :  { %s11518_s0 = inlined_call_operand.vmem [shape: f32[4,32,96], index: 0, kind: input, shape index: {}]   ;;  %s11519_s1 = inlined_call_operand.vmem [shape: f32[5,96,168], index: 1, kind: input, shape index: {}]   ;;  %s11520_s2 = inlined_call_operand.vmem [shape: f32[1,168], index: 2, kind: input, shape index: {}]   ;;  %s11521_s3 = inlined_call_operand.vmem [shape: f32[2,14,28], index: 3, kind: input, shape index: {}]   ;;  %s11522_s4 = inlined_call_operand.vmem [shape: f32[2,168,84], index: 4, kind: input, shape index: {}]   ;;  %s11523_s5 = inlined_call_operand.vmem [shape: f32[5,84,160], index: 5, kind: input, shape index: {}]   ;;  %s11524_s6 = inlined_call_operand.vmem [shape: f32[1,160], index: 6, kind: input, shape index: {}]   ;;  %s11525_s7 = inlined_call_operand.vmem [shape: f32[2,5,10], index: 7, kind: input, shape index: {}]   ;;  %s11526_s8 = inlined_call_operand.vmem [shape: f32[2,160,80], index: 8, kind: input, shape index: {}]   ;;  %s11527_s9 = inlined_call_operand.vmem [shape: f32[5,80,128], index: 9, kind: input, shape index: {}]   ;;  %s11528_s10 = inlined_call_operand.vmem [shape: f32[1,128], index: 10, kind: input, shape index: {}]   ;;  %s11529_s11 = inlined_call_operand.vmem [shape: f32[128,128], index: 11, kind: input, shape index: {}]   ;;  %s11530_s12 = inlined_call_operand.vmem [shape: f32[1,128], index: 12, kind: input, shape index: {}]   ;;  %s11531_s13 = inlined_call_operand.vmem [shape: f32[128,10], index: 13, kind: input, shape index: {}]   ;;  %s11532_s14 = inlined_call_operand.vmem [shape: f32[1,10], index: 14, kind: input, shape index: {}]   ;;  %s11533_s15 = inlined_call_operand.hbm [shape: f32[4,1,10], index: 15, kind: output, shape index: {}]  }
   0x1   :  { %11541 = sst [smem:[#allocation11_spill]] %s11533_s15 }
   0x2   :  { %20 = vsyncpa [#allocation3], 0 }
   0x3   :  { %22 = vsyncpa [#allocation3 + $0x1], 0  ;;  %s8328_s18 = smov 0   ;;  %s8330_s19 = smov 0  }
   0x4   :  { %s8332_s20 = smov 0   ;;  %s8334_s21 = smov 0  }
   0x5 LB: > { %11542 = sst [smem:[#allocation5_spill]] %s8227_s18  ;;  %s8349_s22 = sadd.s32 4294967295, %s8239_s21   ;;  %s8239_s21 = sphi %s8334_s21, %s11558_s21   ;;  %s8235_s20 = sphi %s8332_s20, %s11560_s20   ;;  %s8231_s19 = sphi %s8330_s19, %s11562_s19   ;;  %s8227_s18 = sphi %s8328_s18, %s11561_s18  }
   0x6   : > { %11543 = sst [smem:[#allocation6_spill]] %s8235_s20  ;;  %s5812_s23 = sadd.s32 4294967294, %s8239_s21  }
   0x7   : > { %11544 = sst [smem:[#allocation7_spill]] %s8239_s21  ;;  %s8353_s24 = sadd.s32 1, %s8239_s21  }
   0x8   : > { %11545 = sst [smem:[#allocation8_spill]] %s8353_s24  ;;  %s355_s25 = sadd.s32 1, %s8235_s20 }
   0x9   : > { %s352_s26 = ssub.s32 %s8239_s21, %s8353_s24  ;;  %p365_p0 = scmp.ne.s32.totalorder %s8235_s20, %s8231_s19 }
   0xa   : > { %p353_p1 = scmp.eq.s32.totalorder %s352_s26, 0  ;;  %p366_p2 = scmp.eq.s32.totalorder %s8349_s22, 1 }
   0xb   : > { %p371_p3 = scmp.ne.s32.totalorder %s8231_s19, %s8227_s18  ;;  %p372_p4 = scmp.eq.s32.totalorder %s5812_s23, 1 }
   0xc   : > { %s8364_s27 = scalar_select %p353_p1, %s8235_s20, %s355_s25  }
   0xd   : > { %p8366_p5 = por %p366_p2, %p365_p0  ;;  %p8370_p6 = por %p372_p4, %p371_p3 }
   0xe   : > { %11546 = sst [smem:[#allocation9_spill]] %s8364_s27  ;;  %p5815_p7 = scmp.ge.s32.totalorder %s8239_s21, 1 }
   0xf   : > { %s11548_s29 = scalar_select %p8370_p6, 1, 0 }
  0x10   : > { %p442_p8 = scmp.lt.s32.totalorder %s8239_s21, 3 }
  0x11   : > { %11549 = sst [smem:[#allocation10_spill]] %s11548_s29 }
  0x12   : > { %p443_p9 = pnand %p5815_p7, %p442_p8 }
  0x13   : > { %v5821_v0 = vld [vmem:[%s11519_s1 + $0xc8] sm:$0xff] (!%p443_p9)  ;;  %v5823_v1 = vld [vmem:[%s11519_s1 + $0xd8] sm:$0xff] (!%p443_p9)  ;;  %v5820_v2 = vld [vmem:[%s11519_s1 + $0xc0] sm:$0xff] (!%p443_p9)  ;;  %s5817_s27 = sshll.u32 (!%p443_p9), %s8349_s22, 1  ;;  %v8241_v7 = vmov (!%p443_p9), 0.0   ;;  %vm922_vm0 = vcmask (!%p443_p9), 1044480  }
  0x14   : > { %446 = sbr.rel (%p443_p9) target bundleno = 4241 (0x1091), region = 80  ;;  %v7046_v3 = vpack.c.bf16 (!%p443_p9), %v5823_v1, %v5821_v0  ;;  %v5822_v4 = vld [vmem:[%s11519_s1 + $0xd0] sm:$0xff] (!%p443_p9)  ;;  %v5825_v5 = vld [vmem:[%s11519_s1 + $0xe8] sm:$0xff] (!%p443_p9)  ;;  %v5827_v6 = vld [vmem:[%s11519_s1 + $0xf8] sm:$0xff] (!%p443_p9)  ;;  %637 = vmatprep.mubr.f32.mxu0 (!%p443_p9), %v8241_v7  ;;  %p492_p10 = scmp.lt.s32.totalorder (!%p443_p9), %s5817_s27, 3  ;;  %1280 = vmatprep.mubr.f32.mxu1 (!%p443_p9), %v8241_v7  ;;  %vm1060_vm1 = vcmask (!%p443_p9), 1043456  }
  0x15   : > { %v7048_v8 = vpack.c.bf16 (!%p443_p9), %v5822_v4, %v5820_v2  ;;  %v7050_v9 = vpack.c.bf16 (!%p443_p9), %v5827_v6, %v5825_v5  ;;  %v5824_v10 = vld [vmem:[%s11519_s1 + $0xe0] sm:$0xff] (!%p443_p9)  ;;  %v5826_v11 = vld [vmem:[%s11519_s1 + $0xf0] sm:$0xff] (!%p443_p9)  ;;  %v5829_v12 = vld [vmem:[%s11519_s1 + $0x108] sm:$0xff] (!%p443_p9)  ;;  %vm556_vm2 = vcmask (!%p443_p9), 1046528   ;;  %vm564_vm3 = vcmask (!%p443_p9), 785408   ;;  %s488_s18 = sand.u32 (!%p443_p9), 1, %s8231_s19  }
  0x16   : > { %7047 = vmatprep.subr.bf16.mxu0 (!%p443_p9), %v7046_v3  ;;  %v5831_v13 = vld [vmem:[%s11519_s1 + $0x118] sm:$0xff] (!%p443_p9)  ;;  %v7052_v14 = vpack.c.bf16 (!%p443_p9), %v5826_v11, %v5824_v10  ;;  %v5828_v16 = vld [vmem:[%s11519_s1 + $0x100] sm:$0xff] (!%p443_p9)  ;;  %v5830_v17 = vld [vmem:[%s11519_s1 + $0x110] sm:$0xff] (!%p443_p9)  ;;  %vm784_vm4 = vcmask (!%p443_p9), 1045504   ;;  %vm8243_vm5 = vmmov (!%p443_p9), 1   ;;  %vm1203_vm7 = vcmask (!%p443_p9), 228352  }
  0x17   : > { %7049 = vmatpush1.bf16.msra.mxu0 (!%p443_p9), %v7048_v8  ;;  %v7054_v15 = vpack.c.bf16 (!%p443_p9), %v5831_v13, %v5829_v12  ;;  %v5833_v18 = vld [vmem:[%s11519_s1 + $0x128] sm:$0xff] (!%p443_p9)  ;;  %v5835_v19 = vld [vmem:[%s11519_s1 + $0x138] sm:$0xff] (!%p443_p9)  ;;  %v7056_v20 = vpack.c.bf16 (!%p443_p9), %v5830_v17, %v5828_v16  ;;  %v5832_v23 = vld [vmem:[%s11519_s1 + $0x120] sm:$0xff] (!%p443_p9)  ;;  %vm1404_vm8 = vcmask (!%p443_p9), 326656   ;;  %vm1635_vm9 = vcmask (!%p443_p9), 687104   ;;  %s5816_s29 = sshll.u32 (!%p443_p9), %s488_s18, 1 }
  0x18   : > { %7051 = vmatprep.subr.bf16.mxu0 (!%p443_p9), %v7050_v9  ;;  %v7058_v22 = vpack.c.bf16 (!%p443_p9), %v5835_v19, %v5833_v18  ;;  %v5834_v24 = vld [vmem:[%s11519_s1 + $0x130] sm:$0xff] (!%p443_p9)  ;;  %v5837_v27 = vld [vmem:[%s11519_s1 + $0x148] sm:$0xff] (!%p443_p9)  ;;  %v5839_v28 = vld [vmem:[%s11519_s1 + $0x158] sm:$0xff] (!%p443_p9)  ;;  %vm2186_vm10 = vcmask (!%p443_p9), 1041408   ;;  %vm2182_vm12 = vcmask (!%p443_p9), 80896   ;;  %vm2362_vm13 = vcmask (!%p443_p9), 261120  }
  0x19   : > { %v7060_v32 = vpack.c.bf16 (!%p443_p9), %v5834_v24, %v5832_v23  ;;  %v7062_v33 = vpack.c.bf16 (!%p443_p9), %v5839_v28, %v5837_v27  ;;  %v5836_v34 = vld [vmem:[%s11519_s1 + $0x140] sm:$0xff] (!%p443_p9)  ;;  %v5838_v35 = vld [vmem:[%s11519_s1 + $0x150] sm:$0xff] (!%p443_p9)  ;;  %v5841_v39 = vld [vmem:[%s11519_s1 + $0x168] sm:$0xff] (!%p443_p9)  ;;  %vm8244_vm14 = vmmov (!%p443_p9), 0   ;;  %vm2551_vm15 = vcmask (!%p443_p9), 654336   ;;  %s6497_s16 = sshll.u32 (!%p443_p9), %s8349_s22, 5 }
  0x1a   : > { %v5843_v40 = vld [vmem:[%s11519_s1 + $0x178] sm:$0xff] (!%p443_p9)  ;;  %v7064_v43 = vpack.c.bf16 (!%p443_p9), %v5838_v35, %v5836_v34  ;;  %v5840_v46 = vld [vmem:[%s11519_s1 + $0x160] sm:$0xff] (!%p443_p9)  ;;  %v5842_v47 = vld [vmem:[%s11519_s1 + $0x170] sm:$0xff] (!%p443_p9)  ;;  %s11554_s24 = sld [smem:[#allocation11_spill]] (!%p443_p9)  ;;  %s11477_s22 = scalar_lea.sflag (!%p443_p9), [#allocation3], %s488_s18 }
  0x1b   : > { %s11564_s27 = smov (!%p492_p10, %s5817_s27), 3  ;;  %7053 = vmatpush1.bf16.msra.mxu0 %v7052_v14  ;;  %v7066_v45 = vpack.c.bf16 %v5843_v40, %v5841_v39  ;;  %v504_v50 = vld [vmem:[%s11519_s1 + $0x8] sm:$0xff]  ;;  %v506_v51 = vld [vmem:[%s11519_s1 + $0x18] sm:$0xff]  ;;  %v7068_v55 = vpack.c.bf16 %v5842_v47, %v5840_v46  ;;  %v503_v59 = vld [vmem:[%s11519_s1] sm:$0xff]  ;;  %s8245_s26 = smov [#allocation2]  }
  0x1c   : > { %s6496_s20 = sshll.u32 %s11564_s27, 5  ;;  %7055 = vmatprep.subr.bf16.mxu0 %v7054_v15  ;;  %v7070_v58 = vpack.c.bf16 %v506_v51, %v504_v50  ;;  %v505_v60 = vld [vmem:[%s11519_s1 + $0x10] sm:$0xff]  ;;  %v508_v62 = vld [vmem:[%s11519_s1 + $0x28] sm:$0xff]  ;;  %v510_v63 = vld [vmem:[%s11519_s1 + $0x38] sm:$0xff]  ;;  %s8181_s27 = sshll.u32 %s8245_s26, 4  ;;  %s8182_s27 = int_to_ptr.vmem [resolvable:$false] %s8181_s27 }
  0x1d   : > { %s8424_s15 = scalar_lea.vmem %s11518_s0, %s6496_s20  ;;  %v7072_v1 = vpack.c.bf16 %v505_v60, %v503_v59  ;;  %v7074_v3 = vpack.c.bf16 %v510_v63, %v508_v62  ;;  %v507_v4 = vld [vmem:[%s11519_s1 + $0x20] sm:$0xff]  ;;  %v509_v5 = vld [vmem:[%s11519_s1 + $0x30] sm:$0xff]  ;;  %v512_v6 = vld [vmem:[%s11519_s1 + $0x48] sm:$0xff]  ;;  %s8183_s17 = scalar_lea.vmem %s8182_s27, 64 }
  0x1e   : > { %v8427_v21 = vld [vmem:[%s8424_s15] sm:$0xff]  ;;  %v8436_v25 = vld [vmem:[%s8424_s15 + $0x8] sm:$0xff]  ;;  %v8455_v36 = vld [vmem:[%s8424_s15 + $0x10] sm:$0xff]  ;;  %v7076_v9 = vpack.c.bf16 %v509_v5, %v507_v4 }
  0x1f   : > { %v923_v26 = vrot.slane %v8427_v21, 3  ;;  %v924_v29 = vrot.slane %v8436_v25, 3  ;;  %v1061_v30 = vrot.slane %v8427_v21, 4  ;;  %v1062_v31 = vrot.slane %v8436_v25, 4  ;;  %7057 = vmatpush1.bf16.msra.mxu0 %v7056_v20  ;;  %v8472_v44 = vld [vmem:[%s8424_s15 + $0x18] sm:$0xff]  ;;  %v511_v13 = vld [vmem:[%s11519_s1 + $0x40] sm:$0xff]  ;;  %vm8865_vm6 = vmpackc.low %vm1060_vm1, %vm8243_vm5 }
  0x20   : > { %7059 = vmatprep.subr.bf16.mxu0 %v7058_v22  ;;  %v926_v41 = vrot.slane %v8455_v36, 3  ;;  %v1064_v42 = vrot.slane %v8455_v36, 4  ;;  %v928_v49 = vrot.slane %v8472_v44, 3  ;;  %v1066_v54 = vrot.slane %v8472_v44, 4  ;;  %v514_v8 = vld [vmem:[%s11519_s1 + $0x58] sm:$0xff]  ;;  %v513_v14 = vld [vmem:[%s11519_s1 + $0x50] sm:$0xff]  ;;  %vm9510_vm11 = vmpackc.low %vm2186_vm10, %vm8243_vm5 }
  0x21   : > { %v8458_v37 = vsel %vm922_vm0, %v923_v26, %v924_v29  ;;  %v8461_v38 = vsel %vm1060_vm1, %v1061_v30, %v1062_v31  ;;  %v557_v56 = vrot.slane %v8427_v21, 1  ;;  %v558_v57 = vrot.slane %v8436_v25, 1  ;;  %v516_v15 = vld [vmem:[%s11519_s1 + $0x68] sm:$0xff]  ;;  %v518_v16 = vld [vmem:[%s11519_s1 + $0x78] sm:$0xff]  ;;  %v515_v20 = vld [vmem:[%s11519_s1 + $0x60] sm:$0xff] }
  0x22   : > { %v8481_v48 = vsel %vm922_vm0, %v924_v29, %v926_v41  ;;  %v8491_v52 = vsel %vm1060_vm1, %v1062_v31, %v1064_v42  ;;  %v8496_v53 = vsel %vm922_vm0, %v926_v41, %v928_v49  ;;  %v8510_v61 = vsel %vm1060_vm1, %v1064_v42, %v1066_v54  ;;  %v517_v22 = vld [vmem:[%s11519_s1 + $0x70] sm:$0xff]  ;;  %v520_v23 = vld [vmem:[%s11519_s1 + $0x88] sm:$0xff]  ;;  %v522_v24 = vld [vmem:[%s11519_s1 + $0x98] sm:$0xff] }
  0x23   : > { %7061 = vmatpush1.bf16.msra.mxu0 %v7060_v32  ;;  %v559_v0 = vsel %vm556_vm2, %v557_v56, %v558_v57  ;;  %v560_v2 = vrot.slane %v8455_v36, 1  ;;  %v562_v11 = vrot.slane %v8472_v44, 1  ;;  %v7078_v12 = vpack.c.bf16 %v514_v8, %v512_v6  ;;  %v519_v28 = vld [vmem:[%s11519_s1 + $0x80] sm:$0xff]  ;;  %v521_v29 = vld [vmem:[%s11519_s1 + $0x90] sm:$0xff]  ;;  %v524_v30 = vld [vmem:[%s11519_s1 + $0xa8] sm:$0xff] }
  0x24   : > { %7063 = vmatprep.subr.bf16.mxu0 %v7062_v33  ;;  %v7080_v17 = vpack.c.bf16 %v513_v14, %v511_v13  ;;  %v7082_v19 = vpack.c.bf16 %v518_v16, %v516_v15  ;;  %v7084_v26 = vpack.c.bf16 %v517_v22, %v515_v20  ;;  %v7086_v27 = vpack.c.bf16 %v522_v24, %v520_v23  ;;  %v526_v31 = vld [vmem:[%s11519_s1 + $0xb8] sm:$0xff]  ;;  %v523_v34 = vld [vmem:[%s11519_s1 + $0xa0] sm:$0xff]  ;;  %v525_v35 = vld [vmem:[%s11519_s1 + $0xb0] sm:$0xff] }
  0x25   : > { %v561_v10 = vsel %vm556_vm2, %v558_v57, %v560_v2  ;;  %v563_v18 = vsel %vm556_vm2, %v560_v2, %v562_v11  ;;  %v7088_v32 = vpack.c.bf16 %v521_v29, %v519_v28  ;;  %v7090_v33 = vpack.c.bf16 %v526_v31, %v524_v30  ;;  %v5853_v39 = vld [vmem:[%s11519_s1 + $0x188] sm:$0xff]  ;;  %v5855_v40 = vld [vmem:[%s11519_s1 + $0x198] sm:$0xff]  ;;  %v5858_v56 = vld [vmem:[%s11519_s1 + $0x1b0] sm:$0xff] }
  0x26   : > { %v7092_v41 = vpack.c.bf16 %v525_v35, %v523_v34  ;;  %v7094_v42 = vpack.c.bf16 %v5855_v40, %v5853_v39  ;;  %v5857_v46 = vld [vmem:[%s11519_s1 + $0x1a8] sm:$0xff]  ;;  %v5859_v47 = vld [vmem:[%s11519_s1 + $0x1b8] sm:$0xff]  ;;  %v5860_v62 = vld [vmem:[%s11519_s1 + $0x1c0] sm:$0xff]  ;;  %v785_v23 = vrot.slane %v8427_v21, 2  ;;  %v786_v24 = vrot.slane %v8436_v25, 2 }
  0x27   : > { %7065 = vmatpush1.bf16.msra.mxu0 %v7064_v43  ;;  %v5852_v43 = vld [vmem:[%s11519_s1 + $0x180] sm:$0xff]  ;;  %v7098_v51 = vpack.c.bf16 %v5859_v47, %v5857_v46  ;;  %v5861_v57 = vld [vmem:[%s11519_s1 + $0x1c8] sm:$0xff]  ;;  %v5862_v63 = vld [vmem:[%s11519_s1 + $0x1d0] sm:$0xff]  ;;  %v788_v31 = vrot.slane %v8455_v36, 2 }
  0x28   : > { %7067 = vmatprep.subr.bf16.mxu0 %v7066_v45  ;;  %v5854_v45 = vld [vmem:[%s11519_s1 + $0x190] sm:$0xff]  ;;  %v7104_v2 = vpack.c.bf16 %v5862_v63, %v5860_v62  ;;  %v5864_v4 = vld [vmem:[%s11519_s1 + $0x1e0] sm:$0xff]  ;;  %v5869_v6 = vld [vmem:[%s11519_s1 + $0x208] sm:$0xff] }
  0x29   : > { %v7096_v50 = vpack.c.bf16 %v5854_v45, %v5852_v43  ;;  %v5866_v5 = vld [vmem:[%s11519_s1 + $0x1f0] sm:$0xff]  ;;  %v5871_v8 = vld [vmem:[%s11519_s1 + $0x218] sm:$0xff]  ;;  %v5873_v13 = vld [vmem:[%s11519_s1 + $0x228] sm:$0xff]  ;;  %v789_v40 = vsel %vm784_vm4, %v786_v24, %v788_v31 }
  0x2a   : > { %v5875_v14 = vld [vmem:[%s11519_s1 + $0x238] sm:$0xff]  ;;  %v5882_v28 = vld [vmem:[%s11519_s1 + $0x250] sm:$0xff]  ;;  %v5885_v29 = vld [vmem:[%s11519_s1 + $0x268] sm:$0xff] }
  0x2b   : > { %7069 = vmatpush1.bf16.msra.mxu0 %v7068_v55  ;;  %v5856_v55 = vld [vmem:[%s11519_s1 + $0x1a0] sm:$0xff]  ;;  %v7114_v16 = vpack.c.bf16 %v5875_v14, %v5873_v13  ;;  %v5883_v20 = vld [vmem:[%s11519_s1 + $0x258] sm:$0xff]  ;;  %v5886_v34 = vld [vmem:[%s11519_s1 + $0x270] sm:$0xff] }
  0x2c   : > { %7071 = vmatprep.subr.bf16.mxu0 %v7070_v58  ;;  %v5863_v58 = vld [vmem:[%s11519_s1 + $0x1d8] sm:$0xff]  ;;  %v7100_v59 = vpack.c.bf16 %v5858_v56, %v5856_v55  ;;  %v5889_v35 = vld [vmem:[%s11519_s1 + $0x288] sm:$0xff]  ;;  %v5888_v43 = vld [vmem:[%s11519_s1 + $0x280] sm:$0xff] }
  0x2d   : > { %v7102_v60 = vpack.c.bf16 %v5863_v58, %v5861_v57  ;;  %v5891_v39 = vld [vmem:[%s11519_s1 + $0x298] sm:$0xff]  ;;  %v5890_v45 = vld [vmem:[%s11519_s1 + $0x290] sm:$0xff]  ;;  %v5893_v46 = vld [vmem:[%s11519_s1 + $0x2a8] sm:$0xff] }
  0x2e   : > { %5844 = vmatmul.mubr.msk.f32.vlgmr.msra.gmra.mrb[0].mxu0 %vm564_vm3, %v559_v0  ;;  %v5865_v0 = vld [vmem:[%s11519_s1 + $0x1e8] sm:$0xff]  ;;  %v5895_v47 = vld [vmem:[%s11519_s1 + $0x2b8] sm:$0xff]  ;;  %v5892_v56 = vld [vmem:[%s11519_s1 + $0x2a0] sm:$0xff] }
  0x2f   : > { %7073 = vmatpush1.bf16.msra.mxu0 %v7072_v1  ;;  %643 = vmatprep.mubr.f32.mxu0 %v8241_v7  ;;  %v5867_v1 = vld [vmem:[%s11519_s1 + $0x1f8] sm:$0xff]  ;;  %v7130_v55 = vpack.c.bf16 %v5895_v47, %v5893_v46  ;;  %v5894_v57 = vld [vmem:[%s11519_s1 + $0x2b0] sm:$0xff]  ;;  %v5897_v58 = vld [vmem:[%s11519_s1 + $0x2c8] sm:$0xff] }
  0x30   : > { %7075 = vmatprep.subr.bf16.mxu0 %v7074_v3  ;;  %v7106_v3 = vpack.c.bf16 %v5867_v1, %v5865_v0  ;;  %v5896_v63 = vld [vmem:[%s11519_s1 + $0x2c0] sm:$0xff]  ;;  %v5898_v0 = vld [vmem:[%s11519_s1 + $0x2d0] sm:$0xff]  ;;  %v5901_v1 = vld [vmem:[%s11519_s1 + $0x2e8] sm:$0xff] }
  0x31   : > { %v5910_v13 = vld [vmem:[%s11519_s1 + $0x310] sm:$0xff]  ;;  %v5913_v14 = vld [vmem:[%s11519_s1 + $0x328] sm:$0xff] }
  0x32   : > { %5845 = vmatmul.mubr.msk.f32.gmra.mrb[2].mxu0 %vm564_vm3, %v561_v10  ;;  %v7110_v10 = vpack.c.bf16 %v5871_v8, %v5869_v6  ;;  %v5902_v6 = vld [vmem:[%s11519_s1 + $0x2f0] sm:$0xff]  ;;  %v5909_v8 = vld [vmem:[%s11519_s1 + $0x308] sm:$0xff] }
  0x33   : > { %7077 = vmatpush1.bf16.msra.mxu0 %v7076_v9  ;;  %649 = vmatprep.mubr.f32.mxu0 %v8241_v7  ;;  %v7108_v9 = vpack.c.bf16 %v5866_v5, %v5864_v4  ;;  %v5900_v5 = vld [vmem:[%s11519_s1 + $0x2e0] sm:$0xff] }
  0x34   : > { %7079 = vmatprep.subr.bf16.mxu0 %v7078_v12  ;;  %v5870_v12 = vld [vmem:[%s11519_s1 + $0x210] sm:$0xff] }
  0x36   : > { %5846 = vmatmul.mubr.msk.f32.gmra.mrb[4].mxu0 %vm564_vm3, %v563_v18  ;;  %v5874_v18 = vld [vmem:[%s11519_s1 + $0x230] sm:$0xff] }
  0x37   : > { %7081 = vmatpush1.bf16.msra.mxu0 %v7080_v17  ;;  %655 = vmatprep.mubr.f32.mxu0 %v8241_v7  ;;  %v5872_v17 = vld [vmem:[%s11519_s1 + $0x220] sm:$0xff] }
  0x38   : > { %7083 = vmatprep.subr.bf16.mxu0 %v7082_v19  ;;  %v5881_v19 = vld [vmem:[%s11519_s1 + $0x248] sm:$0xff]  ;;  %v7116_v22 = vpack.c.bf16 %v5874_v18, %v5872_v17  ;;  %v5912_v18 = vld [vmem:[%s11519_s1 + $0x320] sm:$0xff] }
  0x3a   : > { %5847 = vmatmul.mubr.msk.f32.gmra.mrb[6].mxu0 %vm564_vm3, %v562_v11  ;;  %v5868_v11 = vld [vmem:[%s11519_s1 + $0x200] sm:$0xff] }
  0x3b   : > { %7085 = vmatpush1.bf16.msra.mxu0 %v7084_v26  ;;  %734 = vmatprep.mubr.f32.mxu0 %v8241_v7  ;;  %v7112_v15 = vpack.c.bf16 %v5870_v12, %v5868_v11  ;;  %v7118_v26 = vpack.c.bf16 %v5883_v20, %v5881_v19  ;;  %v5908_v12 = vld [vmem:[%s11519_s1 + $0x300] sm:$0xff]  ;;  %v5914_v19 = vld [vmem:[%s11519_s1 + $0x330] sm:$0xff]  ;;  %v5917_v20 = vld [vmem:[%s11519_s1 + $0x348] sm:$0xff] }
  0x3c   : > { %7087 = vmatprep.subr.bf16.mxu0 %v7086_v27  ;;  %v5880_v27 = vld [vmem:[%s11519_s1 + $0x240] sm:$0xff] }
  0x3d   : > { %v7120_v30 = vpack.c.bf16 %v5882_v28, %v5880_v27  ;;  %v5918_v27 = vld [vmem:[%s11519_s1 + $0x350] sm:$0xff]  ;;  %v5921_v28 = vld [vmem:[%s11519_s1 + $0x368] sm:$0xff] }
  0x3f   : > { %7089 = vmatpush1.bf16.msra.mxu0 %v7088_v32 }
  0x40   : > { %7091 = vmatprep.subr.bf16.mxu0 %v7090_v33  ;;  %v5884_v33 = vld [vmem:[%s11519_s1 + $0x260] sm:$0xff] }
  0x43   : > { %7093 = vmatpush1.bf16.msra.mxu0 %v7092_v41  ;;  %v790_v41 = vrot.slane %v8472_v44, 2 }
  0x44   : > { %7095 = vmatprep.subr.bf16.mxu0 %v7094_v42  ;;  %v7126_v42 = vpack.c.bf16 %v5891_v39, %v5889_v35  ;;  %v5926_v35 = vld [vmem:[%s11519_s1 + $0x390] sm:$0xff]  ;;  %v5929_v39 = vld [vmem:[%s11519_s1 + $0x3a8] sm:$0xff] }
  0x46   : > { %5848 = vmatmul.mubr.msk.f32.vlgmr.msra.gmra.mrb[0].mxu0 %vm564_vm3, %v8427_v21  ;;  %v5887_v21 = vld [vmem:[%s11519_s1 + $0x278] sm:$0xff] }
  0x47   : > { %7097 = vmatpush1.bf16.msra.mxu0 %v7096_v50  ;;  %740 = vmatprep.mubr.f32.mxu0 %v8241_v7  ;;  %v7122_v32 = vpack.c.bf16 %v5887_v21, %v5885_v29  ;;  %v7128_v50 = vpack.c.bf16 %v5890_v45, %v5888_v43 }
  0x48   : > { %7099 = vmatprep.subr.bf16.mxu0 %v7098_v51  ;;  %v791_v51 = vsel %vm784_vm4, %v788_v31, %v790_v41  ;;  %v5925_v31 = vld [vmem:[%s11519_s1 + $0x388] sm:$0xff] }
  0x4a   : > { %5849 = vmatmul.mubr.msk.f32.gmra.mrb[2].mxu0 %vm564_vm3, %v8436_v25  ;;  %v787_v25 = vsel %vm784_vm4, %v785_v23, %v786_v24  ;;  %v7148_v23 = vpack.c.bf16 %v5914_v19, %v5912_v18  ;;  %v1201_v19 = vld [vmem:[%s11521_s3] sm:$0xff] }
  0x4b   : > { %7101 = vmatpush1.bf16.msra.mxu0 %v7100_v59  ;;  %746 = vmatprep.mubr.f32.mxu0 %v8241_v7  ;;  %v5899_v59 = vld [vmem:[%s11519_s1 + $0x2d8] sm:$0xff] }
  0x4c   : > { %7103 = vmatprep.subr.bf16.mxu0 %v7102_v60  ;;  %v7132_v60 = vpack.c.bf16 %v5894_v57, %v5892_v56  ;;  %v7134_v62 = vpack.c.bf16 %v5899_v59, %v5897_v58 }
  0x4e   : > { %5850 = vmatmul.mubr.msk.f32.gmra.mrb[4].mxu0 %vm564_vm3, %v8455_v36  ;;  %v7124_v36 = vpack.c.bf16 %v5886_v34, %v5884_v33  ;;  %v5924_v34 = vld [vmem:[%s11519_s1 + $0x380] sm:$0xff] }
  0x4f   : > { %7105 = vmatpush1.bf16.msra.mxu0 %v7104_v2  ;;  %752 = vmatprep.mubr.f32.mxu0 %v8241_v7  ;;  %v5903_v2 = vld [vmem:[%s11519_s1 + $0x2f8] sm:$0xff] }
  0x50   : > { %7107 = vmatprep.subr.bf16.mxu0 %v7106_v3  ;;  %v7136_v3 = vpack.c.bf16 %v5898_v0, %v5896_v63  ;;  %v7138_v4 = vpack.c.bf16 %v5903_v2, %v5901_v1 }
  0x52   : > { %5851 = vmatmul.mubr.msk.f32.gmra.mrb[6].mxu0 %vm564_vm3, %v8472_v44 }
  0x53   : > { %7109 = vmatpush1.bf16.msra.mxu0 %v7108_v9  ;;  %864 = vmatprep.mubr.f32.mxu0 %v8241_v7  ;;  %v5911_v9 = vld [vmem:[%s11519_s1 + $0x318] sm:$0xff] }
  0x54   : > { %7111 = vmatprep.subr.bf16.mxu0 %v7110_v10  ;;  %v7140_v10 = vpack.c.bf16 %v5902_v6, %v5900_v5  ;;  %v7142_v11 = vpack.c.bf16 %v5911_v9, %v5909_v8 }
  0x57   : > { %7113 = vmatpush1.bf16.msra.mxu0 %v7112_v15  ;;  %v5915_v15 = vld [vmem:[%s11519_s1 + $0x338] sm:$0xff] }
  0x58   : > { %7115 = vmatprep.subr.bf16.mxu0 %v7114_v16  ;;  %v7144_v16 = vpack.c.bf16 %v5910_v13, %v5908_v12  ;;  %v7146_v17 = vpack.c.bf16 %v5915_v15, %v5913_v14 }
  0x5b   : > { %7117 = vmatpush1.bf16.msra.mxu0 %v7116_v22  ;;  %v5919_v22 = vld [vmem:[%s11519_s1 + $0x358] sm:$0xff] }
  0x5c   : > { %7119 = vmatprep.subr.bf16.mxu0 %v7118_v26  ;;  %v7150_v24 = vpack.c.bf16 %v5919_v22, %v5917_v20  ;;  %v5916_v26 = vld [vmem:[%s11519_s1 + $0x340] sm:$0xff]  ;;  %v1202_v20 = vld [vmem:[%s11521_s3 + $0x8] sm:$0x3f] }
  0x5d   : > { %v7152_v29 = vpack.c.bf16 %v5918_v27, %v5916_v26  ;;  %v1383_v22 = vld [vmem:[%s11522_s4] sm:$0xff]  ;;  %v1385_v27 = vld [vmem:[%s11522_s4 + $0x10] sm:$0xff] }
  0x5e   : > { %5876 = vmatmul.mubr.msk.f32.vlgmr.msra.gmra.mrb[0].mxu0 %vm564_vm3, %v787_v25  ;;  %v5920_v25 = vld [vmem:[%s11519_s1 + $0x360] sm:$0xff] }
  0x5f   : > { %7121 = vmatpush1.bf16.msra.mxu0 %v7120_v30  ;;  %870 = vmatprep.mubr.f32.mxu0 %v8241_v7  ;;  %v5922_v30 = vld [vmem:[%s11519_s1 + $0x370] sm:$0xff] }
  0x60   : > { %7123 = vmatprep.subr.bf16.mxu0 %v7122_v32  ;;  %v7156_v32 = vpack.c.bf16 %v5922_v30, %v5920_v25  ;;  %v1388_v25 = vld [vmem:[%s11522_s4 + $0x28] sm:$0xff] }
  0x62   : > { %5877 = vmatmul.mubr.msk.f32.gmra.mrb[2].mxu0 %vm564_vm3, %v789_v40 }
  0x63   : > { %7125 = vmatpush1.bf16.msra.mxu0 %v7124_v36  ;;  %876 = vmatprep.mubr.f32.mxu0 %v8241_v7  ;;  %v7160_v36 = vpack.c.bf16 %v5926_v35, %v5924_v34  ;;  %v1392_v34 = vld [vmem:[%s11522_s4 + $0x48] sm:$0xff] }
  0x64   : > { %7127 = vmatprep.subr.bf16.mxu0 %v7126_v42  ;;  %v5930_v42 = vld [vmem:[%s11519_s1 + $0x3b0] sm:$0xff] }
  0x66   : > { %5878 = vmatmul.mubr.msk.f32.gmra.mrb[4].mxu0 %vm564_vm3, %v791_v51 }
  0x67   : > { %7129 = vmatpush1.bf16.msra.mxu0 %v7128_v50  ;;  %882 = vmatprep.mubr.f32.mxu0 %v8241_v7 }
  0x68   : > { %7131 = vmatprep.subr.bf16.mxu0 %v7130_v55 }
  0x6a   : > { %5879 = vmatmul.mubr.msk.f32.gmra.mrb[6].mxu0 %vm564_vm3, %v790_v41  ;;  %v5928_v41 = vld [vmem:[%s11519_s1 + $0x3a0] sm:$0xff] }
  0x6b   : > { %7133 = vmatpush1.bf16.msra.mxu0 %v7132_v60  ;;  %1002 = vmatprep.mubr.f32.mxu0 %v8241_v7  ;;  %v7164_v43 = vpack.c.bf16 %v5930_v42, %v5928_v41  ;;  %v1396_v41 = vld [vmem:[%s11522_s4 + $0x68] sm:$0xff] }
  0x6c   : > { %7135 = vmatprep.subr.bf16.mxu0 %v7134_v62 }
  0x6f   : > { %7137 = vmatpush1.bf16.msra.mxu0 %v7136_v3 }
  0x70   : > { %7139 = vmatprep.subr.bf16.mxu0 %v7138_v4 }
  0x73   : > { %7141 = vmatpush1.bf16.msra.mxu0 %v7140_v10 }
  0x74   : > { %7143 = vmatprep.subr.bf16.mxu0 %v7142_v11 }
  0x76   : > { %5904 = vmatmul.mubr.msk.f32.vlgmr.msra.gmra.mrb[0].mxu0 %vm564_vm3, %v8458_v37  ;;  %v5923_v37 = vld [vmem:[%s11519_s1 + $0x378] sm:$0xff] }
  0x77   : > { %7145 = vmatpush1.bf16.msra.mxu0 %v7144_v16  ;;  %1008 = vmatprep.mubr.f32.mxu0 %v8241_v7  ;;  %v7154_v21 = vpack.c.bf16 %v5923_v37, %v5921_v28  ;;  %v1386_v28 = vld [vmem:[%s11522_s4 + $0x18] sm:$0xff] }
  0x78   : > { %7147 = vmatprep.subr.bf16.mxu0 %v7146_v17  ;;  %v5941_v37 = vld [vmem:[%s11521_s3 + $0x18] sm:$0x3f] }
  0x79   : > { %v4008_v17 = vld [vmem:[%s11522_s4 + $0x18] sm:$0xff] }
  0x7a   : > { %5905 = vmatmul.mubr.msk.f32.gmra.mrb[2].mxu0 %vm564_vm3, %v8481_v48  ;;  %v5927_v48 = vld [vmem:[%s11519_s1 + $0x398] sm:$0xff] }
  0x7b   : > { %7149 = vmatpush1.bf16.msra.mxu0 %v7148_v23  ;;  %1014 = vmatprep.mubr.f32.mxu0 %v8241_v7  ;;  %v7158_v33 = vpack.c.bf16 %v5927_v48, %v5925_v31  ;;  %v1384_v23 = vld [vmem:[%s11522_s4 + $0x8] sm:$0xff]  ;;  %v1389_v31 = vld [vmem:[%s11522_s4 + $0x30] sm:$0xff]  ;;  %v1390_v48 = vld [vmem:[%s11522_s4 + $0x38] sm:$0xff] }
  0x7c   : > { %7151 = vmatprep.subr.bf16.mxu0 %v7150_v24  ;;  %v5940_v24 = vld [vmem:[%s11521_s3 + $0x10] sm:$0xff]  ;;  %v7187_v26 = vpack.c.bf16 %v1384_v23, %v1383_v22  ;;  %v5958_v23 = vld [vmem:[%s11522_s4 + $0xf8] sm:$0xff] }
  0x7e   : > { %5906 = vmatmul.mubr.msk.f32.gmra.mrb[4].mxu0 %vm564_vm3, %v8496_v53  ;;  %v5931_v53 = vld [vmem:[%s11519_s1 + $0x3b8] sm:$0xff] }
  0x7f   : > { %7153 = vmatpush1.bf16.msra.mxu0 %v7152_v29  ;;  %1020 = vmatprep.mubr.f32.mxu0 %v8241_v7  ;;  %v7162_v40 = vpack.c.bf16 %v5931_v53, %v5929_v39  ;;  %v7190_v29 = vpack.c.bf16 %v1386_v28, %v1385_v27  ;;  %v1393_v39 = vld [vmem:[%s11522_s4 + $0x50] sm:$0xff]  ;;  %v1394_v53 = vld [vmem:[%s11522_s4 + $0x58] sm:$0xff]  ;;  %v5960_v27 = vld [vmem:[%s11522_s4 + $0x108] sm:$0xff] }
  0x80   : > { %7155 = vmatprep.subr.bf16.mxu0 %v7154_v21  ;;  %v1387_v21 = vld [vmem:[%s11522_s4 + $0x20] sm:$0xff]  ;;  %v5961_v28 = vld [vmem:[%s11522_s4 + $0x110] sm:$0xff] }
  0x81   : > { %v7193_v30 = vpack.c.bf16 %v1388_v25, %v1387_v21  ;;  %v5963_v21 = vld [vmem:[%s11522_s4 + $0x120] sm:$0xff] }
  0x82   : > { %5907 = vmatmul.mubr.msk.f32.gmra.mrb[6].mxu0 %vm564_vm3, %v928_v49  ;;  %v8242_v49 = vmov 0.0|0.0  }
  0x83   : > { %7157 = vmatpush1.bf16.msra.mxu0 %v7156_v32  ;;  %1140 = vmatprep.mubr.f32.mxu0 %v8241_v7  ;;  %v7196_v32 = vpack.c.bf16 %v1390_v48, %v1389_v31  ;;  %v5965_v31 = vld [vmem:[%s11522_s4 + $0x130] sm:$0xff] }
  0x84   : > { %7159 = vmatprep.subr.bf16.mxu0 %v7158_v33  ;;  %v1391_v33 = vld [vmem:[%s11522_s4 + $0x40] sm:$0xff] }
  0x85   : > { %v7199_v35 = vpack.c.bf16 %v1392_v34, %v1391_v33  ;;  %v5967_v33 = vld [vmem:[%s11522_s4 + $0x140] sm:$0xff] }
  0x87   : > { %7161 = vmatpush1.bf16.msra.mxu0 %v7160_v36  ;;  %v7202_v36 = vpack.c.bf16 %v1394_v53, %v1393_v39  ;;  %v5972_v39 = vld [vmem:[%s11523_s5 + $0xb8] sm:$0xff]  ;;  %v5974_v53 = vld [vmem:[%s11523_s5 + $0xc8] sm:$0xff] }
  0x88   : > { %7163 = vmatprep.subr.bf16.mxu0 %v7162_v40  ;;  %v1395_v40 = vld [vmem:[%s11522_s4 + $0x60] sm:$0xff] }
  0x89   : > { %v7205_v42 = vpack.c.bf16 %v1396_v41, %v1395_v40  ;;  %v7246_v40 = vpack.c.bf16 %v5974_v53, %v5972_v39  ;;  %v5973_v41 = vld [vmem:[%s11523_s5 + $0xc0] sm:$0xff]  ;;  %v1591_v53 = vld [vmem:[%s11523_s5 + $0x30] sm:$0xff] }
  0x8a   : > { %v1589_v39 = vld [vmem:[%s11523_s5 + $0x20] sm:$0xff] }
  0x8b   : > { %7165 = vmatpush1.bf16.msra.mxu0 %v7164_v43  ;;  %v1397_v43 = vld [vmem:[%s11522_s4 + $0x70] sm:$0xff] }
  0x8c   : > { %7358 = vmatprep.subr.bf16.mxu0 %v8242_v49 }
  0x8e   : > { %5932 = vmatmul.mubr.msk.f32.vlgmr.msra.gmra.mrb[0].mxu0 %vm564_vm3, %v8461_v38  ;;  %v1175_v38 = vlaneseq }
  0x8f   : > { %1146 = vmatprep.mubr.f32.mxu0 %v8241_v7 }
  0x90   : > { %v1176_v45 = vshrl.u32 %v1175_v38, 7  ;;  %v1398_v38 = vld [vmem:[%s11522_s4 + $0x78] sm:$0xff] }
  0x92   : > { %5933 = vmatmul.mubr.msk.f32.gmra.mrb[2].mxu0 %vm564_vm3, %v8491_v52  ;;  %v8854_v46 = vsub.s32 0, %v1176_v45  ;;  %v1173_v52 = vld [vmem:[%s11520_s2] sm:$0x3]  ;;  %v8859_v47 = vsub.s32 1, %v1176_v45  ;;  %v7208_v45 = vpack.c.bf16 %v1398_v38, %v1397_v43  ;;  %v5978_v43 = vld [vmem:[%s11523_s5 + $0xe8] sm:$0xff] }
  0x93   : > { %1152 = vmatprep.mubr.f32.mxu0 %v8241_v7 }
  0x94   : > { %v1182_v44 = vrot.slane %v1173_v52, %v8859_v47 }
  0x96   : > { %5934 = vmatmul.mubr.msk.f32.gmra.mrb[4].mxu0 %vm564_vm3, %v8510_v61  ;;  %v1178_v61 = vrot.slane %v1173_v52, %v8854_v46  ;;  %v1399_v52 = vld [vmem:[%s11522_s4 + $0x80] sm:$0xff] }
  0x97   : > { %1158 = vmatprep.mubr.f32.mxu0 %v8241_v7 }
  0x9a   : > { %5935 = vmatmul.mubr.msk.f32.gmra.mrb[6].mxu0 %vm564_vm3, %v1066_v54 }
 0x161   : > { %v1142_v50 = vpop.f32.mrb[0].mxu0 }
 0x162   : > { %v1144_v51 = vpop.f32.mrb[1].mxu0  ;;  %v1185_v54 = vadd.f32 %v1178_v61, %v1142_v50 }
 0x163   : > { %v1186_v55 = vadd.f32 %v1182_v44, %v1144_v51  ;;  %v1402_v51 = vld [vmem:[%s11522_s4 + $0x98] sm:$0xff] }
 0x164   : > { %v1193_v60 = vmax.f32 %v1185_v54, 0.0 }
 0x165   : > { %v1148_v56 = vpop.f32.mrb[2].mxu0  ;;  %v1194_v63 = vmax.f32 %v1186_v55, 0.0  ;;  %v1403_v55 = vld [vmem:[%s11522_s4 + $0xa0] sm:$0xff] }
 0x166   : > { %v1187_v57 = vadd.f32 %v1178_v61, %v1148_v56  ;;  %v1150_v58 = vpop.f32.mrb[3].mxu0 }
 0x167   : > { %v1188_v59 = vadd.f32 %v1182_v44, %v1150_v58 }
 0x168   : > { %v1195_v62 = vmax.f32 %v1187_v57, 0.0 }
 0x169   : > { %v1196_v0 = vmax.f32 %v1188_v59, 0.0  ;;  %v1154_v1 = vpop.f32.mrb[4].mxu0 }
 0x16a   : > { %v1156_v2 = vpop.f32.mrb[5].mxu0  ;;  %v7168_v3 = vpack.c.bf16 %v1195_v62, %v1193_v60  ;;  %v1189_v5 = vadd.f32 %v1178_v61, %v1154_v1  ;;  %v5948_v60 = vld [vmem:[%s11522_s4 + $0xa8] sm:$0xff]  ;;  %v5949_v62 = vld [vmem:[%s11522_s4 + $0xb0] sm:$0xff] }
 0x16b   : > { %v7166_v4 = vpack.c.bf16 %v1196_v0, %v1194_v63  ;;  %v1190_v6 = vadd.f32 %v1182_v44, %v1156_v2 }
 0x16c   : > { %v1197_v12 = vmax.f32 %v1189_v5, 0.0  ;;  %v5951_v5 = vld [vmem:[%s11522_s4 + $0xc0] sm:$0xff] }
 0x16d   : > { %v1160_v8 = vpop.f32.mrb[6].mxu0  ;;  %7167 = vmatprep.subr.bf16.mxu1 %v7166_v4  ;;  %v1198_v14 = vmax.f32 %v1190_v6, 0.0 }
 0x16e   : > { %v1191_v9 = vadd.f32 %v1178_v61, %v1160_v8  ;;  %v1162_v10 = vpop.f32.mrb[7].mxu0  ;;  %7169 = vmatpush1.bf16.msra.mxu1 %v7168_v3  ;;  %v1400_v61 = vld [vmem:[%s11522_s4 + $0x88] sm:$0xff] }
 0x16f   : > { %v1192_v11 = vadd.f32 %v1182_v44, %v1162_v10  ;;  %v7211_v50 = vpack.c.bf16 %v1400_v61, %v1399_v52  ;;  %v1401_v44 = vld [vmem:[%s11522_s4 + $0x90] sm:$0xff]  ;;  %v5977_v61 = vld [vmem:[%s11523_s5 + $0xe0] sm:$0xff] }
 0x170   : > { %v1199_v13 = vmax.f32 %v1191_v9, 0.0  ;;  %v7214_v54 = vpack.c.bf16 %v1402_v51, %v1401_v44  ;;  %v5975_v52 = vld [vmem:[%s11523_s5 + $0xd0] sm:$0xff]  ;;  %v5982_v44 = vld [vmem:[%s11523_s5 + $0x108] sm:$0xff] }
 0x171   : > { %v1200_v15 = vmax.f32 %v1192_v11, 0.0  ;;  %v7252_v51 = vpack.c.bf16 %v5977_v61, %v5975_v52  ;;  %v1593_v61 = vld [vmem:[%s11523_s5 + $0x40] sm:$0xff] }
 0x172   : > { %v7173_v16 = vpack.c.bf16 %v1199_v13, %v1197_v12  ;;  %v5952_v12 = vld [vmem:[%s11522_s4 + $0xc8] sm:$0xff]  ;;  %v5953_v13 = vld [vmem:[%s11522_s4 + $0xd0] sm:$0xff] }
 0x173   : > { %v7170_v18 = vpack.c.bf16 %v1200_v15, %v1198_v14  ;;  %v7223_v14 = vpack.c.bf16 %v5953_v13, %v5952_v12  ;;  %v5954_v15 = vld [vmem:[%s11522_s4 + $0xd8] sm:$0xff] }
 0x175   : > { %7172 = vmatprep.subr.msk.bf16.mxu1 %vm8865_vm6, %v7170_v18 }
 0x176   : > { %7175 = vmatpush1.bf16.msk.msra.mxu1 %vm8865_vm6, %v7173_v16 }
 0x177   : > { %7177 = vmatprep.subr.bf16.mxu1 %v7166_v4  ;;  %v5950_v4 = vld [vmem:[%s11522_s4 + $0xb8] sm:$0xff] }
 0x178   : > { %v7220_v11 = vpack.c.bf16 %v5951_v5, %v5950_v4  ;;  %v5987_v4 = vld [vmem:[%s11523_s5 + $0x130] sm:$0xff]  ;;  %v5989_v5 = vld [vmem:[%s11523_s5 + $0x140] sm:$0xff] }
 0x179   : > { %5938 = vmatmul.mubr.msk.f32.vlgmr.msra.gmra.mrb[0].mxu1 %vm1203_vm7, %v1201_v19  ;;  %v5956_v19 = vld [vmem:[%s11522_s4 + $0xe8] sm:$0xff] }
 0x17a   : > { %7179 = vmatpush1.bf16.msra.mxu1 %v7168_v3  ;;  %1286 = vmatprep.mubr.f32.mxu1 %v8241_v7  ;;  %v7217_v3 = vpack.c.bf16 %v5949_v62, %v5948_v60  ;;  %v5983_v62 = vld [vmem:[%s11523_s5 + $0x110] sm:$0xff] }
 0x17b   : > { %7182 = vmatprep.subr.msk.bf16.mxu1 %vm8865_vm6, %v7170_v18 }
 0x17d   : > { %5939 = vmatmul.mubr.msk.f32.gmra.mrb[2].mxu1 %vm1203_vm7, %v1202_v20  ;;  %v5957_v20 = vld [vmem:[%s11522_s4 + $0xf0] sm:$0xff] }
 0x17e   : > { %7185 = vmatpush1.bf16.msk.msra.mxu1 %vm8865_vm6, %v7173_v16  ;;  %1366 = vmatprep.mubr.f32.mxu1 %v8241_v7  ;;  %v5955_v16 = vld [vmem:[%s11522_s4 + $0xe0] sm:$0xff]  ;;  %v7229_v22 = vpack.c.bf16 %v5957_v20, %v5956_v19 }
 0x17f   : > { %7186 = vmatprep.subr.bf16.mxu1 %v8242_v49  ;;  %v7226_v18 = vpack.c.bf16 %v5955_v16, %v5954_v15 }
 0x181   : > { %5944 = vmatmul.mubr.msk.f32.vlgmr.msra.gmra.mrb[4].mxu1 %vm1203_vm7, %v5940_v24  ;;  %v5959_v24 = vld [vmem:[%s11522_s4 + $0x100] sm:$0xff] }
 0x182   : > { %1372 = vmatprep.mubr.f32.mxu1 %v8241_v7  ;;  %7188 = vmatpush1.bf16.msra.mxu1 %v7187_v26  ;;  %v7232_v26 = vpack.c.bf16 %v5959_v24, %v5958_v23  ;;  %v1587_v23 = vld [vmem:[%s11523_s5 + $0x10] sm:$0xff] }
 0x183   : > { %7189 = vmatprep.subr.bf16.mxu1 %v8242_v49 }
 0x185   : > { %5945 = vmatmul.mubr.msk.f32.gmra.mrb[6].mxu1 %vm1203_vm7, %v5941_v37  ;;  %v7235_v37 = vpack.c.bf16 %v5961_v28, %v5960_v27 }
 0x186   : > { %7191 = vmatpush1.bf16.msra.mxu1 %v7190_v29  ;;  %v5962_v29 = vld [vmem:[%s11522_s4 + $0x118] sm:$0xff] }
 0x187   : > { %7192 = vmatprep.subr.bf16.mxu1 %v8242_v49  ;;  %v7238_v25 = vpack.c.bf16 %v5963_v21, %v5962_v29  ;;  %v1592_v29 = vld [vmem:[%s11523_s5 + $0x38] sm:$0xff] }
 0x18a   : > { %7194 = vmatpush1.bf16.msra.mxu1 %v7193_v30  ;;  %v5964_v30 = vld [vmem:[%s11522_s4 + $0x128] sm:$0xff] }
 0x18b   : > { %7195 = vmatprep.subr.bf16.mxu1 %v8242_v49  ;;  %v7241_v48 = vpack.c.bf16 %v5965_v31, %v5964_v30 }
 0x18e   : > { %7197 = vmatpush1.bf16.msra.mxu1 %v7196_v32  ;;  %v5966_v32 = vld [vmem:[%s11522_s4 + $0x138] sm:$0xff] }
 0x18f   : > { %7198 = vmatprep.subr.bf16.mxu1 %v8242_v49  ;;  %v7244_v34 = vpack.c.bf16 %v5967_v33, %v5966_v32 }
 0x192   : > { %7200 = vmatpush1.bf16.msra.mxu1 %v7199_v35  ;;  %v5968_v35 = vld [vmem:[%s11522_s4 + $0x148] sm:$0xff] }
 0x193   : > { %7201 = vmatprep.subr.bf16.mxu1 %v8242_v49 }
 0x196   : > { %7203 = vmatpush1.bf16.msra.mxu1 %v7202_v36  ;;  %v5971_v36 = vld [vmem:[%s11523_s5 + $0xb0] sm:$0xff] }
 0x197   : > { %7204 = vmatprep.subr.bf16.mxu1 %v8242_v49  ;;  %v7248_v38 = vpack.c.bf16 %v5973_v41, %v5971_v36  ;;  %v1596_v41 = vld [vmem:[%s11523_s5 + $0x58] sm:$0xff] }
 0x19a   : > { %7206 = vmatpush1.bf16.msra.mxu1 %v7205_v42  ;;  %v5976_v42 = vld [vmem:[%s11523_s5 + $0xd8] sm:$0xff] }
 0x19b   : > { %7207 = vmatprep.subr.bf16.mxu1 %v8242_v49 }
 0x19e   : > { %7209 = vmatpush1.bf16.msra.mxu1 %v7208_v45  ;;  %v7250_v45 = vpack.c.bf16 %v5978_v43, %v5976_v42 }
 0x19f   : > { %7210 = vmatprep.subr.bf16.mxu1 %v8242_v49 }
 0x1a2   : > { %7212 = vmatpush1.bf16.msra.mxu1 %v7211_v50  ;;  %v5980_v50 = vld [vmem:[%s11523_s5 + $0xf8] sm:$0xff] }
 0x1a3   : > { %7213 = vmatprep.subr.bf16.mxu1 %v8242_v49 }
 0x1a6   : > { %7215 = vmatpush1.bf16.msra.mxu1 %v7214_v54  ;;  %v7254_v54 = vpack.c.bf16 %v5982_v44, %v5980_v50  ;;  %v1595_v50 = vld [vmem:[%s11523_s5 + $0x50] sm:$0xff]  ;;  %v1598_v44 = vld [vmem:[%s11523_s5 + $0x68] sm:$0xff] }
 0x1a7   : > { %1451 = vmatprep.subr.mxu1 %v8241_v7 }
 0x1aa   : > { %1452 = vmatpush1.msra.mxu1 %v1403_v55  ;;  %v5979_v55 = vld [vmem:[%s11523_s5 + $0xf0] sm:$0xff] }
 0x1ab   : > { %7216 = vmatprep.subr.bf16.mxu1 %v8242_v49 }
 0x24c   : > { %v1282_v56 = vpop.f32.mrb[0].mxu1 }
 0x24d   : > { %v1284_v57 = vpop.f32.mrb[1].mxu1 }
 0x250   : > { %v1288_v58 = vpop.f32.mrb[2].mxu1 }
 0x251   : > { %v1290_v59 = vpop.f32.mrb[3].mxu1 }
 0x254   : > { %v1368_v63 = vpop.f32.mrb[4].mxu1 }
 0x255   : > { %v1379_v0 = vmax.f32 %v1282_v56, %v1368_v63  ;;  %v1370_v1 = vpop.f32.mrb[5].mxu1  ;;  %v5981_v56 = vld [vmem:[%s11523_s5 + $0x100] sm:$0xff] }
 0x256   : > { %v1380_v2 = vmax.f32 %v1284_v57, %v1370_v1  ;;  %v5984_v57 = vld [vmem:[%s11523_s5 + $0x118] sm:$0xff]  ;;  %v5985_v63 = vld [vmem:[%s11523_s5 + $0x120] sm:$0xff] }
 0x257   : > { %v5988_v1 = vld [vmem:[%s11523_s5 + $0x138] sm:$0xff] }
 0x258   : > { %v1374_v6 = vpop.f32.mrb[6].mxu1  ;;  %5946 = vmatprep.mubr.msk.f32.mxu1 %vm1404_vm8, %v1380_v2 }
 0x259   : > { %v1381_v8 = vmax.f32 %v1288_v58, %v1374_v6  ;;  %v1376_v9 = vpop.f32.mrb[7].mxu1  ;;  %1476 = vmatmul.mubr.f32.vlgmr.msra.gmra.mrb[8].mxu1 %v1379_v0  ;;  %v5986_v58 = vld [vmem:[%s11523_s5 + $0x128] sm:$0xff]  ;;  %v7264_v6 = vpack.c.bf16 %v5989_v5, %v5987_v4  ;;  %v6004_v4 = vld [vmem:[%s11523_s5 + $0x178] sm:$0xff]  ;;  %v6001_v5 = vld [vmem:[%s11523_s5 + $0x160] sm:$0xff] }
 0x25a   : > { %v1382_v10 = vmax.f32 %v1290_v59, %v1376_v9  ;;  %7218 = vmatpush1.bf16.msra.mxu1 %v7217_v3  ;;  %v7256_v59 = vpack.c.bf16 %v5981_v56, %v5979_v55  ;;  %v7258_v60 = vpack.c.bf16 %v5986_v58, %v5984_v57  ;;  %v5991_v9 = vld [vmem:[%s11523_s5 + $0x150] sm:$0xf]  ;;  %v1597_v56 = vld [vmem:[%s11523_s5 + $0x60] sm:$0xff]  ;;  %v1602_v58 = vld [vmem:[%s11523_s5 + $0x88] sm:$0xff] }
 0x25b   : > { %7219 = vmatprep.subr.bf16.mxu1 %v8242_v49  ;;  %v1599_v57 = vld [vmem:[%s11523_s5 + $0x70] sm:$0xff] }
 0x25c   : > { %5947 = vmatprep.mubr.msk.f32.mxu1 %vm1404_vm8, %v1382_v10 }
 0x25d   : > { %1481 = vmatmul.mubr.f32.gmra.mrb[10].mxu1 %v1381_v8 }
 0x25e   : > { %7221 = vmatpush1.bf16.msra.mxu1 %v7220_v11  ;;  %5969 = vmatprep.mubr.msk.f32.mxu1 %vm1404_vm8, %v1380_v2  ;;  %v5990_v2 = vld [vmem:[%s11523_s5 + $0x148] sm:$0xff]  ;;  %v1588_v11 = vld [vmem:[%s11523_s5 + $0x18] sm:$0xff] }
 0x25f   : > { %7222 = vmatprep.subr.bf16.mxu1 %v8242_v49  ;;  %v7262_v3 = vpack.c.bf16 %v5990_v2, %v5988_v1  ;;  %v1606_v2 = vld [vmem:[%s11523_s5 + $0xa8] sm:$0xf] }
 0x262   : > { %7224 = vmatpush1.bf16.msra.mxu1 %v7223_v14 }
 0x263   : > { %7225 = vmatprep.subr.bf16.mxu1 %v8242_v49 }
 0x266   : > { %7227 = vmatpush1.bf16.msra.mxu1 %v7226_v18 }
 0x267   : > { %7228 = vmatprep.subr.bf16.mxu1 %v8242_v49 }
 0x26a   : > { %7230 = vmatpush1.bf16.msra.mxu1 %v7229_v22  ;;  %v1585_v22 = vld [vmem:[%s11523_s5] sm:$0xff] }
 0x26b   : > { %7231 = vmatprep.subr.bf16.mxu1 %v8242_v49  ;;  %v7268_v28 = vpack.c.bf16 %v1587_v23, %v1585_v22  ;;  %v6009_v23 = vld [vmem:[%s11523_s5 + $0x1a0] sm:$0xff] }
 0x26e   : > { %7233 = vmatpush1.bf16.msra.mxu1 %v7232_v26 }
 0x26f   : > { %7234 = vmatprep.subr.bf16.mxu1 %v8242_v49 }
 0x272   : > { %7236 = vmatpush1.bf16.msra.mxu1 %v7235_v37  ;;  %v1590_v37 = vld [vmem:[%s11523_s5 + $0x28] sm:$0xff] }
 0x273   : > { %7237 = vmatprep.subr.bf16.mxu1 %v8242_v49 }
 0x276   : > { %7239 = vmatpush1.bf16.msra.mxu1 %v7238_v25 }
 0x277   : > { %7240 = vmatprep.subr.bf16.mxu1 %v8242_v49 }
 0x27a   : > { %7242 = vmatpush1.bf16.msra.mxu1 %v7241_v48 }
 0x27b   : > { %7243 = vmatprep.subr.bf16.mxu1 %v8242_v49 }
 0x27e   : > { %7245 = vmatpush1.bf16.msra.mxu1 %v7244_v34 }
 0x27f   : > { %1548 = vmatprep.subr.mxu1 %v8241_v7 }
 0x282   : > { %1549 = vmatpush1.msra.mxu1 %v5968_v35  ;;  %v7270_v35 = vpack.c.bf16 %v1592_v29, %v1590_v37  ;;  %v6013_v29 = vld [vmem:[%s11523_s5 + $0x1c0] sm:$0xff] }
 0x283   : > { %1573 = vmatmul.mubr.f32.vlgmr.msra.gmra.mrb[12].mxu1 %v1379_v0  ;;  %7247 = vmatprep.subr.bf16.mxu1 %v7246_v40  ;;  %v7260_v0 = vpack.c.bf16 %v5985_v63, %v5983_v62  ;;  %v1594_v40 = vld [vmem:[%s11523_s5 + $0x48] sm:$0xff]  ;;  %v1601_v63 = vld [vmem:[%s11523_s5 + $0x80] sm:$0xff] }
 0x284   : > { %5970 = vmatprep.mubr.msk.f32.mxu1 %vm1404_vm8, %v1382_v10  ;;  %7249 = vmatpush1.bf16.msra.mxu1 %v7248_v38  ;;  %v1586_v10 = vld [vmem:[%s11523_s5 + $0x8] sm:$0xff]  ;;  %v7274_v52 = vpack.c.bf16 %v1596_v41, %v1594_v40  ;;  %v6028_v40 = vld [vmem:[%s11523_s5 + $0x218] sm:$0xff] }
 0x285   : > { %7251 = vmatprep.subr.bf16.mxu1 %v7250_v45  ;;  %v7266_v12 = vpack.c.bf16 %v1588_v11, %v1586_v10  ;;  %v7272_v45 = vpack.c.bf16 %v1591_v53, %v1589_v39  ;;  %v1605_v10 = vld [vmem:[%s11523_s5 + $0xa0] sm:$0xf]  ;;  %v6019_v39 = vld [vmem:[%s11523_s5 + $0x1f0] sm:$0xff]  ;;  %v6030_v41 = vld [vmem:[%s11523_s5 + $0x228] sm:$0xff] }
 0x287   : > { %1578 = vmatmul.mubr.f32.gmra.mrb[14].mxu1 %v1381_v8  ;;  %v5992_v8 = vld [vmem:[%s11523_s5 + $0x158] sm:$0xf] }
 0x288   : > { %1710 = vmatprep.mubr.f32.mxu1 %v8241_v7  ;;  %7253 = vmatpush1.bf16.msra.mxu1 %v7252_v51  ;;  %v1600_v51 = vld [vmem:[%s11523_s5 + $0x78] sm:$0xff] }
 0x289   : > { %7255 = vmatprep.subr.bf16.mxu1 %v7254_v54  ;;  %v7276_v54 = vpack.c.bf16 %v1595_v50, %v1593_v61  ;;  %v7278_v55 = vpack.c.bf16 %v1600_v51, %v1598_v44  ;;  %v6032_v61 = vld [vmem:[%s11523_s5 + $0x238] sm:$0xff]  ;;  %v6034_v50 = vld [vmem:[%s11523_s5 + $0x248] sm:$0xff]  ;;  %v6021_v44 = vld [vmem:[%s11523_s5 + $0x200] sm:$0xf]  ;;  %v7306_v51 = vpack.c.bf16 %v6030_v41, %v6028_v40 }
 0x28a   : > { %v6067_v40 = vld [vmem:[%s11523_s5 + $0x330] sm:$0xff]  ;;  %v6070_v41 = vld [vmem:[%s11523_s5 + $0x348] sm:$0xff] }
 0x28c   : > { %7257 = vmatpush1.bf16.msra.mxu1 %v7256_v59  ;;  %v1604_v59 = vld [vmem:[%s11523_s5 + $0x98] sm:$0xff] }
 0x28d   : > { %7259 = vmatprep.subr.bf16.mxu1 %v7258_v60  ;;  %v7280_v60 = vpack.c.bf16 %v1599_v57, %v1597_v56  ;;  %v7282_v62 = vpack.c.bf16 %v1604_v59, %v1602_v58  ;;  %v6031_v56 = vld [vmem:[%s11523_s5 + $0x230] sm:$0xff]  ;;  %v6033_v57 = vld [vmem:[%s11523_s5 + $0x240] sm:$0xff]  ;;  %v6036_v58 = vld [vmem:[%s11523_s5 + $0x258] sm:$0xff] }
 0x28e   : > { %v6038_v59 = vld [vmem:[%s11523_s5 + $0x268] sm:$0xff] }
 0x290   : > { %7261 = vmatpush1.bf16.msra.mxu1 %v7260_v0  ;;  %v1603_v0 = vld [vmem:[%s11523_s5 + $0x90] sm:$0xff] }
 0x291   : > { %7263 = vmatprep.subr.bf16.mxu1 %v7262_v3  ;;  %v7284_v1 = vpack.c.bf16 %v1603_v0, %v1601_v63  ;;  %v6002_v3 = vld [vmem:[%s11523_s5 + $0x168] sm:$0xff]  ;;  %v6035_v63 = vld [vmem:[%s11523_s5 + $0x250] sm:$0xff]  ;;  %v6037_v0 = vld [vmem:[%s11523_s5 + $0x260] sm:$0xff] }
 0x292   : > { %v7286_v11 = vpack.c.bf16 %v6004_v4, %v6002_v3  ;;  %v6039_v4 = vld [vmem:[%s11523_s5 + $0x270] sm:$0xff] }
 0x294   : > { %7265 = vmatpush1.bf16.msra.mxu1 %v7264_v6  ;;  %v6003_v6 = vld [vmem:[%s11523_s5 + $0x170] sm:$0xff] }
 0x295   : > { %5993 = vmatprep.subr.msk.mxu1 %vm1060_vm1, %v5992_v8  ;;  %v6006_v8 = vld [vmem:[%s11523_s5 + $0x188] sm:$0xff] }
 0x298   : > { %5994 = vmatpush1.msk.msra.mxu1 %vm1060_vm1, %v5991_v9  ;;  %v6008_v9 = vld [vmem:[%s11523_s5 + $0x198] sm:$0xff] }
 0x299   : > { %7267 = vmatprep.subr.bf16.mxu1 %v7266_v12  ;;  %v7288_v12 = vpack.c.bf16 %v6003_v6, %v6001_v5  ;;  %v6041_v5 = vld [vmem:[%s11523_s5 + $0x280] sm:$0xff]  ;;  %v6044_v6 = vld [vmem:[%s11523_s5 + $0x298] sm:$0xff] }
 0x32c   : > { %v1477_v13 = vpop.f32.mrb[8].mxu1 }
 0x32d   : > { %v1479_v14 = vpop.f32.mrb[9].mxu1 }
 0x32e   : > { %v6005_v14 = vld [vmem:[%s11523_s5 + $0x180] sm:$0xff] }
 0x330   : > { %v1482_v15 = vpop.f32.mrb[10].mxu1 }
 0x331   : > { %v1484_v16 = vpop.f32.mrb[11].mxu1 }
 0x332   : > { %v6010_v16 = vld [vmem:[%s11523_s5 + $0x1a8] sm:$0xff] }
 0x356   : > { %v1574_v18 = vpop.f32.mrb[12].mxu1 }
 0x357   : > { %v9123_v19 = vmax.f32 %v1477_v13, %v1574_v18  ;;  %v1576_v20 = vpop.f32.mrb[13].mxu1  ;;  %v7290_v13 = vpack.c.bf16 %v6008_v9, %v6006_v8  ;;  %v6012_v18 = vld [vmem:[%s11523_s5 + $0x1b8] sm:$0xff]  ;;  %v7320_v8 = vpack.c.bf16 %v6041_v5, %v6039_v4 }
 0x358   : > { %v7294_v22 = vpack.c.bf16 %v6012_v18, %v6010_v16  ;;  %v6053_v16 = vld [vmem:[%s11523_s5 + $0x2c0] sm:$0xff]  ;;  %v6055_v18 = vld [vmem:[%s11523_s5 + $0x2d0] sm:$0xff]  ;;  %v2353_v4 = vld [vmem:[%s11526_s8 + $0x58] sm:$0xff] }
 0x359   : > { %v1632_v21 = vrot.slane %v9123_v19, 1  ;;  %v1833_v25 = vrot.slane %v9123_v19, 2  ;;  %v1950_v30 = vrot.slane %v9123_v19, 3  ;;  %v2067_v31 = vrot.slane %v9123_v19, 4 }
 0x35a   : > { %v1579_v24 = vpop.f32.mrb[14].mxu1 }
 0x35b   : > { %v9131_v26 = vmax.f32 %v1482_v15, %v1579_v24  ;;  %v1581_v27 = vpop.f32.mrb[15].mxu1  ;;  %v6007_v15 = vld [vmem:[%s11523_s5 + $0x190] sm:$0xff] }
 0x35c   : > { %v7292_v20 = vpack.c.bf16 %v6007_v15, %v6005_v14  ;;  %v6011_v24 = vld [vmem:[%s11523_s5 + $0x1b0] sm:$0xff]  ;;  %v6014_v27 = vld [vmem:[%s11523_s5 + $0x1c8] sm:$0xff]  ;;  %v6056_v15 = vld [vmem:[%s11523_s5 + $0x2d8] sm:$0xff] }
 0x35d   : > { %v1633_v48 = vrot.slane %v9131_v26, 1  ;;  %v1834_v32 = vrot.slane %v9131_v26, 2  ;;  %v1951_v33 = vrot.slane %v9131_v26, 3  ;;  %v2068_v34 = vrot.slane %v9131_v26, 4  ;;  %v6054_v14 = vld [vmem:[%s11523_s5 + $0x2c8] sm:$0xff] }
 0x35f   : > { %v1634_v36 = vsel %vm556_vm2, %v1632_v21, %v1633_v48  ;;  %v9163_v42 = vsel %vm784_vm4, %v1833_v25, %v1834_v32  ;;  %v9168_v43 = vsel %vm922_vm0, %v1950_v30, %v1951_v33  ;;  %v9173_v38 = vsel %vm1060_vm1, %v2067_v31, %v2068_v34  ;;  %v6015_v21 = vld [vmem:[%s11523_s5 + $0x1d0] sm:$0xff]  ;;  %v6018_v25 = vld [vmem:[%s11523_s5 + $0x1e8] sm:$0xff]  ;;  %v6020_v30 = vld [vmem:[%s11523_s5 + $0x1f8] sm:$0xff] }
 0x360   : > { %5995 = vmatmul.mubr.msk.f32.vlgmr.msra.gmra.mrb[16].mxu1 %vm1635_vm9, %v1634_v36  ;;  %v7300_v31 = vpack.c.bf16 %v6015_v21, %v6013_v29  ;;  %v6022_v36 = vld [vmem:[%s11523_s5 + $0x208] sm:$0xf]  ;;  %v6064_v21 = vld [vmem:[%s11523_s5 + $0x318] sm:$0xff] }
 0x361   : > { %7269 = vmatpush1.bf16.msra.mxu1 %v7268_v28  ;;  %1716 = vmatprep.mubr.f32.mxu1 %v8241_v7  ;;  %v7296_v28 = vpack.c.bf16 %v6011_v24, %v6009_v23  ;;  %v6047_v23 = vld [vmem:[%s11523_s5 + $0x2b0] sm:$0xf]  ;;  %v7326_v24 = vpack.c.bf16 %v6056_v15, %v6054_v14  ;;  %v6062_v29 = vld [vmem:[%s11523_s5 + $0x308] sm:$0xff] }
 0x362   : > { %7271 = vmatprep.subr.bf16.mxu1 %v7270_v35  ;;  %v6017_v35 = vld [vmem:[%s11523_s5 + $0x1e0] sm:$0xff] }
 0x363   : > { %v7304_v53 = vpack.c.bf16 %v6019_v39, %v6017_v35  ;;  %v6066_v35 = vld [vmem:[%s11523_s5 + $0x328] sm:$0xff] }
 0x364   : > { %5996 = vmatmul.mubr.msk.f32.gmra.mrb[18].mxu1 %vm1635_vm9, %v1633_v48  ;;  %v7302_v48 = vpack.c.bf16 %v6020_v30, %v6018_v25  ;;  %v7334_v30 = vpack.c.bf16 %v6064_v21, %v6062_v29 }
 0x365   : > { %7273 = vmatpush1.bf16.msra.mxu1 %v7272_v45  ;;  %1797 = vmatprep.mubr.f32.mxu1 %v8241_v7  ;;  %v6027_v45 = vld [vmem:[%s11523_s5 + $0x210] sm:$0xff] }
 0x366   : > { %7275 = vmatprep.subr.bf16.mxu1 %v7274_v52  ;;  %v6029_v52 = vld [vmem:[%s11523_s5 + $0x220] sm:$0xff] }
 0x369   : > { %7277 = vmatpush1.bf16.msra.mxu1 %v7276_v54  ;;  %v7308_v54 = vpack.c.bf16 %v6029_v52, %v6027_v45 }
 0x36a   : > { %7279 = vmatprep.subr.bf16.mxu1 %v7278_v55  ;;  %v7310_v55 = vpack.c.bf16 %v6034_v50, %v6032_v61  ;;  %v6069_v61 = vld [vmem:[%s11523_s5 + $0x340] sm:$0xff]  ;;  %v6071_v50 = vld [vmem:[%s11523_s5 + $0x350] sm:$0xff] }
 0x36d   : > { %7281 = vmatpush1.bf16.msra.mxu1 %v7280_v60  ;;  %v7312_v60 = vpack.c.bf16 %v6033_v57, %v6031_v56  ;;  %v2343_v56 = vld [vmem:[%s11526_s8 + $0x8] sm:$0xff] }
 0x36e   : > { %7283 = vmatprep.subr.bf16.mxu1 %v7282_v62  ;;  %v7314_v62 = vpack.c.bf16 %v6038_v59, %v6036_v58  ;;  %v2346_v58 = vld [vmem:[%s11526_s8 + $0x20] sm:$0xff]  ;;  %v2347_v59 = vld [vmem:[%s11526_s8 + $0x28] sm:$0xff] }
 0x371   : > { %7285 = vmatpush1.bf16.msra.mxu1 %v7284_v1  ;;  %v6040_v1 = vld [vmem:[%s11523_s5 + $0x278] sm:$0xff] }
 0x372   : > { %5997 = vmatprep.subr.msk.mxu1 %vm1060_vm1, %v1606_v2  ;;  %v7316_v2 = vpack.c.bf16 %v6037_v0, %v6035_v63  ;;  %v2349_v63 = vld [vmem:[%s11526_s8 + $0x38] sm:$0xff] }
 0x375   : > { %5998 = vmatpush1.msk.msra.mxu1 %vm1060_vm1, %v1605_v10  ;;  %v6043_v10 = vld [vmem:[%s11523_s5 + $0x290] sm:$0xff] }
 0x376   : > { %5999 = vmatmul.mubr.msk.f32.vlgmr.msra.gmra.mrb[16].mxu1 %vm1635_vm9, %v9123_v19  ;;  %7287 = vmatprep.subr.bf16.mxu1 %v7286_v11  ;;  %v6016_v19 = vld [vmem:[%s11523_s5 + $0x1d8] sm:$0xff]  ;;  %v6045_v11 = vld [vmem:[%s11523_s5 + $0x2a0] sm:$0xff] }
 0x377   : > { %7289 = vmatpush1.bf16.msra.mxu1 %v7288_v12  ;;  %1803 = vmatprep.mubr.f32.mxu1 %v8241_v7  ;;  %v7298_v37 = vpack.c.bf16 %v6016_v19, %v6014_v27  ;;  %v7324_v12 = vpack.c.bf16 %v6045_v11, %v6043_v10  ;;  %v7328_v27 = vpack.c.bf16 %v6055_v18, %v6053_v16  ;;  %v2357_v10 = vld [vmem:[%s11526_s8 + $0x78] sm:$0xff] }
 0x378   : > { %7291 = vmatprep.subr.bf16.mxu1 %v7290_v13  ;;  %v6048_v13 = vld [vmem:[%s11523_s5 + $0x2b8] sm:$0xf] }
 0x37a   : > { %6000 = vmatmul.mubr.msk.f32.gmra.mrb[18].mxu1 %vm1635_vm9, %v9131_v26  ;;  %v2345_v26 = vld [vmem:[%s11526_s8 + $0x18] sm:$0xff] }
 0x37b   : > { %7293 = vmatpush1.bf16.msra.mxu1 %v7292_v20  ;;  %1910 = vmatprep.mubr.f32.mxu1 %v8241_v7  ;;  %v6058_v20 = vld [vmem:[%s11523_s5 + $0x2e8] sm:$0xff] }
 0x37c   : > { %7295 = vmatprep.subr.bf16.mxu1 %v7294_v22  ;;  %v6060_v22 = vld [vmem:[%s11523_s5 + $0x2f8] sm:$0xff] }
 0x37d   : > { %v7330_v19 = vpack.c.bf16 %v6060_v22, %v6058_v20 }
 0x37f   : > { %7297 = vmatpush1.bf16.msra.mxu1 %v7296_v28  ;;  %v6057_v28 = vld [vmem:[%s11523_s5 + $0x2e0] sm:$0xff] }
 0x380   : > { %7299 = vmatprep.subr.bf16.mxu1 %v7298_v37  ;;  %v6059_v37 = vld [vmem:[%s11523_s5 + $0x2f0] sm:$0xff] }
 0x381   : > { %v7332_v25 = vpack.c.bf16 %v6059_v37, %v6057_v28 }
 0x383   : > { %7301 = vmatpush1.bf16.msra.mxu1 %v7300_v31  ;;  %v6061_v31 = vld [vmem:[%s11523_s5 + $0x300] sm:$0xff] }
 0x384   : > { %7303 = vmatprep.subr.bf16.mxu1 %v7302_v48  ;;  %v6063_v48 = vld [vmem:[%s11523_s5 + $0x310] sm:$0xff] }
 0x385   : > { %v7336_v39 = vpack.c.bf16 %v6063_v48, %v6061_v31  ;;  %v2181_v31 = vld [vmem:[%s11525_s7] sm:$0x1f]  ;;  %v6082_v48 = vld [vmem:[%s11525_s7 + $0x8] sm:$0x1f] }
 0x387   : > { %7305 = vmatpush1.bf16.msra.mxu1 %v7304_v53 }
 0x388   : > { %6023 = vmatprep.subr.msk.mxu1 %vm1060_vm1, %v6022_v36  ;;  %v6065_v36 = vld [vmem:[%s11523_s5 + $0x320] sm:$0xff] }
 0x389   : > { %v7340_v45 = vpack.c.bf16 %v6067_v40, %v6065_v36  ;;  %v2361_v36 = vld [vmem:[%s11526_s8 + $0x98] sm:$0xff] }
 0x38b   : > { %6024 = vmatpush1.msk.msra.mxu1 %vm1060_vm1, %v6021_v44  ;;  %v7344_v44 = vpack.c.bf16 %v6071_v50, %v6069_v61 }
 0x38c   : > { %6025 = vmatmul.mubr.msk.f32.vlgmr.msra.gmra.mrb[16].mxu1 %vm1635_vm9, %v9163_v42  ;;  %7307 = vmatprep.subr.bf16.mxu1 %v7306_v51  ;;  %v6042_v42 = vld [vmem:[%s11523_s5 + $0x288] sm:$0xff] }
 0x38d   : > { %7309 = vmatpush1.bf16.msra.mxu1 %v7308_v54  ;;  %1916 = vmatprep.mubr.f32.mxu1 %v8241_v7  ;;  %v7318_v3 = vpack.c.bf16 %v6042_v42, %v6040_v1  ;;  %v6074_v51 = vld [vmem:[%s11523_s5 + $0x368] sm:$0xf]  ;;  %v6073_v54 = vld [vmem:[%s11523_s5 + $0x360] sm:$0xf] }
 0x38e   : > { %7311 = vmatprep.subr.bf16.mxu1 %v7310_v55  ;;  %v2342_v55 = vld [vmem:[%s11526_s8] sm:$0xff]  ;;  %v2351_v42 = vld [vmem:[%s11526_s8 + $0x48] sm:$0xff] }
 0x38f   : > { %v7359_v57 = vpack.c.bf16 %v2343_v56, %v2342_v55  ;;  %v2350_v1 = vld [vmem:[%s11526_s8 + $0x40] sm:$0xff]  ;;  %v6089_v55 = vld [vmem:[%s11526_s8 + $0xb0] sm:$0xff]  ;;  %v6090_v56 = vld [vmem:[%s11526_s8 + $0xb8] sm:$0xff] }
 0x390   : > { %6026 = vmatmul.mubr.msk.f32.gmra.mrb[18].mxu1 %vm1635_vm9, %v1834_v32  ;;  %v6046_v32 = vld [vmem:[%s11523_s5 + $0x2a8] sm:$0xff] }
 0x391   : > { %7313 = vmatpush1.bf16.msra.mxu1 %v7312_v60  ;;  %2027 = vmatprep.mubr.f32.mxu1 %v8241_v7  ;;  %v7322_v9 = vpack.c.bf16 %v6046_v32, %v6044_v6  ;;  %v7365_v60 = vpack.c.bf16 %v2347_v59, %v2346_v58  ;;  %v2354_v6 = vld [vmem:[%s11526_s8 + $0x60] sm:$0xff]  ;;  %v2355_v32 = vld [vmem:[%s11526_s8 + $0x68] sm:$0xff]  ;;  %v6093_v58 = vld [vmem:[%s11526_s8 + $0xd0] sm:$0xff] }
 0x392   : > { %7315 = vmatprep.subr.bf16.mxu1 %v7314_v62  ;;  %7360 = vmatpush1.bf16.msra.mxu0 %v7359_v57  ;;  %v2348_v62 = vld [vmem:[%s11526_s8 + $0x30] sm:$0xff]  ;;  %v6091_v57 = vld [vmem:[%s11526_s8 + $0xc0] sm:$0xff]  ;;  %v6094_v59 = vld [vmem:[%s11526_s8 + $0xd8] sm:$0xff] }
 0x393   : > { %7361 = vmatprep.subr.bf16.mxu0 %v8242_v49  ;;  %v7368_v0 = vpack.c.bf16 %v2349_v63, %v2348_v62  ;;  %v6095_v62 = vld [vmem:[%s11526_s8 + $0xe0] sm:$0xff]  ;;  %v6096_v63 = vld [vmem:[%s11526_s8 + $0xe8] sm:$0xff] }
 0x395   : > { %7317 = vmatpush1.bf16.msra.mxu1 %v7316_v2  ;;  %v7371_v2 = vpack.c.bf16 %v2351_v42, %v2350_v1  ;;  %v6097_v1 = vld [vmem:[%s11526_s8 + $0xf0] sm:$0xff]  ;;  %v6098_v42 = vld [vmem:[%s11526_s8 + $0xf8] sm:$0xff] }
 0x396   : > { %7319 = vmatprep.subr.bf16.mxu1 %v7318_v3  ;;  %v2352_v3 = vld [vmem:[%s11526_s8 + $0x50] sm:$0xff] }
 0x397   : > { %v7374_v5 = vpack.c.bf16 %v2353_v4, %v2352_v3  ;;  %v6099_v3 = vld [vmem:[%s11526_s8 + $0x100] sm:$0xff]  ;;  %v6100_v4 = vld [vmem:[%s11526_s8 + $0x108] sm:$0xff] }
 0x399   : > { %7321 = vmatpush1.bf16.msra.mxu1 %v7320_v8  ;;  %v7377_v8 = vpack.c.bf16 %v2355_v32, %v2354_v6  ;;  %v6101_v6 = vld [vmem:[%s11526_s8 + $0x110] sm:$0xff]  ;;  %v6102_v32 = vld [vmem:[%s11526_s8 + $0x118] sm:$0xff] }
 0x39a   : > { %7323 = vmatprep.subr.bf16.mxu1 %v7322_v9  ;;  %v2356_v9 = vld [vmem:[%s11526_s8 + $0x70] sm:$0xff] }
 0x39b   : > { %v7380_v11 = vpack.c.bf16 %v2357_v10, %v2356_v9  ;;  %v6103_v9 = vld [vmem:[%s11526_s8 + $0x120] sm:$0xff]  ;;  %v6104_v10 = vld [vmem:[%s11526_s8 + $0x128] sm:$0xff] }
 0x39d   : > { %7325 = vmatpush1.bf16.msra.mxu1 %v7324_v12  ;;  %v2161_v12 = vld [vmem:[%s11524_s6] sm:$0x3] }
 0x39e   : > { %6049 = vmatprep.subr.msk.mxu1 %vm1060_vm1, %v6048_v13  ;;  %v2166_v13 = vrot.slane %v2161_v12, %v8854_v46  ;;  %v2170_v15 = vrot.slane %v2161_v12, %v8859_v47  ;;  %v6105_v12 = vld [vmem:[%s11526_s8 + $0x130] sm:$0xff] }
 0x3a1   : > { %6050 = vmatpush1.msk.msra.mxu1 %vm1060_vm1, %v6047_v23 }
 0x3a2   : > { %6051 = vmatmul.mubr.msk.f32.vlgmr.msra.gmra.mrb[16].mxu1 %vm1635_vm9, %v9168_v43  ;;  %7327 = vmatprep.subr.bf16.mxu1 %v7326_v24  ;;  %v6068_v43 = vld [vmem:[%s11523_s5 + $0x338] sm:$0xff] }
 0x3a3   : > { %7329 = vmatpush1.bf16.msra.mxu1 %v7328_v27  ;;  %2033 = vmatprep.mubr.f32.mxu1 %v8241_v7  ;;  %v7338_v53 = vpack.c.bf16 %v6068_v43, %v6066_v35  ;;  %v2358_v35 = vld [vmem:[%s11526_s8 + $0x80] sm:$0xff]  ;;  %v2359_v43 = vld [vmem:[%s11526_s8 + $0x88] sm:$0xff] }
 0x3a4   : > { %7331 = vmatprep.subr.bf16.mxu1 %v7330_v19 }
 0x3a6   : > { %6052 = vmatmul.mubr.msk.f32.gmra.mrb[18].mxu1 %vm1635_vm9, %v1951_v33  ;;  %v6072_v33 = vld [vmem:[%s11523_s5 + $0x358] sm:$0xff] }
 0x3a7   : > { %7333 = vmatpush1.bf16.msra.mxu1 %v7332_v25  ;;  %2144 = vmatprep.mubr.f32.mxu1 %v8241_v7  ;;  %v7342_v52 = vpack.c.bf16 %v6072_v33, %v6070_v41 }
 0x3a8   : > { %7335 = vmatprep.subr.bf16.mxu1 %v7334_v30 }
 0x3ab   : > { %7337 = vmatpush1.bf16.msra.mxu1 %v7336_v39  ;;  %v7383_v39 = vpack.c.bf16 %v2359_v43, %v2358_v35 }
 0x3ac   : > { %7339 = vmatprep.subr.bf16.mxu1 %v7338_v53  ;;  %v2360_v53 = vld [vmem:[%s11526_s8 + $0x90] sm:$0xff] }
 0x3ad   : > { %v7386_v40 = vpack.c.bf16 %v2361_v36, %v2360_v53  ;;  %v2535_v53 = vld [vmem:[%s11527_s9 + $0x38] sm:$0xff]  ;;  %v6114_v36 = vld [vmem:[%s11527_s9 + $0x80] sm:$0xff] }
 0x3af   : > { %7341 = vmatpush1.bf16.msra.mxu1 %v7340_v45  ;;  %v6087_v45 = vld [vmem:[%s11526_s8 + $0xa0] sm:$0xff] }
 0x3b0   : > { %7343 = vmatprep.subr.bf16.mxu1 %v7342_v52  ;;  %v6088_v52 = vld [vmem:[%s11526_s8 + $0xa8] sm:$0xff] }
 0x3b3   : > { %7345 = vmatpush1.bf16.msra.mxu1 %v7344_v44 }
 0x3b4   : > { %6075 = vmatprep.subr.msk.mxu1 %vm1060_vm1, %v6074_v51 }
 0x3b7   : > { %6076 = vmatpush1.msk.msra.mxu1 %vm1060_vm1, %v6073_v54  ;;  %v7389_v54 = vpack.c.bf16 %v6088_v52, %v6087_v45  ;;  %v2536_v45 = vld [vmem:[%s11527_s9 + $0x40] sm:$0xff]  ;;  %v2537_v52 = vld [vmem:[%s11527_s9 + $0x48] sm:$0xff] }
 0x3b8   : > { %6077 = vmatmul.mubr.msk.f32.vlgmr.msra.gmra.mrb[16].mxu1 %vm1635_vm9, %v9173_v38  ;;  %v2344_v38 = vld [vmem:[%s11526_s8 + $0x10] sm:$0xff] }
 0x3b9   : > { %2150 = vmatprep.mubr.f32.mxu1 %v8241_v7 }
 0x3bc   : > { %6078 = vmatmul.mubr.msk.f32.gmra.mrb[18].mxu1 %vm1635_vm9, %v2068_v34  ;;  %v7362_v34 = vpack.c.bf16 %v2345_v26, %v2344_v38  ;;  %v7392_v38 = vpack.c.bf16 %v6090_v56, %v6089_v55  ;;  %v6092_v26 = vld [vmem:[%s11526_s8 + $0xc8] sm:$0xff]  ;;  %v6131_v56 = vld [vmem:[%s11527_s9 + $0xf0] sm:$0xff] }
 0x3bd   : > { %2257 = vmatprep.mubr.f32.mxu1 %v8241_v7 }
 0x3be   : > { %7363 = vmatpush1.bf16.msra.mxu0 %v7362_v34  ;;  %v7395_v34 = vpack.c.bf16 %v6092_v26, %v6091_v57  ;;  %v6120_v57 = vld [vmem:[%s11527_s9 + $0xa0] sm:$0xff]  ;;  %v6121_v26 = vld [vmem:[%s11527_s9 + $0xa8] sm:$0xff] }
 0x3bf   : > { %7364 = vmatprep.subr.bf16.mxu0 %v8242_v49 }
 0x3c2   : > { %7366 = vmatpush1.bf16.msra.mxu0 %v7365_v60  ;;  %v7398_v60 = vpack.c.bf16 %v6094_v59, %v6093_v58 }
 0x3c3   : > { %7367 = vmatprep.subr.bf16.mxu0 %v8242_v49 }
 0x3c6   : > { %7369 = vmatpush1.bf16.msra.mxu0 %v7368_v0  ;;  %v7401_v0 = vpack.c.bf16 %v6096_v63, %v6095_v62  ;;  %v6133_v62 = vld [vmem:[%s11527_s9 + $0x100] sm:$0xff]  ;;  %v6134_v63 = vld [vmem:[%s11527_s9 + $0x108] sm:$0xff] }
 0x3c7   : > { %7370 = vmatprep.subr.bf16.mxu0 %v8242_v49 }
 0x3ca   : > { %7372 = vmatpush1.bf16.msra.mxu0 %v7371_v2  ;;  %v7404_v2 = vpack.c.bf16 %v6098_v42, %v6097_v1  ;;  %v6122_v42 = vld [vmem:[%s11527_s9 + $0xb0] sm:$0xff] }
 0x3cb   : > { %7373 = vmatprep.subr.bf16.mxu0 %v8242_v49 }
 0x3ce   : > { %7375 = vmatpush1.bf16.msra.mxu0 %v7374_v5  ;;  %v7407_v5 = vpack.c.bf16 %v6100_v4, %v6099_v3  ;;  %v7467_v3 = vpack.c.bf16 %v6134_v63, %v6133_v62  ;;  %v6135_v4 = vld [vmem:[%s11527_s9 + $0x110] sm:$0xff] }
 0x3cf   : > { %7376 = vmatprep.subr.bf16.mxu0 %v8242_v49  ;;  %v2964_v63 = vld [vmem:[%s11529_s11 + $0x50] sm:$0xff] }
 0x3d2   : > { %7378 = vmatpush1.bf16.msra.mxu0 %v7377_v8  ;;  %v7410_v8 = vpack.c.bf16 %v6102_v32, %v6101_v6  ;;  %v6124_v32 = vld [vmem:[%s11527_s9 + $0xc0] sm:$0xff] }
 0x3d3   : > { %7379 = vmatprep.subr.bf16.mxu0 %v8242_v49 }
 0x3d6   : > { %7381 = vmatpush1.bf16.msra.mxu0 %v7380_v11  ;;  %v7413_v11 = vpack.c.bf16 %v6104_v10, %v6103_v9  ;;  %v6137_v10 = vld [vmem:[%s11527_s9 + $0x120] sm:$0xff] }
 0x3d7   : > { %7382 = vmatprep.subr.bf16.mxu0 %v8242_v49 }
 0x3da   : > { %7384 = vmatpush1.bf16.msra.mxu0 %v7383_v39  ;;  %v2534_v39 = vld [vmem:[%s11527_s9 + $0x30] sm:$0xff] }
 0x3db   : > { %7385 = vmatprep.subr.bf16.mxu0 %v8242_v49 }
 0x3de   : > { %7387 = vmatpush1.bf16.msra.mxu0 %v7386_v40  ;;  %v6115_v40 = vld [vmem:[%s11527_s9 + $0x88] sm:$0xff] }
 0x3df   : > { %7388 = vmatprep.subr.bf16.mxu0 %v8242_v49 }
 0x48b   : > { %v2146_v14 = vpop.f32.mrb[16].mxu1 }
 0x48c   : > { %v2148_v16 = vpop.f32.mrb[17].mxu1  ;;  %v2173_v18 = vadd.f32 %v2166_v13, %v2146_v14 }
 0x48d   : > { %v2174_v20 = vadd.f32 %v2170_v15, %v2148_v16  ;;  %v2529_v16 = vld [vmem:[%s11527_s9 + $0x8] sm:$0xff] }
 0x48e   : > { %v2177_v19 = vmax.f32 %v2173_v18, 0.0  ;;  %v6108_v18 = vld [vmem:[%s11527_s9 + $0x50] sm:$0xff] }
 0x48f   : > { %v2152_v22 = vpop.f32.mrb[18].mxu1  ;;  %v2178_v37 = vmax.f32 %v2174_v20, 0.0 }
 0x490   : > { %v2175_v23 = vadd.f32 %v2166_v13, %v2152_v22  ;;  %v2154_v24 = vpop.f32.mrb[19].mxu1  ;;  %v6106_v13 = vld [vmem:[%s11526_s8 + $0x138] sm:$0xff] }
 0x491   : > { %v2176_v27 = vadd.f32 %v2170_v15, %v2154_v24  ;;  %v7416_v14 = vpack.c.bf16 %v6106_v13, %v6105_v12  ;;  %v2528_v15 = vld [vmem:[%s11527_s9] sm:$0xff]  ;;  %v6109_v22 = vld [vmem:[%s11527_s9 + $0x58] sm:$0xff]  ;;  %v6126_v13 = vld [vmem:[%s11527_s9 + $0xd0] sm:$0xff] }
 0x492   : > { %v2179_v28 = vmax.f32 %v2175_v23, 0.0  ;;  %v7434_v20 = vpack.c.bf16 %v2529_v16, %v2528_v15  ;;  %v2530_v23 = vld [vmem:[%s11527_s9 + $0x10] sm:$0xff]  ;;  %v2531_v24 = vld [vmem:[%s11527_s9 + $0x18] sm:$0xff] }
 0x493   : > { %v2180_v29 = vmax.f32 %v2176_v27, 0.0  ;;  %v7419_v27 = vpack.c.bf16 %v6109_v22, %v6108_v18  ;;  %v6139_v16 = vld [vmem:[%s11527_s9 + $0x130] sm:$0xff]  ;;  %v6140_v18 = vld [vmem:[%s11527_s9 + $0x138] sm:$0xff]  ;;  %v6128_v22 = vld [vmem:[%s11527_s9 + $0xe0] sm:$0xff] }
 0x494   : > { %v7349_v21 = vpack.c.bf16 %v2179_v28, %v2177_v19  ;;  %v6110_v19 = vld [vmem:[%s11527_s9 + $0x60] sm:$0xff]  ;;  %v6111_v28 = vld [vmem:[%s11527_s9 + $0x68] sm:$0xff] }
 0x495   : > { %v7346_v30 = vpack.c.bf16 %v2180_v29, %v2178_v37  ;;  %v7437_v37 = vpack.c.bf16 %v2531_v24, %v2530_v23  ;;  %v7422_v29 = vpack.c.bf16 %v6111_v28, %v6110_v19  ;;  %v6129_v23 = vld [vmem:[%s11527_s9 + $0xe8] sm:$0xff]  ;;  %v7476_v24 = vpack.c.bf16 %v6140_v18, %v6139_v16  ;;  %v6142_v19 = vld [vmem:[%s11527_s9 + $0x140] sm:$0xff] }
 0x496   : > { %v6143_v28 = vld [vmem:[%s11527_s9 + $0x148] sm:$0xff] }
 0x497   : > { %7348 = vmatprep.subr.msk.bf16.mxu1 %vm9510_vm11, %v7346_v30 }
 0x498   : > { %7351 = vmatpush1.bf16.msk.msra.mxu1 %vm9510_vm11, %v7349_v21 }
 0x499   : > { %7354 = vmatprep.subr.msk.bf16.mxu1 %vm9510_vm11, %v7346_v30  ;;  %v2533_v30 = vld [vmem:[%s11527_s9 + $0x28] sm:$0xff] }
 0x49b   : > { %6081 = vmatmul.mubr.msk.f32.vlgmr.msra.gmra.mrb[20].mxu1 %vm2182_vm12, %v2181_v31  ;;  %v6112_v31 = vld [vmem:[%s11527_s9 + $0x70] sm:$0xff] }
 0x49c   : > { %7357 = vmatpush1.bf16.msk.msra.mxu1 %vm9510_vm11, %v7349_v21  ;;  %2333 = vmatprep.mubr.f32.mxu1 %v8241_v7  ;;  %v2532_v21 = vld [vmem:[%s11527_s9 + $0x20] sm:$0xff] }
 0x49d   : > { %7418 = vmatprep.subr.bf16.mxu1 %v8242_v49  ;;  %v7440_v35 = vpack.c.bf16 %v2533_v30, %v2532_v21  ;;  %v6144_v30 = vld [vmem:[%s11527_s9 + $0x150] sm:$0xff] }
 0x49f   : > { %6085 = vmatmul.mubr.msk.f32.vlgmr.msra.gmra.mrb[22].mxu1 %vm2182_vm12, %v6082_v48  ;;  %v6113_v48 = vld [vmem:[%s11527_s9 + $0x78] sm:$0xff] }
 0x4a0   : > { %7420 = vmatpush3.bf16.msra.mxu1 %v7419_v27  ;;  %v7425_v43 = vpack.c.bf16 %v6113_v48, %v6112_v31  ;;  %6696 = vmatprep.mubr.msk.f32.mxu1 %vm8244_vm14, %v8241_v7  ;;  %v7461_v27 = vpack.c.bf16 %v6129_v23, %v6128_v22  ;;  %v6145_v31 = vld [vmem:[%s11527_s9 + $0x158] sm:$0xff] }
 0x4a1   : > { %7421 = vmatprep.subr.bf16.mxu1 %v8242_v49  ;;  %v7482_v48 = vpack.c.bf16 %v6145_v31, %v6144_v30  ;;  %v6164_v30 = vld [vmem:[%s11519_s1 + $0xf8] sm:$0xff] }
 0x4a4   : > { %7423 = vmatpush3.bf16.msra.mxu1 %v7422_v29  ;;  %v7479_v29 = vpack.c.bf16 %v6143_v28, %v6142_v19 }
 0x4a5   : > { %7424 = vmatprep.subr.bf16.mxu1 %v8242_v49 }
 0x4a8   : > { %7426 = vmatpush3.bf16.msra.mxu1 %v7425_v43  ;;  %v6147_v43 = vld [vmem:[%s11527_s9 + $0x168] sm:$0xff] }
 0x4a9   : > { %7427 = vmatprep.subr.bf16.mxu1 %v8242_v49 }
 0x56e   : > { %v2259_v41 = vpop.f32.mrb[20].mxu1 }
 0x56f   : > { %v2261_v33 = vpop.f32.mrb[21].mxu1 }
 0x572   : > { %v2335_v61 = vpop.f32.mrb[22].mxu1 }
 0x573   : > { %v2340_v50 = vmax.f32 %v2259_v41, %v2335_v61  ;;  %v2337_v44 = vpop.f32.mrb[23].mxu1  ;;  %v7443_v41 = vpack.c.bf16 %v2535_v53, %v2534_v39  ;;  %v7446_v61 = vpack.c.bf16 %v2537_v52, %v2536_v45  ;;  %v6148_v53 = vld [vmem:[%s11527_s9 + $0x170] sm:$0xff] }
 0x574   : > { %v2341_v51 = vmax.f32 %v2261_v33, %v2337_v44  ;;  %v7428_v33 = vpack.c.bf16 %v6115_v40, %v6114_v36  ;;  %v6117_v44 = vld [vmem:[%s11527_s9 + $0x98] sm:$0xff] }
 0x575   : > { %v6149_v36 = vld [vmem:[%s11527_s9 + $0x178] sm:$0xff] }
 0x576   : > { %6086 = vmatprep.mubr.msk.f32.mxu0 %vm2362_vm13, %v2341_v51  ;;  %7429 = vmatpush3.bf16.msra.mxu1 %v7428_v33  ;;  %v7488_v40 = vpack.c.bf16 %v6149_v36, %v6148_v53  ;;  %v6151_v33 = vld [vmem:[%s11527_s9 + $0x188] sm:$0xff]  ;;  %v6163_v53 = vld [vmem:[%s11519_s1 + $0xf0] sm:$0xff] }
 0x577   : > { %2431 = vmatmul.mubr.f32.vlgmr.msra.gmra.mrb[8].mxu0 %v2340_v50  ;;  %7430 = vmatprep.subr.bf16.mxu1 %v8242_v49  ;;  %v6166_v36 = vld [vmem:[%s11519_s1 + $0x108] sm:$0xff] }
 0x578   : > { %7390 = vmatpush1.bf16.msra.mxu0 %v7389_v54  ;;  %6107 = vmatprep.mubr.msk.f32.mxu0 %vm2362_vm13, %v2341_v51 }
 0x579   : > { %7391 = vmatprep.subr.bf16.mxu0 %v8242_v49 }
 0x57c   : > { %7393 = vmatpush1.bf16.msra.mxu0 %v7392_v38  ;;  %v6132_v38 = vld [vmem:[%s11527_s9 + $0xf8] sm:$0xff] }
 0x57d   : > { %7394 = vmatprep.subr.bf16.mxu0 %v8242_v49  ;;  %v7464_v58 = vpack.c.bf16 %v6132_v38, %v6131_v56  ;;  %v2958_v56 = vld [vmem:[%s11529_s11 + $0x20] sm:$0xff]  ;;  %v2959_v38 = vld [vmem:[%s11529_s11 + $0x28] sm:$0xff] }
 0x580   : > { %7396 = vmatpush1.bf16.msra.mxu0 %v7395_v34 }
 0x581   : > { %7397 = vmatprep.subr.bf16.mxu0 %v8242_v49 }
 0x584   : > { %7399 = vmatpush1.bf16.msra.mxu0 %v7398_v60 }
 0x585   : > { %7400 = vmatprep.subr.bf16.mxu0 %v8242_v49 }
 0x588   : > { %7402 = vmatpush1.bf16.msra.mxu0 %v7401_v0  ;;  %v7449_v0 = vpack.c.bf16 %v6121_v26, %v6120_v57  ;;  %v7500_v57 = vpack.c.bf16 %v2959_v38, %v2958_v56  ;;  %v2960_v26 = vld [vmem:[%s11529_s11 + $0x30] sm:$0xff]  ;;  %v3045_v38 = vld [vmem:[%s11531_s13 + $0x18] sm:$0xff] }
 0x589   : > { %7403 = vmatprep.subr.bf16.mxu0 %v8242_v49 }
 0x58c   : > { %7405 = vmatpush1.bf16.msra.mxu0 %v7404_v2  ;;  %v6123_v2 = vld [vmem:[%s11527_s9 + $0xb8] sm:$0xff] }
 0x58d   : > { %7406 = vmatprep.subr.bf16.mxu0 %v8242_v49  ;;  %v7452_v6 = vpack.c.bf16 %v6123_v2, %v6122_v42  ;;  %v2966_v42 = vld [vmem:[%s11529_s11 + $0x60] sm:$0xff]  ;;  %v2967_v2 = vld [vmem:[%s11529_s11 + $0x68] sm:$0xff] }
 0x590   : > { %7408 = vmatpush1.bf16.msra.mxu0 %v7407_v5  ;;  %v6136_v5 = vld [vmem:[%s11527_s9 + $0x118] sm:$0xff] }
 0x591   : > { %7409 = vmatprep.subr.bf16.mxu0 %v8242_v49  ;;  %v7470_v9 = vpack.c.bf16 %v6136_v5, %v6135_v4  ;;  %v2968_v4 = vld [vmem:[%s11529_s11 + $0x70] sm:$0xff]  ;;  %v2969_v5 = vld [vmem:[%s11529_s11 + $0x78] sm:$0xff] }
 0x594   : > { %7411 = vmatpush1.bf16.msra.mxu0 %v7410_v8  ;;  %v6125_v8 = vld [vmem:[%s11527_s9 + $0xc8] sm:$0xff] }
 0x595   : > { %7412 = vmatprep.subr.bf16.mxu0 %v8242_v49  ;;  %v7455_v12 = vpack.c.bf16 %v6125_v8, %v6124_v32  ;;  %v6158_v32 = vld [vmem:[%s11519_s1 + $0xc8] sm:$0xff]  ;;  %v6160_v8 = vld [vmem:[%s11519_s1 + $0xd8] sm:$0xff] }
 0x598   : > { %7414 = vmatpush1.bf16.msra.mxu0 %v7413_v11  ;;  %v6138_v11 = vld [vmem:[%s11527_s9 + $0x128] sm:$0xff] }
 0x599   : > { %7415 = vmatprep.subr.bf16.mxu0 %v8242_v49  ;;  %v7473_v15 = vpack.c.bf16 %v6138_v11, %v6137_v10 }
 0x59c   : > { %7417 = vmatpush1.bf16.msra.mxu0 %v7416_v14  ;;  %v6127_v14 = vld [vmem:[%s11527_s9 + $0xd8] sm:$0xff] }
 0x59d   : > { %7433 = vmatprep.subr.bf16.mxu0 %v8242_v49 }
 0x59f   : > { %2522 = vmatmul.mubr.f32.vlgmr.msra.gmra.mrb[10].mxu0 %v2340_v50  ;;  %v6116_v50 = vld [vmem:[%s11527_s9 + $0x90] sm:$0xff] }
 0x5a0   : > { %7435 = vmatpush3.bf16.msra.mxu0 %v7434_v20  ;;  %v7431_v51 = vpack.c.bf16 %v6117_v44, %v6116_v50  ;;  %6719 = vmatprep.mubr.msk.f32.mxu0 %vm8244_vm14, %v8241_v7  ;;  %v7458_v20 = vpack.c.bf16 %v6127_v14, %v6126_v13  ;;  %v2955_v50 = vld [vmem:[%s11529_s11 + $0x8] sm:$0xff] }
 0x5a1   : > { %7436 = vmatprep.subr.bf16.mxu0 %v8242_v49 }
 0x5a2   : > { %7432 = vmatpush3.bf16.msra.mxu1 %v7431_v51  ;;  %v2956_v51 = vld [vmem:[%s11529_s11 + $0x10] sm:$0xff] }
 0x5a3   : > { %7448 = vmatprep.subr.bf16.mxu1 %v8242_v49 }
 0x5a4   : > { %7438 = vmatpush3.bf16.msra.mxu0 %v7437_v37 }
 0x5a5   : > { %7439 = vmatprep.subr.bf16.mxu0 %v8242_v49 }
 0x5a8   : > { %7441 = vmatpush3.bf16.msra.mxu0 %v7440_v35  ;;  %v6146_v35 = vld [vmem:[%s11527_s9 + $0x160] sm:$0xff] }
 0x5a9   : > { %7442 = vmatprep.subr.bf16.mxu0 %v8242_v49  ;;  %v7485_v39 = vpack.c.bf16 %v6147_v43, %v6146_v35 }
 0x5ac   : > { %7444 = vmatpush3.bf16.msra.mxu0 %v7443_v41  ;;  %v6150_v41 = vld [vmem:[%s11527_s9 + $0x180] sm:$0xff] }
 0x5ad   : > { %7445 = vmatprep.subr.bf16.mxu0 %v8242_v49  ;;  %v7491_v45 = vpack.c.bf16 %v6151_v33, %v6150_v41 }
 0x5b0   : > { %7447 = vmatpush3.bf16.msra.mxu0 %v7446_v61  ;;  %v2954_v61 = vld [vmem:[%s11529_s11] sm:$0xff] }
 0x5b1   : > { %7463 = vmatprep.subr.bf16.mxu0 %v8242_v49  ;;  %v7494_v44 = vpack.c.bf16 %v2955_v50, %v2954_v61  ;;  %v6170_v61 = vld [vmem:[%s11519_s1 + $0x128] sm:$0xff]  ;;  %v6172_v50 = vld [vmem:[%s11519_s1 + $0x138] sm:$0xff] }
 0x64a   : > { %v2432_v54 = vpop.f32.mrb[8].mxu0 }
 0x64b   : > { %v2434_v55 = vpop.f32.mrb[9].mxu0 }
 0x672   : > { %v2523_v34 = vpop.f32.mrb[10].mxu0 }
 0x673   : > { %v9704_v59 = vmax.f32 %v2432_v54, %v2523_v34  ;;  %v2525_v60 = vpop.f32.mrb[11].mxu0  ;;  %v2957_v54 = vld [vmem:[%s11529_s11 + $0x18] sm:$0xff] }
 0x674   : > { %v7497_v55 = vpack.c.bf16 %v2957_v54, %v2956_v51  ;;  %v2961_v34 = vld [vmem:[%s11529_s11 + $0x38] sm:$0xff]  ;;  %v2963_v60 = vld [vmem:[%s11529_s11 + $0x48] sm:$0xff]  ;;  %v3044_v54 = vld [vmem:[%s11531_s13 + $0x10] sm:$0xff] }
 0x675   : > { %6720 = vmatmul.mubr.msk.f32.vlgmr.msra.gmra.mrb[12].mxu0 %vm2551_vm15, %v9704_v59  ;;  %v2550_v1 = vrot.slane %v9704_v59, 1  ;;  %v2792_v37 = vrot.slane %v9704_v59, 3  ;;  %v2707_v21 = vrot.slane %v9704_v59, 2  ;;  %v2877_v52 = vrot.slane %v9704_v59, 4  ;;  %v2962_v59 = vld [vmem:[%s11529_s11 + $0x40] sm:$0xff]  ;;  %v3043_v51 = vld [vmem:[%s11531_s13 + $0x8] sm:$0xff] }
 0x676   : > { %7465 = vmatpush3.bf16.msra.mxu0 %v7464_v58  ;;  %6765 = vmatprep.mubr.msk.f32.mxu0 %vm8244_vm14, %v8241_v7  ;;  %v7503_v58 = vpack.c.bf16 %v2961_v34, %v2960_v26  ;;  %v7506_v62 = vpack.c.bf16 %v2963_v60, %v2962_v59  ;;  %v6169_v26 = vld [vmem:[%s11519_s1 + $0x120] sm:$0xff]  ;;  %v6171_v34 = vld [vmem:[%s11519_s1 + $0x130] sm:$0xff]  ;;  %v6176_v59 = vld [vmem:[%s11519_s1 + $0x158] sm:$0xff]  ;;  %v7521_v60 = vpack.c.bf16 %v3045_v38, %v3044_v54 }
 0x677   : > { %6697 = vmatmul.mubr.msk.f32.vlgmr.msra.gmra.mrb[24].mxu1 %vm2551_vm15, %v2550_v1  ;;  %7466 = vmatprep.subr.bf16.mxu0 %v8242_v49  ;;  %v3146_v38 = vld [vmem:[%s11519_s1 + $0x50] sm:$0xff] }
 0x678   : > { %7450 = vmatpush3.bf16.msra.mxu1 %v7449_v0  ;;  %6742 = vmatprep.mubr.msk.f32.mxu1 %vm8244_vm14, %v8241_v7  ;;  %v2965_v0 = vld [vmem:[%s11529_s11 + $0x58] sm:$0xff] }
 0x679   : > { %7451 = vmatprep.subr.bf16.mxu1 %v8242_v49  ;;  %v7509_v1 = vpack.c.bf16 %v2965_v0, %v2964_v63  ;;  %v3047_v63 = vld [vmem:[%s11531_s13 + $0x28] sm:$0xff]  ;;  %v7555_v0 = vpack.c.bf16 %v6171_v34, %v6169_v26  ;;  %v3151_v26 = vld [vmem:[%s11519_s1 + $0x78] sm:$0xff] }
 0x67a   : > { %7468 = vmatpush3.bf16.msra.mxu0 %v7467_v3  ;;  %v7512_v3 = vpack.c.bf16 %v2967_v2, %v2966_v42  ;;  %v6173_v42 = vld [vmem:[%s11519_s1 + $0x140] sm:$0xff]  ;;  %v6175_v2 = vld [vmem:[%s11519_s1 + $0x150] sm:$0xff] }
 0x67b   : > { %7469 = vmatprep.subr.bf16.mxu0 %v8242_v49 }
 0x67c   : > { %7453 = vmatpush3.bf16.msra.mxu1 %v7452_v6  ;;  %v7515_v6 = vpack.c.bf16 %v2969_v5, %v2968_v4  ;;  %v6180_v4 = vld [vmem:[%s11519_s1 + $0x178] sm:$0xff] }
 0x67d   : > { %7454 = vmatprep.subr.bf16.mxu1 %v8242_v49 }
 0x67e   : > { %7471 = vmatpush3.bf16.msra.mxu0 %v7470_v9  ;;  %v7541_v9 = vpack.c.bf16 %v6160_v8, %v6158_v32  ;;  %v3049_v32 = vld [vmem:[%s11531_s13 + $0x38] sm:$0xff]  ;;  %v7559_v8 = vpack.c.bf16 %v6175_v2, %v6173_v42 }
 0x67f   : > { %7472 = vmatprep.subr.bf16.mxu0 %v8242_v49 }
 0x680   : > { %7456 = vmatpush3.bf16.msra.mxu1 %v7455_v12 }
 0x681   : > { %7457 = vmatprep.subr.bf16.mxu1 %v8242_v49 }
 0x682   : > { %7474 = vmatpush3.bf16.msra.mxu0 %v7473_v15 }
 0x683   : > { %7475 = vmatprep.subr.bf16.mxu0 %v8242_v49 }
 0x684   : > { %7459 = vmatpush3.bf16.msra.mxu1 %v7458_v20 }
 0x685   : > { %7460 = vmatprep.subr.bf16.mxu1 %v8242_v49 }
 0x686   : > { %7477 = vmatpush3.bf16.msra.mxu0 %v7476_v24 }
 0x687   : > { %7493 = vmatprep.subr.bf16.mxu0 %v8242_v49 }
 0x688   : > { %7462 = vmatpush3.bf16.msra.mxu1 %v7461_v27  ;;  %v2951_v27 = vld [vmem:[%s11528_s10] sm:$0x1] }
 0x689   : > { %6766 = vmatmul.mubr.msk.f32.vlgmr.msra.gmra.mrb[14].mxu0 %vm2551_vm15, %v2792_v37  ;;  %7478 = vmatprep.subr.bf16.mxu1 %v8242_v49  ;;  %v6157_v37 = vld [vmem:[%s11519_s1 + $0xc0] sm:$0xff] }
 0x68a   : > { %6823 = vmatprep.mubr.msk.f32.mxu0 %vm8244_vm14, %v8241_v7  ;;  %7495 = vmatpush3.bf16.msra.mxu0 %v7494_v44  ;;  %v3042_v44 = vld [vmem:[%s11531_s13] sm:$0xff] }
 0x68b   : > { %6743 = vmatmul.mubr.msk.f32.vlgmr.msra.gmra.mrb[26].mxu1 %vm2551_vm15, %v2707_v21  ;;  %7496 = vmatprep.subr.bf16.mxu0 %v8242_v49  ;;  %v6162_v21 = vld [vmem:[%s11519_s1 + $0xe8] sm:$0xff]  ;;  %v7518_v56 = vpack.c.bf16 %v3043_v51, %v3042_v44 }
 0x68c   : > { %7480 = vmatpush3.bf16.msra.mxu1 %v7479_v29  ;;  %6788 = vmatprep.mubr.msk.f32.mxu1 %vm8244_vm14, %v8241_v7  ;;  %v6159_v29 = vld [vmem:[%s11519_s1 + $0xd0] sm:$0xff]  ;;  %v7545_v43 = vpack.c.bf16 %v6164_v30, %v6162_v21  ;;  %v3143_v21 = vld [vmem:[%s11519_s1 + $0x38] sm:$0xff] }
 0x68d   : > { %7481 = vmatprep.subr.bf16.mxu1 %v8242_v49 }
 0x68e   : > { %7498 = vmatpush3.bf16.msra.mxu0 %v7497_v55 }
 0x68f   : > { %7499 = vmatprep.subr.bf16.mxu0 %v8242_v49 }
 0x690   : > { %7483 = vmatpush3.bf16.msra.mxu1 %v7482_v48  ;;  %v7543_v48 = vpack.c.bf16 %v6159_v29, %v6157_v37  ;;  %v10004_v37 = vld [vmem:[%s8424_s15 + $0x30] sm:$0xff]  ;;  %v3141_v29 = vld [vmem:[%s11519_s1 + $0x28] sm:$0xff] }
 0x691   : > { %7484 = vmatprep.subr.bf16.mxu1 %v8242_v49 }
 0x692   : > { %7501 = vmatpush3.bf16.msra.mxu0 %v7500_v57  ;;  %v7553_v57 = vpack.c.bf16 %v6172_v50, %v6170_v61  ;;  %v3054_v61 = vld [vmem:[%s11531_s13 + $0x60] sm:$0xff]  ;;  %v3055_v50 = vld [vmem:[%s11531_s13 + $0x68] sm:$0xff] }
 0x693   : > { %7502 = vmatprep.subr.bf16.mxu0 %v8242_v49  ;;  %v7536_v34 = vpack.c.bf16 %v3055_v50, %v3054_v61 }
 0x694   : > { %7486 = vmatpush3.bf16.msra.mxu1 %v7485_v39  ;;  %v6161_v39 = vld [vmem:[%s11519_s1 + $0xe0] sm:$0xff] }
 0x695   : > { %7487 = vmatprep.subr.bf16.mxu1 %v8242_v49  ;;  %v7547_v41 = vpack.c.bf16 %v6163_v53, %v6161_v39  ;;  %v3191_v39 = vrot.slane %v10004_v37, 1  ;;  %v7569_v53 = vpack.c.bf16 %v3143_v21, %v3141_v29  ;;  %v6198_v29 = vld [vmem:[%s11519_s1 + $0x1c8] sm:$0xff]  ;;  %v6200_v21 = vld [vmem:[%s11519_s1 + $0x1d8] sm:$0xff] }
 0x696   : > { %7504 = vmatpush3.bf16.msra.mxu0 %v7503_v58  ;;  %v6174_v58 = vld [vmem:[%s11519_s1 + $0x148] sm:$0xff] }
 0x697   : > { %7505 = vmatprep.subr.bf16.mxu0 %v8242_v49 }
 0x698   : > { %7489 = vmatpush3.bf16.msra.mxu1 %v7488_v40  ;;  %v6168_v40 = vld [vmem:[%s11519_s1 + $0x118] sm:$0xff] }
 0x699   : > { %7490 = vmatprep.subr.bf16.mxu1 %v8242_v49  ;;  %v7549_v33 = vpack.c.bf16 %v6168_v40, %v6166_v36  ;;  %v3140_v36 = vld [vmem:[%s11519_s1 + $0x20] sm:$0xff]  ;;  %v3142_v40 = vld [vmem:[%s11519_s1 + $0x30] sm:$0xff] }
 0x69a   : > { %7507 = vmatpush3.bf16.msra.mxu0 %v7506_v62  ;;  %v3046_v62 = vld [vmem:[%s11531_s13 + $0x20] sm:$0xff]  ;;  %v7571_v44 = vpack.c.bf16 %v3142_v40, %v3140_v36 }
 0x69b   : > { %7508 = vmatprep.subr.bf16.mxu0 %v8242_v49  ;;  %v7524_v5 = vpack.c.bf16 %v3047_v63, %v3046_v62  ;;  %v3148_v62 = vld [vmem:[%s11519_s1 + $0x60] sm:$0xff]  ;;  %v3150_v63 = vld [vmem:[%s11519_s1 + $0x70] sm:$0xff] }
 0x69c   : > { %7492 = vmatpush3.bf16.msra.mxu1 %v7491_v45  ;;  %v6165_v45 = vld [vmem:[%s11519_s1 + $0x100] sm:$0xff]  ;;  %v7579_v42 = vpack.c.bf16 %v3150_v63, %v3148_v62 }
 0x69d   : > { %7517 = vmatprep.subr.bf16.mxu1 %v8242_v49  ;;  %v6201_v40 = vld [vmem:[%s11519_s1 + $0x1e0] sm:$0xff] }
 0x69e   : > { %7510 = vmatpush3.bf16.msra.mxu0 %v7509_v1  ;;  %v7557_v1 = vpack.c.bf16 %v6176_v59, %v6174_v58 }
 0x69f   : > { %6789 = vmatmul.mubr.msk.f32.vlgmr.msra.gmra.mrb[28].mxu1 %vm2551_vm15, %v2877_v52  ;;  %7511 = vmatprep.subr.bf16.mxu0 %v8242_v49  ;;  %v6167_v52 = vld [vmem:[%s11519_s1 + $0x110] sm:$0xff] }
 0x6a0   : > { %6858 = vmatprep.mubr.msk.f32.mxu1 %vm8244_vm14, %v8241_v7  ;;  %v7551_v55 = vpack.c.bf16 %v6167_v52, %v6165_v45  ;;  %7519 = vmatpush3.bf16.msra.mxu1 %v7518_v56  ;;  %v3147_v45 = vld [vmem:[%s11519_s1 + $0x58] sm:$0xff]  ;;  %v3144_v56 = vld [vmem:[%s11519_s1 + $0x40] sm:$0xff] }
 0x6a1   : > { %7520 = vmatprep.subr.bf16.mxu1 %v8242_v49  ;;  %v7575_v58 = vpack.c.bf16 %v3146_v38, %v3144_v56 }
 0x6a2   : > { %7513 = vmatpush3.bf16.msra.mxu0 %v7512_v3  ;;  %v6178_v3 = vld [vmem:[%s11519_s1 + $0x168] sm:$0xff] }
 0x6a3   : > { %7514 = vmatprep.subr.bf16.mxu0 %v8242_v49 }
 0x6a4   : > { %7522 = vmatpush3.bf16.msra.mxu1 %v7521_v60 }
 0x6a5   : > { %7523 = vmatprep.subr.bf16.mxu1 %v8242_v49 }
 0x6a6   : > { %7516 = vmatpush3.bf16.msra.mxu0 %v7515_v6  ;;  %v3048_v6 = vld [vmem:[%s11531_s13 + $0x30] sm:$0xff] }
 0x6a7   : > { %7542 = vmatprep.subr.bf16.mxu0 %v7541_v9  ;;  %v6177_v9 = vld [vmem:[%s11519_s1 + $0x160] sm:$0xff] }
 0x6a8   : > { %7525 = vmatpush3.bf16.msra.mxu1 %v7524_v5  ;;  %v3157_v5 = vld [vmem:[%s11519_s1 + $0xa8] sm:$0xff] }
 0x6a9   : > { %7526 = vmatprep.subr.bf16.mxu1 %v8242_v49 }
 0x748   : > { %v2692_v10 = vpop.f32.mrb[12].mxu0 }
 0x749   : > { %v6721_v11 = vpop.f32.mrb[13].mxu0 }
 0x74a   : > { %v2620_v12 = vpop.f32.mrb[24].mxu1  ;;  %v6179_v11 = vld [vmem:[%s11519_s1 + $0x170] sm:$0xff] }
 0x74b   : > { %v2693_v13 = vadd.f32 %v2692_v10, %v2620_v12  ;;  %v6698_v14 = vpop.f32.mrb[25].mxu1  ;;  %v7561_v10 = vpack.c.bf16 %v6180_v4, %v6178_v3  ;;  %v9977_v12 = vld [vmem:[%s8424_s15 + $0x20] sm:$0xff]  ;;  %v3154_v4 = vld [vmem:[%s11519_s1 + $0x90] sm:$0xff] }
 0x74c   : > { %v3137_v14 = vld [vmem:[%s11519_s1 + $0x8] sm:$0xff]  ;;  %v3152_v3 = vld [vmem:[%s11519_s1 + $0x80] sm:$0xff] }
 0x75c   : > { %v2861_v15 = vpop.f32.mrb[14].mxu0 }
 0x75d   : > { %v6767_v16 = vpop.f32.mrb[15].mxu0 }
 0x75e   : > { %v2776_v18 = vpop.f32.mrb[26].mxu1  ;;  %v7527_v16 = vpack.c.bf16 %v3049_v32, %v3048_v6  ;;  %v3159_v6 = vld [vmem:[%s11519_s1 + $0xb8] sm:$0xff]  ;;  %v7583_v32 = vpack.c.bf16 %v3154_v4, %v3152_v3 }
 0x75f   : > { %v2780_v20 = vadd.f32 %v2776_v18, %v2693_v13  ;;  %v6744_v22 = vpop.f32.mrb[27].mxu1  ;;  %v9980_v13 = vld [vmem:[%s8424_s15 + $0x28] sm:$0xff]  ;;  %v3050_v18 = vld [vmem:[%s11531_s13 + $0x40] sm:$0xff] }
 0x760   : > { %v7563_v22 = vpack.c.bf16 %v6179_v11, %v6177_v9  ;;  %7528 = vmatpush3.bf16.msra.mxu1 %v7527_v16  ;;  %v3156_v9 = vld [vmem:[%s11519_s1 + $0xa0] sm:$0xff]  ;;  %v6190_v11 = vld [vmem:[%s11519_s1 + $0x188] sm:$0xff]  ;;  %v3414_v62 = vrot.slane %v9980_v13, 2 }
 0x761   : > { %v2865_v23 = vadd.f32 %v2861_v15, %v2780_v20  ;;  %v3139_v15 = vld [vmem:[%s11519_s1 + $0x18] sm:$0xff]  ;;  %v3051_v20 = vld [vmem:[%s11531_s13 + $0x48] sm:$0xff]  ;;  %7529 = vmatprep.subr.bf16.mxu1 %v8242_v49 }
 0x762   : > { %v7530_v30 = vpack.c.bf16 %v3051_v20, %v3050_v18  ;;  %v6189_v18 = vld [vmem:[%s11519_s1 + $0x180] sm:$0xff]  ;;  %v6191_v20 = vld [vmem:[%s11519_s1 + $0x190] sm:$0xff] }
 0x764   : > { %7531 = vmatpush3.bf16.msra.mxu1 %v7530_v30 }
 0x765   : > { %7532 = vmatprep.subr.bf16.mxu1 %v8242_v49 }
 0x772   : > { %v2946_v24 = vpop.f32.mrb[28].mxu1 }
 0x773   : > { %v2950_v19 = vadd.f32 %v2946_v24, %v2865_v23  ;;  %v6790_v28 = vpop.f32.mrb[29].mxu1  ;;  %v3188_v23 = vrot.slane %v9977_v12, 1  ;;  %v3189_v24 = vrot.slane %v9980_v13, 1 }
 0x774   : > { %v3138_v28 = vld [vmem:[%s11519_s1 + $0x10] sm:$0xff] }
 0x775   : > { %v2952_v31 = vadd.f32 %v2951_v27, %v2950_v19  ;;  %v7565_v27 = vpack.c.bf16 %v3139_v15, %v3137_v14  ;;  %v3136_v19 = vld [vmem:[%s11519_s1] sm:$0xff]  ;;  %v3192_v51 = vsel %vm556_vm2, %v3189_v24, %v3191_v39  ;;  %v6192_v14 = vld [vmem:[%s11519_s1 + $0x198] sm:$0xff] }
 0x776   : > { %v7589_v16 = vpack.c.bf16 %v6192_v14, %v6190_v11 }
 0x777   : > { %v2953_v35 = vmax.f32 %v2952_v31, 0.0  ;;  %v3052_v31 = vld [vmem:[%s11531_s13 + $0x50] sm:$0xff] }
 0x779   : > { %6824 = vmatmul.mubr.f32.vlgmr.msra.gmra.mrb[16].mxu0 %v2953_v35  ;;  %v3190_v35 = vsel %vm556_vm2, %v3188_v23, %v3189_v24  ;;  %v6196_v23 = vld [vmem:[%s11519_s1 + $0x1b8] sm:$0xff]  ;;  %v7591_v24 = vpack.c.bf16 %v6191_v20, %v6189_v18  ;;  %v6225_v18 = vld [vmem:[%s11519_s1 + $0x280] sm:$0xff]  ;;  %v6227_v20 = vld [vmem:[%s11519_s1 + $0x290] sm:$0xff] }
 0x77a   : > { %7544 = vmatpush1.bf16.msra.mxu0 %v7543_v48  ;;  %3267 = vmatprep.mubr.f32.mxu0 %v8241_v7  ;;  %v3053_v48 = vld [vmem:[%s11531_s13 + $0x58] sm:$0xff] }
 0x77b   : > { %7546 = vmatprep.subr.bf16.mxu0 %v7545_v43  ;;  %v7567_v43 = vpack.c.bf16 %v3138_v28, %v3136_v19  ;;  %v7533_v52 = vpack.c.bf16 %v3053_v48, %v3052_v31  ;;  %v6193_v19 = vld [vmem:[%s11519_s1 + $0x1a0] sm:$0xff]  ;;  %v6195_v28 = vld [vmem:[%s11519_s1 + $0x1b0] sm:$0xff]  ;;  %v7597_v31 = vpack.c.bf16 %v6200_v21, %v6198_v29  ;;  %v6234_v21 = vld [vmem:[%s11519_s1 + $0x2c8] sm:$0xff] }
 0x77c   : > { %v7595_v30 = vpack.c.bf16 %v6195_v28, %v6193_v19  ;;  %v6197_v48 = vld [vmem:[%s11519_s1 + $0x1c0] sm:$0xff]  ;;  %v6231_v29 = vld [vmem:[%s11519_s1 + $0x2b0] sm:$0xff] }
 0x77d   : > { %7534 = vmatpush3.bf16.msra.mxu1 %v7533_v52  ;;  %v6208_v52 = vld [vmem:[%s11519_s1 + $0x218] sm:$0xff]  ;;  %v6229_v28 = vld [vmem:[%s11519_s1 + $0x2a0] sm:$0xff] }
 0x77e   : > { %7548 = vmatpush1.bf16.msra.mxu0 %v7547_v41  ;;  %v10028_v41 = vld [vmem:[%s8424_s15 + $0x38] sm:$0xff]  ;;  %7535 = vmatprep.subr.bf16.mxu1 %v8242_v49  ;;  %s10490_s15 = scalar_lea.vmem [#allocation2], %s5816_s29  ;;  %s11471_s29 = scalar_lea.hbm %s11554_s24, %s6497_s16 }
 0x77f   : > { %7550 = vmatprep.subr.bf16.mxu0 %v7549_v33  ;;  %v3145_v33 = vld [vmem:[%s11519_s1 + $0x48] sm:$0xff]  ;;  %v3193_v54 = vrot.slane %v10028_v41, 1  ;;  %s5750_s30 = sshll.u32 %s10490_s15, 4  ;;  %s11466_s30 = int_to_ptr.vmem [resolvable:$true] %s5750_s30 }
 0x780   : > { %s8177_s25 = scalar_lea.vmem %s11466_s30, 32  ;;  %p8184_p0 = scmp.lt.s32.totalorder %s11466_s30, %s8182_s27 }
 0x781   : > { %v3194_v59 = vsel %vm556_vm2, %v3191_v39, %v3193_v54  ;;  %7537 = vmatpush3.bf16.msra.mxu1 %v7536_v34  ;;  %v6204_v39 = vld [vmem:[%s11519_s1 + $0x1f8] sm:$0xff]  ;;  %v6218_v34 = vld [vmem:[%s11519_s1 + $0x248] sm:$0xff]  ;;  %p8178_p11 = scmp.ne.s32.totalorder %s11466_s30, %s8177_s25  ;;  %p8185_p1 = scmp.lt.s32.totalorder %s8183_s17, %s8177_s25 }
 0x782   : > { %7552 = vmatpush1.bf16.msra.mxu0 %v7551_v55  ;;  %v7573_v55 = vpack.c.bf16 %v3147_v45, %v3145_v33  ;;  %7538 = vmatprep.subr.bf16.mxu1 %v8242_v49  ;;  %v6203_v33 = vld [vmem:[%s11519_s1 + $0x1f0] sm:$0xff]  ;;  %v6206_v45 = vld [vmem:[%s11519_s1 + $0x208] sm:$0xff] }
 0x783   : > { %7554 = vmatprep.subr.bf16.mxu0 %v7553_v57  ;;  %v3149_v57 = vld [vmem:[%s11519_s1 + $0x68] sm:$0xff]  ;;  %v7603_v61 = vpack.c.bf16 %v6203_v33, %v6201_v40  ;;  %v7605_v50 = vpack.c.bf16 %v6208_v52, %v6206_v45  ;;  %v3057_v40 = vld [vmem:[%s11531_s13 + $0x78] sm:$0xff]  ;;  %p8179_p12 = pnand %p8178_p11, %p8366_p5  ;;  %p8186_p2 = por %p8185_p1, %p8184_p0 }
 0x784   : > { %v7577_v60 = vpack.c.bf16 %v3151_v26, %v3149_v57  ;;  %v6209_v57 = vld [vmem:[%s11519_s1 + $0x220] sm:$0xff]  ;;  %v6211_v26 = vld [vmem:[%s11519_s1 + $0x230] sm:$0xff] }
 0x785   : > { %p8180_p13 = pneg %p8179_p12 }
 0x786   : > { %7556 = vmatpush1.bf16.msra.mxu0 %v7555_v0  ;;  %v3153_v0 = vld [vmem:[%s11519_s1 + $0x88] sm:$0xff] }
 0x787   : > { %7558 = vmatprep.subr.bf16.mxu0 %v7557_v1  ;;  %v3155_v1 = vld [vmem:[%s11519_s1 + $0x98] sm:$0xff]  ;;  %p8187_p3 = pnand %p8186_p2, %p8180_p13 }
 0x788   : > { %v7581_v2 = vpack.c.bf16 %v3155_v1, %v3153_v0  ;;  %v6217_v0 = vld [vmem:[%s11519_s1 + $0x240] sm:$0xff]  ;;  %v6219_v1 = vld [vmem:[%s11519_s1 + $0x250] sm:$0xff] }
 0x789   : > { %v7615_v4 = vpack.c.bf16 %v6219_v1, %v6217_v0  ;;  %v6249_v0 = vld [vmem:[%s11519_s1 + $0x320] sm:$0xff]  ;;  %v6251_v1 = vld [vmem:[%s11519_s1 + $0x330] sm:$0xff] }
 0x78a   : > { %7560 = vmatpush1.bf16.msra.mxu0 %v7559_v8  ;;  %v7585_v8 = vpack.c.bf16 %v3159_v6, %v3157_v5  ;;  %v3416_v5 = vrot.slane %v10004_v37, 2 }
 0x78b   : > { %7562 = vmatprep.subr.bf16.mxu0 %v7561_v10  ;;  %v3158_v10 = vld [vmem:[%s11519_s1 + $0xb0] sm:$0xff] }
 0x78c   : > { %v7587_v15 = vpack.c.bf16 %v3158_v10, %v3156_v9  ;;  %v6226_v9 = vld [vmem:[%s11519_s1 + $0x288] sm:$0xff]  ;;  %v6228_v10 = vld [vmem:[%s11519_s1 + $0x298] sm:$0xff]  ;;  %v3417_v14 = vsel %vm784_vm4, %v3414_v62, %v3416_v5 }
 0x78e   : > { %7564 = vmatpush1.bf16.msra.mxu0 %v7563_v22  ;;  %v6194_v22 = vld [vmem:[%s11519_s1 + $0x1a8] sm:$0xff] }
 0x78f   : > { %7566 = vmatprep.subr.bf16.mxu0 %v7565_v27  ;;  %v7593_v27 = vpack.c.bf16 %v6196_v23, %v6194_v22  ;;  %v6230_v22 = vld [vmem:[%s11519_s1 + $0x2a8] sm:$0xff]  ;;  %v6232_v23 = vld [vmem:[%s11519_s1 + $0x2b8] sm:$0xff] }
 0x790   : > { %v7625_v19 = vpack.c.bf16 %v6232_v23, %v6230_v22  ;;  %v6264_v22 = vld [vmem:[%s11519_s1 + $0x398] sm:$0xff] }
 0x791   : > { %6181 = vmatmul.mubr.msk.f32.vlgmr.msra.gmra.mrb[18].mxu0 %vm564_vm3, %v3190_v35  ;;  %v6199_v35 = vld [vmem:[%s11519_s1 + $0x1d0] sm:$0xff] }
 0x792   : > { %7568 = vmatpush1.bf16.msra.mxu0 %v7567_v43  ;;  %3273 = vmatprep.mubr.f32.mxu0 %v8241_v7  ;;  %v6202_v43 = vld [vmem:[%s11519_s1 + $0x1e8] sm:$0xff] }
 0x793   : > { %7570 = vmatprep.subr.bf16.mxu0 %v7569_v53  ;;  %v7599_v53 = vpack.c.bf16 %v6199_v35, %v6197_v48  ;;  %v7601_v36 = vpack.c.bf16 %v6204_v39, %v6202_v43  ;;  %v6233_v35 = vld [vmem:[%s11519_s1 + $0x2c0] sm:$0xff]  ;;  %v6235_v43 = vld [vmem:[%s11519_s1 + $0x2d0] sm:$0xff]  ;;  %v6238_v39 = vld [vmem:[%s11519_s1 + $0x2e8] sm:$0xff] }
 0x794   : > { %v7631_v45 = vpack.c.bf16 %v6235_v43, %v6233_v35  ;;  %v3685_v43 = vrot.slane %v9977_v12, 4 }
 0x795   : > { %6182 = vmatmul.mubr.msk.f32.gmra.mrb[20].mxu0 %vm564_vm3, %v3192_v51  ;;  %v6207_v51 = vld [vmem:[%s11519_s1 + $0x210] sm:$0xff] }
 0x796   : > { %7572 = vmatpush1.bf16.msra.mxu0 %v7571_v44  ;;  %3279 = vmatprep.mubr.f32.mxu0 %v8241_v7  ;;  %v6205_v44 = vld [vmem:[%s11519_s1 + $0x200] sm:$0xff] }
 0x797   : > { %7574 = vmatprep.subr.bf16.mxu0 %v7573_v55  ;;  %v6212_v55 = vld [vmem:[%s11519_s1 + $0x238] sm:$0xff]  ;;  %v7607_v56 = vpack.c.bf16 %v6207_v51, %v6205_v44  ;;  %v6246_v44 = vld [vmem:[%s11519_s1 + $0x308] sm:$0xff] }
 0x798   : > { %v6248_v51 = vld [vmem:[%s11519_s1 + $0x318] sm:$0xff] }
 0x799   : > { %6183 = vmatmul.mubr.msk.f32.gmra.mrb[22].mxu0 %vm564_vm3, %v3194_v59  ;;  %v7611_v59 = vpack.c.bf16 %v6211_v26, %v6209_v57  ;;  %v6245_v57 = vld [vmem:[%s11519_s1 + $0x300] sm:$0xff]  ;;  %v6247_v26 = vld [vmem:[%s11519_s1 + $0x310] sm:$0xff] }
 0x79a   : > { %7576 = vmatpush1.bf16.msra.mxu0 %v7575_v58  ;;  %3285 = vmatprep.mubr.f32.mxu0 %v8241_v7  ;;  %v6220_v58 = vld [vmem:[%s11519_s1 + $0x258] sm:$0xff] }
 0x79b   : > { %7578 = vmatprep.subr.bf16.mxu0 %v7577_v60  ;;  %v3413_v60 = vrot.slane %v9977_v12, 2  ;;  %v7613_v63 = vpack.c.bf16 %v6220_v58, %v6218_v34  ;;  %v6250_v34 = vld [vmem:[%s11519_s1 + $0x328] sm:$0xff]  ;;  %v6252_v58 = vld [vmem:[%s11519_s1 + $0x338] sm:$0xff] }
 0x79d   : > { %6184 = vmatmul.mubr.msk.f32.gmra.mrb[24].mxu0 %vm564_vm3, %v3193_v54  ;;  %v6210_v54 = vld [vmem:[%s11519_s1 + $0x228] sm:$0xff]  ;;  %v3415_v3 = vsel %vm784_vm4, %v3413_v60, %v3414_v62  ;;  %v7639_v60 = vpack.c.bf16 %v6247_v26, %v6245_v57  ;;  %v3552_v62 = vrot.slane %v10004_v37, 3 }
 0x79e   : > { %7580 = vmatpush1.bf16.msra.mxu0 %v7579_v42  ;;  %3364 = vmatprep.mubr.f32.mxu0 %v8241_v7  ;;  %v7609_v38 = vpack.c.bf16 %v6212_v55, %v6210_v54  ;;  %v6222_v42 = vld [vmem:[%s11519_s1 + $0x268] sm:$0xff]  ;;  %v3549_v55 = vrot.slane %v9977_v12, 3 }
 0x79f   : > { %7582 = vmatprep.subr.bf16.mxu0 %v7581_v2  ;;  %v6224_v2 = vld [vmem:[%s11519_s1 + $0x278] sm:$0xff] }
 0x7a0   : > { %v7617_v6 = vpack.c.bf16 %v6224_v2, %v6222_v42  ;;  %v6254_v42 = vld [vmem:[%s11519_s1 + $0x348] sm:$0xff]  ;;  %v6256_v2 = vld [vmem:[%s11519_s1 + $0x358] sm:$0xff] }
 0x7a2   : > { %7584 = vmatpush1.bf16.msra.mxu0 %v7583_v32  ;;  %v6221_v32 = vld [vmem:[%s11519_s1 + $0x260] sm:$0xff] }
 0x7a3   : > { %7586 = vmatprep.subr.bf16.mxu0 %v7585_v8  ;;  %v6223_v8 = vld [vmem:[%s11519_s1 + $0x270] sm:$0xff] }
 0x7a4   : > { %v7619_v11 = vpack.c.bf16 %v6223_v8, %v6221_v32  ;;  %v6253_v32 = vld [vmem:[%s11519_s1 + $0x340] sm:$0xff]  ;;  %v6255_v8 = vld [vmem:[%s11519_s1 + $0x350] sm:$0xff] }
 0x7a6   : > { %7588 = vmatpush1.bf16.msra.mxu0 %v7587_v15  ;;  %v3418_v15 = vrot.slane %v10028_v41, 2 }
 0x7a7   : > { %7590 = vmatprep.subr.bf16.mxu0 %v7589_v16  ;;  %v7621_v16 = vpack.c.bf16 %v6228_v10, %v6226_v9  ;;  %v6258_v9 = vld [vmem:[%s11519_s1 + $0x368] sm:$0xff]  ;;  %v6260_v10 = vld [vmem:[%s11519_s1 + $0x378] sm:$0xff] }
 0x7a9   : > { %6185 = vmatmul.mubr.msk.f32.vlgmr.msra.gmra.mrb[18].mxu0 %vm564_vm3, %v9977_v12 }
 0x7aa   : > { %7592 = vmatpush1.bf16.msra.mxu0 %v7591_v24  ;;  %3370 = vmatprep.mubr.f32.mxu0 %v8241_v7  ;;  %v7623_v24 = vpack.c.bf16 %v6227_v20, %v6225_v18  ;;  %v6259_v18 = vld [vmem:[%s11519_s1 + $0x370] sm:$0xff]  ;;  %v6262_v20 = vld [vmem:[%s11519_s1 + $0x388] sm:$0xff] }
 0x7ab   : > { %7594 = vmatprep.subr.bf16.mxu0 %v7593_v27  ;;  %v3419_v27 = vsel %vm784_vm4, %v3416_v5, %v3418_v15  ;;  %v3554_v5 = vrot.slane %v10028_v41, 3 }
 0x7ad   : > { %6186 = vmatmul.mubr.msk.f32.gmra.mrb[20].mxu0 %vm564_vm3, %v9980_v13 }
 0x7ae   : > { %7596 = vmatpush1.bf16.msra.mxu0 %v7595_v30  ;;  %3376 = vmatprep.mubr.f32.mxu0 %v8241_v7  ;;  %v6236_v30 = vld [vmem:[%s11519_s1 + $0x2d8] sm:$0xff] }
 0x7af   : > { %7598 = vmatprep.subr.bf16.mxu0 %v7597_v31  ;;  %v7627_v31 = vpack.c.bf16 %v6231_v29, %v6229_v28  ;;  %v7629_v48 = vpack.c.bf16 %v6236_v30, %v6234_v21  ;;  %v6266_v28 = vld [vmem:[%s11519_s1 + $0x3a8] sm:$0xff]  ;;  %v6268_v29 = vld [vmem:[%s11519_s1 + $0x3b8] sm:$0xff] }
 0x7b0   : > { %v7657_v30 = vpack.c.bf16 %v6268_v29, %v6266_v28  ;;  %v4009_v29 = vld [vmem:[%s11522_s4 + $0x20] sm:$0xff] }
 0x7b1   : > { %6187 = vmatmul.mubr.msk.f32.gmra.mrb[22].mxu0 %vm564_vm3, %v10004_v37 }
 0x7b2   : > { %7600 = vmatpush1.bf16.msra.mxu0 %v7599_v53  ;;  %3382 = vmatprep.mubr.f32.mxu0 %v8241_v7  ;;  %v6240_v53 = vld [vmem:[%s11519_s1 + $0x2f8] sm:$0xff] }
 0x7b3   : > { %7602 = vmatprep.subr.bf16.mxu0 %v7601_v36  ;;  %v3056_v36 = vld [vmem:[%s11531_s13 + $0x70] sm:$0xff]  ;;  %v7633_v52 = vpack.c.bf16 %v6240_v53, %v6238_v39  ;;  %v3686_v39 = vrot.slane %v9980_v13, 4 }
 0x7b4   : > { %v7539_v33 = vpack.c.bf16 %v3057_v40, %v3056_v36  ;;  %v3688_v36 = vrot.slane %v10004_v37, 4 }
 0x7b5   : > { %6188 = vmatmul.mubr.msk.f32.gmra.mrb[24].mxu0 %vm564_vm3, %v10028_v41  ;;  %v3687_v53 = vsel %vm1060_vm1, %v3685_v43, %v3686_v39  ;;  %v4013_v43 = vld [vmem:[%s11522_s4 + $0x40] sm:$0xff] }
 0x7b6   : > { %7604 = vmatpush1.bf16.msra.mxu0 %v7603_v61  ;;  %3492 = vmatprep.mubr.f32.mxu0 %v8241_v7  ;;  %v6237_v61 = vld [vmem:[%s11519_s1 + $0x2e0] sm:$0xff]  ;;  %v3689_v40 = vsel %vm1060_vm1, %v3686_v39, %v3688_v36  ;;  %v4014_v39 = vld [vmem:[%s11522_s4 + $0x48] sm:$0xff] }
 0x7b7   : > { %7606 = vmatprep.subr.bf16.mxu0 %v7605_v50  ;;  %v6239_v50 = vld [vmem:[%s11519_s1 + $0x2f0] sm:$0xff]  ;;  %7540 = vmatpush3.bf16.msra.mxu1 %v7539_v33  ;;  %v3690_v33 = vrot.slane %v10028_v41, 4 }
 0x7b8   : > { %v7635_v54 = vpack.c.bf16 %v6239_v50, %v6237_v61  ;;  %v3797_v61 = vld [vmem:[%s11520_s2] sm:$0x3] }
 0x7b9   : > { %v3691_v12 = vsel %vm1060_vm1, %v3688_v36, %v3690_v33  ;;  %v3802_v50 = vrot.slane %v3797_v61, %v8854_v46  ;;  %v4015_v36 = vld [vmem:[%s11522_s4 + $0x50] sm:$0xff] }
 0x7ba   : > { %7608 = vmatpush1.bf16.msra.mxu0 %v7607_v56  ;;  %v3550_v56 = vrot.slane %v9980_v13, 3  ;;  %v2970_v13 = vld [vmem:[%s11530_s12] sm:$0x1] }
 0x7bb   : > { %7610 = vmatprep.subr.bf16.mxu0 %v7609_v38  ;;  %v7637_v38 = vpack.c.bf16 %v6248_v51, %v6246_v44  ;;  %v3806_v51 = vrot.slane %v3797_v61, %v8859_v47  ;;  %v4021_v61 = vld [vmem:[%s11522_s4 + $0x80] sm:$0xff] }
 0x7be   : > { %7612 = vmatpush1.bf16.msra.mxu0 %v7611_v59  ;;  %v3551_v59 = vsel %vm922_vm0, %v3549_v55, %v3550_v56 }
 0x7bf   : > { %7614 = vmatprep.subr.bf16.mxu0 %v7613_v63  ;;  %v7641_v63 = vpack.c.bf16 %v6252_v58, %v6250_v34 }
 0x7c1   : > { %6213 = vmatmul.mubr.msk.f32.vlgmr.msra.gmra.mrb[18].mxu0 %vm564_vm3, %v3415_v3  ;;  %v7643_v3 = vpack.c.bf16 %v6251_v1, %v6249_v0 }
 0x7c2   : > { %7616 = vmatpush1.bf16.msra.mxu0 %v7615_v4  ;;  %3498 = vmatprep.mubr.f32.mxu0 %v8241_v7  ;;  %v3553_v4 = vsel %vm922_vm0, %v3550_v56, %v3552_v62 }
 0x7c3   : > { %7618 = vmatprep.subr.bf16.mxu0 %v7617_v6  ;;  %v7645_v6 = vpack.c.bf16 %v6256_v2, %v6254_v42 }
 0x7c5   : > { %6214 = vmatmul.mubr.msk.f32.gmra.mrb[20].mxu0 %vm564_vm3, %v3417_v14  ;;  %v3555_v14 = vsel %vm922_vm0, %v3552_v62, %v3554_v5 }
 0x7c6   : > { %7620 = vmatpush1.bf16.msra.mxu0 %v7619_v11  ;;  %3504 = vmatprep.mubr.f32.mxu0 %v8241_v7  ;;  %v7647_v11 = vpack.c.bf16 %v6255_v8, %v6253_v32 }
 0x7c7   : > { %7622 = vmatprep.subr.bf16.mxu0 %v7621_v16  ;;  %v6257_v16 = vld [vmem:[%s11519_s1 + $0x360] sm:$0xff] }
 0x7c8   : > { %v7651_v23 = vpack.c.bf16 %v6259_v18, %v6257_v16  ;;  %v4005_v16 = vld [vmem:[%s11522_s4] sm:$0xff]  ;;  %v4006_v18 = vld [vmem:[%s11522_s4 + $0x8] sm:$0xff] }
 0x7c9   : > { %6215 = vmatmul.mubr.msk.f32.gmra.mrb[22].mxu0 %vm564_vm3, %v3419_v27  ;;  %v6261_v27 = vld [vmem:[%s11519_s1 + $0x380] sm:$0xff] }
 0x7ca   : > { %7624 = vmatpush1.bf16.msra.mxu0 %v7623_v24  ;;  %3510 = vmatprep.mubr.f32.mxu0 %v8241_v7  ;;  %v7653_v24 = vpack.c.bf16 %v6264_v22, %v6262_v20  ;;  %v3825_v20 = vld [vmem:[%s11521_s3] sm:$0xff]  ;;  %v6277_v22 = vld [vmem:[%s11521_s3 + $0x10] sm:$0xff] }
 0x7cb   : > { %7626 = vmatprep.subr.bf16.mxu0 %v7625_v19  ;;  %v6263_v19 = vld [vmem:[%s11519_s1 + $0x390] sm:$0xff] }
 0x7cc   : > { %v7655_v21 = vpack.c.bf16 %v6263_v19, %v6261_v27  ;;  %v3826_v27 = vld [vmem:[%s11521_s3 + $0x8] sm:$0x3f]  ;;  %v6278_v19 = vld [vmem:[%s11521_s3 + $0x18] sm:$0x3f] }
 0x7cd   : > { %6216 = vmatmul.mubr.msk.f32.gmra.mrb[24].mxu0 %vm564_vm3, %v3418_v15  ;;  %v7649_v15 = vpack.c.bf16 %v6260_v10, %v6258_v9 }
 0x7ce   : > { %7628 = vmatpush1.bf16.msra.mxu0 %v7627_v31  ;;  %3628 = vmatprep.mubr.f32.mxu0 %v8241_v7  ;;  %v6265_v31 = vld [vmem:[%s11519_s1 + $0x3a0] sm:$0xff] }
 0x7cf   : > { %7630 = vmatprep.subr.bf16.mxu0 %v7629_v48  ;;  %v6267_v48 = vld [vmem:[%s11519_s1 + $0x3b0] sm:$0xff] }
 0x7d0   : > { %v7659_v35 = vpack.c.bf16 %v6267_v48, %v6265_v31  ;;  %v4011_v31 = vld [vmem:[%s11522_s4 + $0x30] sm:$0xff]  ;;  %v4012_v48 = vld [vmem:[%s11522_s4 + $0x38] sm:$0xff] }
 0x7d2   : > { %7632 = vmatpush1.bf16.msra.mxu0 %v7631_v45 }
 0x7d3   : > { %7634 = vmatprep.subr.bf16.mxu0 %v7633_v52 }
 0x7d6   : > { %7636 = vmatpush1.bf16.msra.mxu0 %v7635_v54 }
 0x7d7   : > { %7638 = vmatprep.subr.bf16.mxu0 %v7637_v38 }
 0x7d9   : > { %6241 = vmatmul.mubr.msk.f32.vlgmr.msra.gmra.mrb[18].mxu0 %vm564_vm3, %v3551_v59 }
 0x7da   : > { %7640 = vmatpush1.bf16.msra.mxu0 %v7639_v60  ;;  %3634 = vmatprep.mubr.f32.mxu0 %v8241_v7 }
 0x7db   : > { %7642 = vmatprep.subr.bf16.mxu0 %v7641_v63 }
 0x7dd   : > { %6242 = vmatmul.mubr.msk.f32.gmra.mrb[20].mxu0 %vm564_vm3, %v3553_v4 }
 0x7de   : > { %7644 = vmatpush1.bf16.msra.mxu0 %v7643_v3  ;;  %3640 = vmatprep.mubr.f32.mxu0 %v8241_v7 }
 0x7df   : > { %7646 = vmatprep.subr.bf16.mxu0 %v7645_v6 }
 0x7e1   : > { %6243 = vmatmul.mubr.msk.f32.gmra.mrb[22].mxu0 %vm564_vm3, %v3555_v14 }
 0x7e2   : > { %7648 = vmatpush1.bf16.msra.mxu0 %v7647_v11  ;;  %3646 = vmatprep.mubr.f32.mxu0 %v8241_v7 }
 0x7e3   : > { %7650 = vmatprep.subr.bf16.mxu0 %v7649_v15 }
 0x7e5   : > { %6244 = vmatmul.mubr.msk.f32.gmra.mrb[24].mxu0 %vm564_vm3, %v3554_v5 }
 0x7e6   : > { %7652 = vmatpush1.bf16.msra.mxu0 %v7651_v23  ;;  %3764 = vmatprep.mubr.f32.mxu0 %v8241_v7  ;;  %v7682_v23 = vpack.c.bf16 %v4006_v18, %v4005_v16  ;;  %v6291_v18 = vld [vmem:[%s11522_s4 + $0xd8] sm:$0xff] }
 0x7e7   : > { %7654 = vmatprep.subr.bf16.mxu0 %v7653_v24  ;;  %v4007_v24 = vld [vmem:[%s11522_s4 + $0x10] sm:$0xff] }
 0x7e8   : > { %v7685_v28 = vpack.c.bf16 %v4008_v17, %v4007_v24  ;;  %v6294_v24 = vld [vmem:[%s11522_s4 + $0xf0] sm:$0xff] }
 0x7ea   : > { %7656 = vmatpush1.bf16.msra.mxu0 %v7655_v21  ;;  %v4010_v21 = vld [vmem:[%s11522_s4 + $0x28] sm:$0xff] }
 0x7eb   : > { %7658 = vmatprep.subr.bf16.mxu0 %v7657_v30  ;;  %v7688_v30 = vpack.c.bf16 %v4010_v21, %v4009_v29  ;;  %v6297_v29 = vld [vmem:[%s11522_s4 + $0x108] sm:$0xff]  ;;  %v6298_v21 = vld [vmem:[%s11522_s4 + $0x110] sm:$0xff] }
 0x7ee   : > { %7660 = vmatpush1.bf16.msra.mxu0 %v7659_v35  ;;  %v7691_v35 = vpack.c.bf16 %v4012_v48, %v4011_v31  ;;  %v6299_v31 = vld [vmem:[%s11522_s4 + $0x118] sm:$0xff]  ;;  %v6300_v48 = vld [vmem:[%s11522_s4 + $0x120] sm:$0xff] }
 0x7f1   : > { %6269 = vmatmul.mubr.msk.f32.vlgmr.msra.gmra.mrb[18].mxu0 %vm564_vm3, %v3687_v53  ;;  %v7694_v53 = vpack.c.bf16 %v4014_v39, %v4013_v43  ;;  %v6301_v43 = vld [vmem:[%s11522_s4 + $0x128] sm:$0xff]  ;;  %v6302_v39 = vld [vmem:[%s11522_s4 + $0x130] sm:$0xff] }
 0x7f2   : > { %3770 = vmatprep.mubr.f32.mxu0 %v8241_v7 }
 0x7f5   : > { %6270 = vmatmul.mubr.msk.f32.gmra.mrb[20].mxu0 %vm564_vm3, %v3689_v40  ;;  %v4016_v40 = vld [vmem:[%s11522_s4 + $0x58] sm:$0xff] }
 0x7f6   : > { %3776 = vmatprep.mubr.f32.mxu0 %v8241_v7 }
 0x7f9   : > { %6271 = vmatmul.mubr.msk.f32.gmra.mrb[22].mxu0 %vm564_vm3, %v3691_v12  ;;  %v4017_v12 = vld [vmem:[%s11522_s4 + $0x60] sm:$0xff] }
 0x7fa   : > { %3782 = vmatprep.mubr.f32.mxu0 %v8241_v7 }
 0x7fd   : > { %6272 = vmatmul.mubr.msk.f32.gmra.mrb[24].mxu0 %vm564_vm3, %v3690_v33  ;;  %v7697_v33 = vpack.c.bf16 %v4016_v40, %v4015_v36  ;;  %vm3129_vm3 = vcmask 73728   ;;  %v6303_v36 = vld [vmem:[%s11522_s4 + $0x138] sm:$0xff]  ;;  %v6304_v40 = vld [vmem:[%s11522_s4 + $0x140] sm:$0xff] }
 0x7fe   : > { %3903 = vmatprep.mubr.f32.mxu0 %v8241_v7 }
 0x84c   : > { %v3037_v37 = vpop.f32.mrb[16].mxu0 }
 0x84d   : > { %v3038_v41 = vadd.f32 %v3037_v37, %v2970_v13  ;;  %v6825_v45 = vpop.f32.mrb[17].mxu0  ;;  %v4018_v13 = vld [vmem:[%s11522_s4 + $0x68] sm:$0xff] }
 0x84e   : > { %v7700_v37 = vpack.c.bf16 %v4018_v13, %v4017_v12  ;;  %v4020_v45 = vld [vmem:[%s11522_s4 + $0x78] sm:$0xff]  ;;  %v6305_v12 = vld [vmem:[%s11522_s4 + $0x148] sm:$0xff] }
 0x84f   : > { %v3041_v52 = vmax.f32 %v3038_v41, 0.0  ;;  %v4019_v41 = vld [vmem:[%s11522_s4 + $0x70] sm:$0xff]  ;;  %v6309_v13 = vld [vmem:[%s11523_s5 + $0xb8] sm:$0xff] }
 0x851   : > { %6859 = vmatmul.mubr.f32.vlgmr.msra.gmra.mrb[30].mxu1 %v3041_v52  ;;  %v7703_v52 = vpack.c.bf16 %v4020_v45, %v4019_v41  ;;  %v6308_v41 = vld [vmem:[%s11523_s5 + $0xb0] sm:$0xff] }
 0x852   : > { %3988 = vmatprep.mubr.f32.mxu1 %v8241_v7 }
 0x8c4   : > { %v3766_v44 = vpop.f32.mrb[18].mxu0 }
 0x8c5   : > { %v3768_v54 = vpop.f32.mrb[19].mxu0  ;;  %v3809_v55 = vadd.f32 %v3802_v50, %v3766_v44 }
 0x8c6   : > { %v3810_v56 = vadd.f32 %v3806_v51, %v3768_v54  ;;  %v4024_v54 = vld [vmem:[%s11522_s4 + $0x98] sm:$0xff] }
 0x8c7   : > { %v3817_v58 = vmax.f32 %v3809_v55, 0.0 }
 0x8c8   : > { %v3772_v38 = vpop.f32.mrb[20].mxu0  ;;  %v3818_v60 = vmax.f32 %v3810_v56, 0.0  ;;  %v3058_v56 = vld [vmem:[%s11532_s14] sm:$0x1] }
 0x8c9   : > { %v3811_v57 = vadd.f32 %v3802_v50, %v3772_v38  ;;  %v3774_v26 = vpop.f32.mrb[21].mxu0 }
 0x8ca   : > { %v3812_v34 = vadd.f32 %v3806_v51, %v3774_v26 }
 0x8cb   : > { %v3819_v59 = vmax.f32 %v3811_v57, 0.0 }
 0x8cc   : > { %v3820_v62 = vmax.f32 %v3812_v34, 0.0  ;;  %v3778_v63 = vpop.f32.mrb[22].mxu0  ;;  %v4025_v34 = vld [vmem:[%s11522_s4 + $0xa0] sm:$0xff] }
 0x8cd   : > { %v7663_v0 = vpack.c.bf16 %v3819_v59, %v3817_v58  ;;  %v3780_v1 = vpop.f32.mrb[23].mxu0  ;;  %v3813_v2 = vadd.f32 %v3802_v50, %v3778_v63  ;;  %v6285_v58 = vld [vmem:[%s11522_s4 + $0xa8] sm:$0xff]  ;;  %v6286_v59 = vld [vmem:[%s11522_s4 + $0xb0] sm:$0xff] }
 0x8ce   : > { %v7661_v42 = vpack.c.bf16 %v3820_v62, %v3818_v60  ;;  %v3814_v3 = vadd.f32 %v3806_v51, %v3780_v1 }
 0x8cf   : > { %v3821_v8 = vmax.f32 %v3813_v2, 0.0  ;;  %v7712_v2 = vpack.c.bf16 %v6286_v59, %v6285_v58  ;;  %v6318_v58 = vld [vmem:[%s11523_s5 + $0x100] sm:$0xff]  ;;  %v6321_v59 = vld [vmem:[%s11523_s5 + $0x118] sm:$0xff] }
 0x8d0   : > { %v3784_v4 = vpop.f32.mrb[24].mxu0  ;;  %7662 = vmatprep.subr.bf16.mxu0 %v7661_v42  ;;  %7672 = vmatprep.subr.bf16.mxu1 %v7661_v42  ;;  %v3822_v10 = vmax.f32 %v3814_v3, 0.0  ;;  %v6287_v3 = vld [vmem:[%s11522_s4 + $0xb8] sm:$0xff] }
 0x8d1   : > { %v3815_v5 = vadd.f32 %v3802_v50, %v3784_v4  ;;  %v3786_v6 = vpop.f32.mrb[25].mxu0  ;;  %7664 = vmatpush1.bf16.msra.mxu0 %v7663_v0  ;;  %7674 = vmatpush1.bf16.msra.mxu1 %v7663_v0  ;;  %v4022_v50 = vld [vmem:[%s11522_s4 + $0x88] sm:$0xff]  ;;  %v6288_v4 = vld [vmem:[%s11522_s4 + $0xc0] sm:$0xff] }
 0x8d2   : > { %v3816_v32 = vadd.f32 %v3806_v51, %v3786_v6  ;;  %v7706_v44 = vpack.c.bf16 %v4022_v50, %v4021_v61  ;;  %v4023_v51 = vld [vmem:[%s11522_s4 + $0x90] sm:$0xff]  ;;  %v6313_v61 = vld [vmem:[%s11523_s5 + $0xd8] sm:$0xff]  ;;  %v6315_v50 = vld [vmem:[%s11523_s5 + $0xe8] sm:$0xff] }
 0x8d3   : > { %v3823_v9 = vmax.f32 %v3815_v5, 0.0  ;;  %v7709_v55 = vpack.c.bf16 %v4024_v54, %v4023_v51  ;;  %v7745_v51 = vpack.c.bf16 %v6315_v50, %v6313_v61  ;;  %v6312_v54 = vld [vmem:[%s11523_s5 + $0xd0] sm:$0xff] }
 0x8d4   : > { %v3824_v11 = vmax.f32 %v3816_v32, 0.0 }
 0x8d5   : > { %v7668_v14 = vpack.c.bf16 %v3823_v9, %v3821_v8 }
 0x8d6   : > { %v7665_v15 = vpack.c.bf16 %v3824_v11, %v3822_v10  ;;  %v7715_v11 = vpack.c.bf16 %v6288_v4, %v6287_v3  ;;  %v6327_v3 = vld [vmem:[%s11523_s5 + $0x148] sm:$0xff] }
 0x8d8   : > { %7667 = vmatprep.subr.msk.bf16.mxu0 %vm8865_vm6, %v7665_v15  ;;  %7677 = vmatprep.subr.msk.bf16.mxu1 %vm8865_vm6, %v7665_v15  ;;  %v6290_v15 = vld [vmem:[%s11522_s4 + $0xd0] sm:$0xff] }
 0x8d9   : > { %7670 = vmatpush1.bf16.msk.msra.mxu0 %vm8865_vm6, %v7668_v14  ;;  %7680 = vmatpush1.bf16.msk.msra.mxu1 %vm8865_vm6, %v7668_v14  ;;  %v6289_v14 = vld [vmem:[%s11522_s4 + $0xc8] sm:$0xff] }
 0x8da   : > { %7681 = vmatprep.subr.bf16.mxu1 %v8242_v49  ;;  %v7718_v16 = vpack.c.bf16 %v6290_v15, %v6289_v14 }
 0x8dc   : > { %6275 = vmatmul.mubr.msk.f32.vlgmr.msra.gmra.mrb[26].mxu0 %vm1203_vm7, %v3825_v20  ;;  %6281 = vmatmul.mubr.msk.f32.vlgmr.msra.gmra.mrb[32].mxu1 %vm1203_vm7, %v6277_v22  ;;  %v6292_v20 = vld [vmem:[%s11522_s4 + $0xe0] sm:$0xff] }
 0x8dd   : > { %3909 = vmatprep.mubr.f32.mxu0 %v8241_v7  ;;  %3994 = vmatprep.mubr.f32.mxu1 %v8241_v7  ;;  %v7721_v22 = vpack.c.bf16 %v6292_v20, %v6291_v18 }
 0x8de   : > { %7683 = vmatpush1.bf16.msra.mxu1 %v7682_v23  ;;  %v6293_v23 = vld [vmem:[%s11522_s4 + $0xe8] sm:$0xff] }
 0x8df   : > { %7684 = vmatprep.subr.bf16.mxu1 %v8242_v49  ;;  %v7724_v17 = vpack.c.bf16 %v6294_v24, %v6293_v23 }
 0x8e0   : > { %6276 = vmatmul.mubr.msk.f32.gmra.mrb[28].mxu0 %vm1203_vm7, %v3826_v27  ;;  %6282 = vmatmul.mubr.msk.f32.gmra.mrb[34].mxu1 %vm1203_vm7, %v6278_v19  ;;  %v6295_v27 = vld [vmem:[%s11522_s4 + $0xf8] sm:$0xff]  ;;  %v6296_v19 = vld [vmem:[%s11522_s4 + $0x100] sm:$0xff] }
 0x8e1   : > { %4870 = vmatprep.mubr.f32.mxu0 %v8241_v7 }
 0x8e2   : > { %7686 = vmatpush1.bf16.msra.mxu1 %v7685_v28  ;;  %v7727_v28 = vpack.c.bf16 %v6296_v19, %v6295_v27  ;;  %v4207_v27 = vld [vmem:[%s11523_s5 + $0x10] sm:$0xff] }
 0x8e3   : > { %7687 = vmatprep.subr.bf16.mxu1 %v8242_v49 }
 0x8e6   : > { %7689 = vmatpush1.bf16.msra.mxu1 %v7688_v30  ;;  %v7730_v30 = vpack.c.bf16 %v6298_v21, %v6297_v29 }
 0x8e7   : > { %7690 = vmatprep.subr.bf16.mxu1 %v8242_v49 }
 0x8ea   : > { %7692 = vmatpush1.bf16.msra.mxu1 %v7691_v35  ;;  %v7733_v35 = vpack.c.bf16 %v6300_v48, %v6299_v31  ;;  %v4212_v31 = vld [vmem:[%s11523_s5 + $0x38] sm:$0xff] }
 0x8eb   : > { %7693 = vmatprep.subr.bf16.mxu1 %v8242_v49 }
 0x8ee   : > { %7695 = vmatpush1.bf16.msra.mxu1 %v7694_v53  ;;  %v7736_v53 = vpack.c.bf16 %v6302_v39, %v6301_v43 }
 0x8ef   : > { %7696 = vmatprep.subr.bf16.mxu1 %v8242_v49 }
 0x8f2   : > { %7698 = vmatpush1.bf16.msra.mxu1 %v7697_v33  ;;  %v7739_v33 = vpack.c.bf16 %v6304_v40, %v6303_v36 }
 0x8f3   : > { %7699 = vmatprep.subr.bf16.mxu1 %v8242_v49 }
 0x8f6   : > { %7701 = vmatpush1.bf16.msra.mxu1 %v7700_v37  ;;  %v6311_v37 = vld [vmem:[%s11523_s5 + $0xc8] sm:$0xff] }
 0x8f7   : > { %7702 = vmatprep.subr.bf16.mxu1 %v8242_v49  ;;  %v7741_v45 = vpack.c.bf16 %v6311_v37, %v6309_v13  ;;  %v4209_v13 = vld [vmem:[%s11523_s5 + $0x20] sm:$0xff]  ;;  %v4211_v37 = vld [vmem:[%s11523_s5 + $0x30] sm:$0xff] }
 0x8fa   : > { %7704 = vmatpush1.bf16.msra.mxu1 %v7703_v52  ;;  %v6310_v52 = vld [vmem:[%s11523_s5 + $0xc0] sm:$0xff] }
 0x8fb   : > { %7705 = vmatprep.subr.bf16.mxu1 %v8242_v49 }
 0x8fe   : > { %7707 = vmatpush1.bf16.msra.mxu1 %v7706_v44  ;;  %v7743_v44 = vpack.c.bf16 %v6310_v52, %v6308_v41  ;;  %v4216_v52 = vld [vmem:[%s11523_s5 + $0x58] sm:$0xff] }
 0x8ff   : > { %7708 = vmatprep.subr.bf16.mxu1 %v8242_v49 }
 0x902   : > { %7710 = vmatpush1.bf16.msra.mxu1 %v7709_v55  ;;  %v6314_v55 = vld [vmem:[%s11523_s5 + $0xe0] sm:$0xff] }
 0x903   : > { %4072 = vmatprep.subr.mxu1 %v8241_v7 }
 0x906   : > { %4073 = vmatpush1.msra.mxu1 %v4025_v34  ;;  %v6316_v34 = vld [vmem:[%s11523_s5 + $0xf0] sm:$0xff] }
 0x907   : > { %7711 = vmatprep.subr.bf16.mxu1 %v8242_v49 }
 0x924   : > { %v3125_v38 = vpop.f32.mrb[30].mxu1 }
 0x925   : > { %v3126_v57 = vadd.f32 %v3125_v38, %v3058_v56  ;;  %v6860_v26 = vpop.f32.mrb[31].mxu1  ;;  %v7747_v56 = vpack.c.bf16 %v6314_v55, %v6312_v54  ;;  %v6317_v38 = vld [vmem:[%s11523_s5 + $0xf8] sm:$0xff]  ;;  %v4213_v55 = vld [vmem:[%s11523_s5 + $0x40] sm:$0xff] }
 0x927   : > { %3130 = vst.msk [vmem:[%s10490_s15] sm:$0x1] %vm3129_vm3, %v3126_v57  ;;  %v6319_v57 = vld [vmem:[%s11523_s5 + $0x108] sm:$0xff] }
 0x928   : > { %v7749_v26 = vpack.c.bf16 %v6319_v57, %v6317_v38  ;;  %v4218_v38 = vld [vmem:[%s11523_s5 + $0x68] sm:$0xff]  ;;  %v4220_v57 = vld [vmem:[%s11523_s5 + $0x78] sm:$0xff] }
 0x9af   : > { %v3905_v60 = vpop.f32.mrb[26].mxu0  ;;  %v3990_v62 = vpop.f32.mrb[32].mxu1 }
 0x9b0   : > { %v10504_v63 = vmax.f32 %v3905_v60, %v3990_v62  ;;  %v3907_v0 = vpop.f32.mrb[27].mxu0  ;;  %v3992_v1 = vpop.f32.mrb[33].mxu1  ;;  %v6323_v60 = vld [vmem:[%s11523_s5 + $0x128] sm:$0xff]  ;;  %v7751_v62 = vpack.c.bf16 %v6318_v58, %v6316_v34  ;;  %v7773_v34 = vpack.c.bf16 %v4220_v57, %v4218_v38  ;;  %v4217_v58 = vld [vmem:[%s11523_s5 + $0x60] sm:$0xff] }
 0x9b1   : > { %v4002_v42 = vmax.f32 %v3907_v0, %v3992_v1  ;;  %v6320_v0 = vld [vmem:[%s11523_s5 + $0x110] sm:$0xff]  ;;  %v6322_v1 = vld [vmem:[%s11523_s5 + $0x120] sm:$0xff] }
 0x9b2   : > { %v6358_v38 = vld [vmem:[%s11523_s5 + $0x200] sm:$0xf] }
 0x9b3   : > { %v3911_v5 = vpop.f32.mrb[28].mxu0  ;;  %v3996_v6 = vpop.f32.mrb[34].mxu1  ;;  %6283 = vmatprep.mubr.msk.f32.mxu1 %vm1404_vm8, %v4002_v42 }
 0x9b4   : > { %v4003_v32 = vmax.f32 %v3911_v5, %v3996_v6  ;;  %v3913_v8 = vpop.f32.mrb[29].mxu0  ;;  %v3998_v9 = vpop.f32.mrb[35].mxu1  ;;  %4097 = vmatmul.mubr.f32.vlgmr.msra.gmra.mrb[36].mxu1 %v10504_v63  ;;  %v6324_v5 = vld [vmem:[%s11523_s5 + $0x130] sm:$0xff]  ;;  %v6326_v6 = vld [vmem:[%s11523_s5 + $0x140] sm:$0xff] }
 0x9b5   : > { %v4004_v10 = vmax.f32 %v3913_v8, %v3998_v9  ;;  %7713 = vmatpush1.bf16.msra.mxu1 %v7712_v2  ;;  %v6325_v2 = vld [vmem:[%s11523_s5 + $0x138] sm:$0xff]  ;;  %v6328_v9 = vld [vmem:[%s11523_s5 + $0x150] sm:$0xf] }
 0x9b6   : > { %7714 = vmatprep.subr.bf16.mxu1 %v8242_v49  ;;  %v7757_v4 = vpack.c.bf16 %v6327_v3, %v6325_v2  ;;  %v6329_v8 = vld [vmem:[%s11523_s5 + $0x158] sm:$0xf]  ;;  %v4226_v3 = vld [vmem:[%s11523_s5 + $0xa8] sm:$0xf] }
 0x9b7   : > { %6284 = vmatprep.mubr.msk.f32.mxu1 %vm1404_vm8, %v4004_v10 }
 0x9b8   : > { %4102 = vmatmul.mubr.f32.gmra.mrb[38].mxu1 %v4003_v32 }
 0x9b9   : > { %7716 = vmatpush1.bf16.msra.mxu1 %v7715_v11  ;;  %6306 = vmatprep.mubr.msk.f32.mxu1 %vm1404_vm8, %v4002_v42  ;;  %v7755_v42 = vpack.c.bf16 %v6322_v1, %v6320_v0  ;;  %v4208_v11 = vld [vmem:[%s11523_s5 + $0x18] sm:$0xff]  ;;  %v4221_v1 = vld [vmem:[%s11523_s5 + $0x80] sm:$0xff] }
 0x9ba   : > { %7717 = vmatprep.subr.bf16.mxu1 %v8242_v49 }
 0x9bd   : > { %7719 = vmatpush1.bf16.msra.mxu1 %v7718_v16 }
 0x9be   : > { %7720 = vmatprep.subr.bf16.mxu1 %v8242_v49 }
 0x9c1   : > { %7722 = vmatpush1.bf16.msra.mxu1 %v7721_v22 }
 0x9c2   : > { %7723 = vmatprep.subr.bf16.mxu1 %v8242_v49 }
 0x9c5   : > { %7725 = vmatpush1.bf16.msra.mxu1 %v7724_v17  ;;  %v4205_v17 = vld [vmem:[%s11523_s5] sm:$0xff] }
 0x9c6   : > { %7726 = vmatprep.subr.bf16.mxu1 %v8242_v49  ;;  %v7763_v21 = vpack.c.bf16 %v4207_v27, %v4205_v17  ;;  %v6346_v27 = vld [vmem:[%s11523_s5 + $0x1a0] sm:$0xff] }
 0x9c9   : > { %7728 = vmatpush1.bf16.msra.mxu1 %v7727_v28 }
 0x9ca   : > { %7729 = vmatprep.subr.bf16.mxu1 %v8242_v49 }
 0x9cd   : > { %7731 = vmatpush1.bf16.msra.mxu1 %v7730_v30  ;;  %v4210_v30 = vld [vmem:[%s11523_s5 + $0x28] sm:$0xff] }
 0x9ce   : > { %7732 = vmatprep.subr.bf16.mxu1 %v8242_v49 }
 0x9d1   : > { %7734 = vmatpush1.bf16.msra.mxu1 %v7733_v35 }
 0x9d2   : > { %7735 = vmatprep.subr.bf16.mxu1 %v8242_v49 }
 0x9d5   : > { %7737 = vmatpush1.bf16.msra.mxu1 %v7736_v53 }
 0x9d6   : > { %7738 = vmatprep.subr.bf16.mxu1 %v8242_v49 }
 0x9d9   : > { %7740 = vmatpush1.bf16.msra.mxu1 %v7739_v33 }
 0x9da   : > { %4168 = vmatprep.subr.mxu1 %v8241_v7 }
 0x9dd   : > { %4169 = vmatpush1.msra.mxu1 %v6305_v12  ;;  %v7765_v12 = vpack.c.bf16 %v4212_v31, %v4210_v30  ;;  %v6350_v31 = vld [vmem:[%s11523_s5 + $0x1c0] sm:$0xff] }
 0x9de   : > { %4193 = vmatmul.mubr.f32.vlgmr.msra.gmra.mrb[40].mxu1 %v10504_v63  ;;  %7742 = vmatprep.subr.bf16.mxu1 %v7741_v45  ;;  %v7753_v63 = vpack.c.bf16 %v6323_v60, %v6321_v59  ;;  %v4214_v45 = vld [vmem:[%s11523_s5 + $0x48] sm:$0xff]  ;;  %v4219_v59 = vld [vmem:[%s11523_s5 + $0x70] sm:$0xff] }
 0x9df   : > { %6307 = vmatprep.mubr.msk.f32.mxu1 %vm1404_vm8, %v4004_v10  ;;  %7744 = vmatpush1.bf16.msra.mxu1 %v7743_v44  ;;  %v4206_v10 = vld [vmem:[%s11523_s5 + $0x8] sm:$0xff]  ;;  %v7769_v54 = vpack.c.bf16 %v4216_v52, %v4214_v45  ;;  %v6365_v45 = vld [vmem:[%s11523_s5 + $0x218] sm:$0xff] }
 0x9e0   : > { %7746 = vmatprep.subr.bf16.mxu1 %v7745_v51  ;;  %v7761_v14 = vpack.c.bf16 %v4208_v11, %v4206_v10  ;;  %v7767_v51 = vpack.c.bf16 %v4211_v37, %v4209_v13  ;;  %v4222_v60 = vld [vmem:[%s11523_s5 + $0x88] sm:$0xff]  ;;  %v4225_v10 = vld [vmem:[%s11523_s5 + $0xa0] sm:$0xf]  ;;  %v6356_v13 = vld [vmem:[%s11523_s5 + $0x1f0] sm:$0xff] }
 0x9e1   : > { %v6367_v52 = vld [vmem:[%s11523_s5 + $0x228] sm:$0xff] }
 0x9e2   : > { %4198 = vmatmul.mubr.f32.gmra.mrb[42].mxu1 %v4003_v32  ;;  %v7759_v32 = vpack.c.bf16 %v6326_v6, %v6324_v5  ;;  %v6341_v5 = vld [vmem:[%s11523_s5 + $0x178] sm:$0xff]  ;;  %v6338_v6 = vld [vmem:[%s11523_s5 + $0x160] sm:$0xff]  ;;  %v7801_v57 = vpack.c.bf16 %v6367_v52, %v6365_v45  ;;  %v6404_v45 = vld [vmem:[%s11523_s5 + $0x330] sm:$0xff] }
 0x9e3   : > { %4328 = vmatprep.mubr.f32.mxu1 %v8241_v7  ;;  %7748 = vmatpush1.bf16.msra.mxu1 %v7747_v56  ;;  %v4215_v56 = vld [vmem:[%s11523_s5 + $0x50] sm:$0xff]  ;;  %v6407_v52 = vld [vmem:[%s11523_s5 + $0x348] sm:$0xff] }
 0x9e4   : > { %7750 = vmatprep.subr.bf16.mxu1 %v7749_v26  ;;  %v7771_v26 = vpack.c.bf16 %v4215_v56, %v4213_v55  ;;  %v6369_v55 = vld [vmem:[%s11523_s5 + $0x238] sm:$0xff]  ;;  %v6371_v56 = vld [vmem:[%s11523_s5 + $0x248] sm:$0xff] }
 0x9e7   : > { %7752 = vmatpush1.bf16.msra.mxu1 %v7751_v62  ;;  %v4224_v62 = vld [vmem:[%s11523_s5 + $0x98] sm:$0xff] }
 0x9e8   : > { %7754 = vmatprep.subr.bf16.mxu1 %v7753_v63  ;;  %v7775_v63 = vpack.c.bf16 %v4219_v59, %v4217_v58  ;;  %v7777_v0 = vpack.c.bf16 %v4224_v62, %v4222_v60  ;;  %v6368_v58 = vld [vmem:[%s11523_s5 + $0x230] sm:$0xff]  ;;  %v6370_v59 = vld [vmem:[%s11523_s5 + $0x240] sm:$0xff]  ;;  %v6373_v60 = vld [vmem:[%s11523_s5 + $0x258] sm:$0xff] }
 0x9e9   : > { %v6375_v62 = vld [vmem:[%s11523_s5 + $0x268] sm:$0xff] }
 0x9eb   : > { %7756 = vmatpush1.bf16.msra.mxu1 %v7755_v42  ;;  %v4223_v42 = vld [vmem:[%s11523_s5 + $0x90] sm:$0xff] }
 0x9ec   : > { %7758 = vmatprep.subr.bf16.mxu1 %v7757_v4  ;;  %v7779_v2 = vpack.c.bf16 %v4223_v42, %v4221_v1  ;;  %v6339_v4 = vld [vmem:[%s11523_s5 + $0x168] sm:$0xff]  ;;  %v6372_v1 = vld [vmem:[%s11523_s5 + $0x250] sm:$0xff]  ;;  %v6374_v42 = vld [vmem:[%s11523_s5 + $0x260] sm:$0xff] }
 0x9ed   : > { %v7781_v11 = vpack.c.bf16 %v6341_v5, %v6339_v4  ;;  %v6376_v5 = vld [vmem:[%s11523_s5 + $0x270] sm:$0xff] }
 0x9ef   : > { %7760 = vmatpush1.bf16.msra.mxu1 %v7759_v32  ;;  %v6340_v32 = vld [vmem:[%s11523_s5 + $0x170] sm:$0xff] }
 0x9f0   : > { %6330 = vmatprep.subr.msk.mxu1 %vm1060_vm1, %v6329_v8  ;;  %v6343_v8 = vld [vmem:[%s11523_s5 + $0x188] sm:$0xff] }
 0x9f3   : > { %6331 = vmatpush1.msk.msra.mxu1 %vm1060_vm1, %v6328_v9  ;;  %v6345_v9 = vld [vmem:[%s11523_s5 + $0x198] sm:$0xff] }
 0x9f4   : > { %7762 = vmatprep.subr.bf16.mxu1 %v7761_v14  ;;  %v7783_v14 = vpack.c.bf16 %v6340_v32, %v6338_v6  ;;  %v6378_v6 = vld [vmem:[%s11523_s5 + $0x280] sm:$0xff]  ;;  %v6381_v32 = vld [vmem:[%s11523_s5 + $0x298] sm:$0xff] }
 0xa87   : > { %v4098_v15 = vpop.f32.mrb[36].mxu1 }
 0xa88   : > { %v4100_v16 = vpop.f32.mrb[37].mxu1 }
 0xa89   : > { %v6342_v16 = vld [vmem:[%s11523_s5 + $0x180] sm:$0xff] }
 0xa8b   : > { %v4103_v18 = vpop.f32.mrb[38].mxu1 }
 0xa8c   : > { %v4105_v20 = vpop.f32.mrb[39].mxu1 }
 0xa8d   : > { %v6347_v20 = vld [vmem:[%s11523_s5 + $0x1a8] sm:$0xff] }
 0xab1   : > { %v4194_v22 = vpop.f32.mrb[40].mxu1 }
 0xab2   : > { %v10654_v23 = vmax.f32 %v4098_v15, %v4194_v22  ;;  %v4196_v24 = vpop.f32.mrb[41].mxu1  ;;  %v7785_v15 = vpack.c.bf16 %v6345_v9, %v6343_v8  ;;  %v6349_v22 = vld [vmem:[%s11523_s5 + $0x1b8] sm:$0xff]  ;;  %v7815_v8 = vpack.c.bf16 %v6378_v6, %v6376_v5  ;;  %v4955_v6 = vld [vmem:[%s11526_s8 + $0x8] sm:$0xff] }
 0xab3   : > { %v7789_v17 = vpack.c.bf16 %v6349_v22, %v6347_v20  ;;  %v6390_v20 = vld [vmem:[%s11523_s5 + $0x2c0] sm:$0xff]  ;;  %v6392_v22 = vld [vmem:[%s11523_s5 + $0x2d0] sm:$0xff] }
 0xab4   : > { %v4251_v48 = vrot.slane %v10654_v23, 1  ;;  %v4450_v35 = vrot.slane %v10654_v23, 2  ;;  %v4566_v43 = vrot.slane %v10654_v23, 3  ;;  %v4682_v39 = vrot.slane %v10654_v23, 4 }
 0xab5   : > { %v4199_v19 = vpop.f32.mrb[42].mxu1 }
 0xab6   : > { %v10662_v28 = vmax.f32 %v4103_v18, %v4199_v19  ;;  %v4201_v29 = vpop.f32.mrb[43].mxu1  ;;  %v6344_v18 = vld [vmem:[%s11523_s5 + $0x190] sm:$0xff] }
 0xab7   : > { %v7787_v24 = vpack.c.bf16 %v6344_v18, %v6342_v16  ;;  %v6348_v19 = vld [vmem:[%s11523_s5 + $0x1b0] sm:$0xff]  ;;  %v6351_v29 = vld [vmem:[%s11523_s5 + $0x1c8] sm:$0xff]  ;;  %v6393_v18 = vld [vmem:[%s11523_s5 + $0x2d8] sm:$0xff] }
 0xab8   : > { %v4252_v53 = vrot.slane %v10662_v28, 1  ;;  %v4451_v36 = vrot.slane %v10662_v28, 2  ;;  %v4567_v40 = vrot.slane %v10662_v28, 3  ;;  %v4683_v33 = vrot.slane %v10662_v28, 4  ;;  %v6391_v16 = vld [vmem:[%s11523_s5 + $0x2c8] sm:$0xff] }
 0xaba   : > { %v4253_v41 = vsel %vm556_vm2, %v4251_v48, %v4252_v53  ;;  %v10694_v61 = vsel %vm784_vm4, %v4450_v35, %v4451_v36  ;;  %v10699_v50 = vsel %vm922_vm0, %v4566_v43, %v4567_v40  ;;  %v10704_v44 = vsel %vm1060_vm1, %v4682_v39, %v4683_v33  ;;  %v6352_v48 = vld [vmem:[%s11523_s5 + $0x1d0] sm:$0xff]  ;;  %v6355_v35 = vld [vmem:[%s11523_s5 + $0x1e8] sm:$0xff]  ;;  %v6357_v43 = vld [vmem:[%s11523_s5 + $0x1f8] sm:$0xff] }
 0xabb   : > { %6332 = vmatmul.mubr.msk.f32.vlgmr.msra.gmra.mrb[44].mxu1 %vm1635_vm9, %v4253_v41  ;;  %v7795_v39 = vpack.c.bf16 %v6352_v48, %v6350_v31  ;;  %v6359_v41 = vld [vmem:[%s11523_s5 + $0x208] sm:$0xf]  ;;  %v6401_v48 = vld [vmem:[%s11523_s5 + $0x318] sm:$0xff] }
 0xabc   : > { %7764 = vmatpush1.bf16.msra.mxu1 %v7763_v21  ;;  %4334 = vmatprep.mubr.f32.mxu1 %v8241_v7  ;;  %v7791_v21 = vpack.c.bf16 %v6348_v19, %v6346_v27  ;;  %v6384_v27 = vld [vmem:[%s11523_s5 + $0x2b0] sm:$0xf]  ;;  %v7821_v19 = vpack.c.bf16 %v6393_v18, %v6391_v16  ;;  %v6399_v31 = vld [vmem:[%s11523_s5 + $0x308] sm:$0xff]  ;;  %v4961_v16 = vld [vmem:[%s11526_s8 + $0x38] sm:$0xff] }
 0xabd   : > { %7766 = vmatprep.subr.bf16.mxu1 %v7765_v12  ;;  %v6354_v12 = vld [vmem:[%s11523_s5 + $0x1e0] sm:$0xff] }
 0xabe   : > { %v7799_v37 = vpack.c.bf16 %v6356_v13, %v6354_v12  ;;  %v6403_v12 = vld [vmem:[%s11523_s5 + $0x328] sm:$0xff] }
 0xabf   : > { %6333 = vmatmul.mubr.msk.f32.gmra.mrb[46].mxu1 %vm1635_vm9, %v4252_v53  ;;  %v7797_v53 = vpack.c.bf16 %v6357_v43, %v6355_v35  ;;  %v7829_v43 = vpack.c.bf16 %v6401_v48, %v6399_v31  ;;  %v4969_v31 = vld [vmem:[%s11526_s8 + $0x78] sm:$0xff] }
 0xac0   : > { %7768 = vmatpush1.bf16.msra.mxu1 %v7767_v51  ;;  %4415 = vmatprep.mubr.f32.mxu1 %v8241_v7  ;;  %v6364_v51 = vld [vmem:[%s11523_s5 + $0x210] sm:$0xff] }
 0xac1   : > { %7770 = vmatprep.subr.bf16.mxu1 %v7769_v54  ;;  %v6366_v54 = vld [vmem:[%s11523_s5 + $0x220] sm:$0xff] }
 0xac4   : > { %7772 = vmatpush1.bf16.msra.mxu1 %v7771_v26  ;;  %v7803_v26 = vpack.c.bf16 %v6366_v54, %v6364_v51 }
 0xac5   : > { %7774 = vmatprep.subr.bf16.mxu1 %v7773_v34  ;;  %v7805_v34 = vpack.c.bf16 %v6371_v56, %v6369_v55  ;;  %v6406_v55 = vld [vmem:[%s11523_s5 + $0x340] sm:$0xff]  ;;  %v6408_v56 = vld [vmem:[%s11523_s5 + $0x350] sm:$0xff] }
 0xac8   : > { %7776 = vmatpush1.bf16.msra.mxu1 %v7775_v63  ;;  %v7807_v63 = vpack.c.bf16 %v6370_v59, %v6368_v58 }
 0xac9   : > { %7778 = vmatprep.subr.bf16.mxu1 %v7777_v0  ;;  %v7809_v0 = vpack.c.bf16 %v6375_v62, %v6373_v60 }
 0xacc   : > { %7780 = vmatpush1.bf16.msra.mxu1 %v7779_v2  ;;  %v6377_v2 = vld [vmem:[%s11523_s5 + $0x278] sm:$0xff] }
 0xacd   : > { %6334 = vmatprep.subr.msk.mxu1 %vm1060_vm1, %v4226_v3  ;;  %v7811_v3 = vpack.c.bf16 %v6374_v42, %v6372_v1 }
 0xad0   : > { %6335 = vmatpush1.msk.msra.mxu1 %vm1060_vm1, %v4225_v10  ;;  %v6380_v10 = vld [vmem:[%s11523_s5 + $0x290] sm:$0xff] }
 0xad1   : > { %6336 = vmatmul.mubr.msk.f32.vlgmr.msra.gmra.mrb[44].mxu1 %vm1635_vm9, %v10654_v23  ;;  %7782 = vmatprep.subr.bf16.mxu1 %v7781_v11  ;;  %v6353_v23 = vld [vmem:[%s11523_s5 + $0x1d8] sm:$0xff]  ;;  %v6382_v11 = vld [vmem:[%s11523_s5 + $0x2a0] sm:$0xff] }
 0xad2   : > { %7784 = vmatpush1.bf16.msra.mxu1 %v7783_v14  ;;  %4421 = vmatprep.mubr.f32.mxu1 %v8241_v7  ;;  %v7793_v30 = vpack.c.bf16 %v6353_v23, %v6351_v29  ;;  %v7819_v14 = vpack.c.bf16 %v6382_v11, %v6380_v10  ;;  %v7823_v29 = vpack.c.bf16 %v6392_v22, %v6390_v20  ;;  %v4958_v10 = vld [vmem:[%s11526_s8 + $0x20] sm:$0xff]  ;;  %v4959_v11 = vld [vmem:[%s11526_s8 + $0x28] sm:$0xff] }
 0xad3   : > { %7786 = vmatprep.subr.bf16.mxu1 %v7785_v15  ;;  %v6385_v15 = vld [vmem:[%s11523_s5 + $0x2b8] sm:$0xf]  ;;  %v4962_v20 = vld [vmem:[%s11526_s8 + $0x40] sm:$0xff]  ;;  %v4963_v22 = vld [vmem:[%s11526_s8 + $0x48] sm:$0xff] }
 0xad5   : > { %6337 = vmatmul.mubr.msk.f32.gmra.mrb[46].mxu1 %vm1635_vm9, %v10662_v28 }
 0xad6   : > { %7788 = vmatpush1.bf16.msra.mxu1 %v7787_v24  ;;  %4527 = vmatprep.mubr.f32.mxu1 %v8241_v7  ;;  %v6395_v24 = vld [vmem:[%s11523_s5 + $0x2e8] sm:$0xff] }
 0xad7   : > { %7790 = vmatprep.subr.bf16.mxu1 %v7789_v17  ;;  %v6397_v17 = vld [vmem:[%s11523_s5 + $0x2f8] sm:$0xff] }
 0xad8   : > { %v7825_v23 = vpack.c.bf16 %v6397_v17, %v6395_v24  ;;  %v7866_v24 = vpack.c.bf16 %v4963_v22, %v4962_v20  ;;  %v4964_v17 = vld [vmem:[%s11526_s8 + $0x50] sm:$0xff]  ;;  %v6447_v20 = vld [vmem:[%s11527_s9 + $0x60] sm:$0xff]  ;;  %v6448_v22 = vld [vmem:[%s11527_s9 + $0x68] sm:$0xff] }
 0xada   : > { %7792 = vmatpush1.bf16.msra.mxu1 %v7791_v21  ;;  %v6394_v21 = vld [vmem:[%s11523_s5 + $0x2e0] sm:$0xff] }
 0xadb   : > { %7794 = vmatprep.subr.bf16.mxu1 %v7793_v30  ;;  %v6396_v30 = vld [vmem:[%s11523_s5 + $0x2f0] sm:$0xff] }
 0xadc   : > { %v7827_v35 = vpack.c.bf16 %v6396_v30, %v6394_v21  ;;  %v4968_v30 = vld [vmem:[%s11526_s8 + $0x70] sm:$0xff] }
 0xadd   : > { %v7875_v48 = vpack.c.bf16 %v4969_v31, %v4968_v30  ;;  %v5144_v31 = vld [vmem:[%s11527_s9 + $0x30] sm:$0xff] }
 0xade   : > { %7796 = vmatpush1.bf16.msra.mxu1 %v7795_v39  ;;  %v6398_v39 = vld [vmem:[%s11523_s5 + $0x300] sm:$0xff] }
 0xadf   : > { %7798 = vmatprep.subr.bf16.mxu1 %v7797_v53  ;;  %v6400_v53 = vld [vmem:[%s11523_s5 + $0x310] sm:$0xff] }
 0xae0   : > { %v7831_v13 = vpack.c.bf16 %v6400_v53, %v6398_v39  ;;  %v4972_v53 = vld [vmem:[%s11526_s8 + $0x90] sm:$0xff] }
 0xae2   : > { %7800 = vmatpush1.bf16.msra.mxu1 %v7799_v37 }
 0xae3   : > { %6360 = vmatprep.subr.msk.mxu1 %vm1060_vm1, %v6359_v41  ;;  %v6402_v41 = vld [vmem:[%s11523_s5 + $0x320] sm:$0xff] }
 0xae4   : > { %v7835_v51 = vpack.c.bf16 %v6404_v45, %v6402_v41  ;;  %v6424_v41 = vld [vmem:[%s11526_s8 + $0xa0] sm:$0xff]  ;;  %v6425_v45 = vld [vmem:[%s11526_s8 + $0xa8] sm:$0xff] }
 0xae6   : > { %6361 = vmatpush1.msk.msra.mxu1 %vm1060_vm1, %v6358_v38  ;;  %v7839_v38 = vpack.c.bf16 %v6408_v56, %v6406_v55  ;;  %v7884_v55 = vpack.c.bf16 %v6425_v45, %v6424_v41  ;;  %v6426_v56 = vld [vmem:[%s11526_s8 + $0xb0] sm:$0xff]  ;;  %v6454_v41 = vld [vmem:[%s11527_s9 + $0x98] sm:$0xff] }
 0xae7   : > { %6362 = vmatmul.mubr.msk.f32.vlgmr.msra.gmra.mrb[44].mxu1 %vm1635_vm9, %v10694_v61  ;;  %7802 = vmatprep.subr.bf16.mxu1 %v7801_v57  ;;  %v6379_v61 = vld [vmem:[%s11523_s5 + $0x288] sm:$0xff] }
 0xae8   : > { %7804 = vmatpush1.bf16.msra.mxu1 %v7803_v26  ;;  %4533 = vmatprep.mubr.f32.mxu1 %v8241_v7  ;;  %v7813_v4 = vpack.c.bf16 %v6379_v61, %v6377_v2  ;;  %v6411_v57 = vld [vmem:[%s11523_s5 + $0x368] sm:$0xf]  ;;  %v6410_v26 = vld [vmem:[%s11523_s5 + $0x360] sm:$0xf] }
 0xae9   : > { %7806 = vmatprep.subr.bf16.mxu1 %v7805_v34  ;;  %v4776_v34 = vld [vmem:[%s11524_s6] sm:$0x3] }
 0xaea   : > { %v4781_v58 = vrot.slane %v4776_v34, %v8854_v46  ;;  %v4796_v46 = vld [vmem:[%s11525_s7] sm:$0x1f] }
 0xaeb   : > { %6363 = vmatmul.mubr.msk.f32.gmra.mrb[46].mxu1 %vm1635_vm9, %v4451_v36  ;;  %v6383_v36 = vld [vmem:[%s11523_s5 + $0x2a8] sm:$0xff] }
 0xaec   : > { %7808 = vmatpush1.bf16.msra.mxu1 %v7807_v63  ;;  %4643 = vmatprep.mubr.f32.mxu1 %v8241_v7  ;;  %v7817_v9 = vpack.c.bf16 %v6383_v36, %v6381_v32  ;;  %v6419_v32 = vld [vmem:[%s11525_s7 + $0x8] sm:$0x1f] }
 0xaed   : > { %7810 = vmatprep.subr.bf16.mxu1 %v7809_v0 }
 0xaf0   : > { %7812 = vmatpush1.bf16.msra.mxu1 %v7811_v3 }
 0xaf1   : > { %7814 = vmatprep.subr.bf16.mxu1 %v7813_v4 }
 0xaf4   : > { %7816 = vmatpush1.bf16.msra.mxu1 %v7815_v8  ;;  %v4956_v8 = vld [vmem:[%s11526_s8 + $0x10] sm:$0xff] }
 0xaf5   : > { %7818 = vmatprep.subr.bf16.mxu1 %v7817_v9  ;;  %v4957_v9 = vld [vmem:[%s11526_s8 + $0x18] sm:$0xff] }
 0xaf6   : > { %v7857_v25 = vpack.c.bf16 %v4957_v9, %v4956_v8  ;;  %v5138_v9 = vld [vmem:[%s11527_s9] sm:$0xff] }
 0xaf8   : > { %7820 = vmatpush1.bf16.msra.mxu1 %v7819_v14  ;;  %v7860_v14 = vpack.c.bf16 %v4959_v11, %v4958_v10  ;;  %v6445_v10 = vld [vmem:[%s11527_s9 + $0x50] sm:$0xff] }
 0xaf9   : > { %6386 = vmatprep.subr.msk.mxu1 %vm1060_vm1, %v6385_v15  ;;  %v4960_v15 = vld [vmem:[%s11526_s8 + $0x30] sm:$0xff] }
 0xafa   : > { %v7863_v18 = vpack.c.bf16 %v4961_v16, %v4960_v15  ;;  %v5140_v15 = vld [vmem:[%s11527_s9 + $0x10] sm:$0xff]  ;;  %v5141_v16 = vld [vmem:[%s11527_s9 + $0x18] sm:$0xff] }
 0xafc   : > { %6387 = vmatpush1.msk.msra.mxu1 %vm1060_vm1, %v6384_v27  ;;  %v4965_v27 = vld [vmem:[%s11526_s8 + $0x58] sm:$0xff] }
 0xafd   : > { %6388 = vmatmul.mubr.msk.f32.vlgmr.msra.gmra.mrb[44].mxu1 %vm1635_vm9, %v10699_v50  ;;  %7822 = vmatprep.subr.bf16.mxu1 %v7821_v19  ;;  %v6405_v50 = vld [vmem:[%s11523_s5 + $0x338] sm:$0xff]  ;;  %v7869_v19 = vpack.c.bf16 %v4965_v27, %v4964_v17  ;;  %v7917_v17 = vpack.c.bf16 %v6448_v22, %v6447_v20  ;;  %v5142_v27 = vld [vmem:[%s11527_s9 + $0x20] sm:$0xff]  ;;  %v6481_v22 = vld [vmem:[%s11527_s9 + $0x150] sm:$0xff] }
 0xafe   : > { %7824 = vmatpush1.bf16.msra.mxu1 %v7823_v29  ;;  %4649 = vmatprep.mubr.f32.mxu1 %v8241_v7  ;;  %v7833_v37 = vpack.c.bf16 %v6405_v50, %v6403_v12  ;;  %v4966_v29 = vld [vmem:[%s11526_s8 + $0x60] sm:$0xff]  ;;  %v4973_v12 = vld [vmem:[%s11526_s8 + $0x98] sm:$0xff] }
 0xaff   : > { %7826 = vmatprep.subr.bf16.mxu1 %v7825_v23  ;;  %v4967_v23 = vld [vmem:[%s11526_s8 + $0x68] sm:$0xff]  ;;  %v7881_v50 = vpack.c.bf16 %v4973_v12, %v4972_v53  ;;  %v5146_v12 = vld [vmem:[%s11527_s9 + $0x40] sm:$0xff] }
 0xb00   : > { %v7872_v21 = vpack.c.bf16 %v4967_v23, %v4966_v29  ;;  %v6449_v29 = vld [vmem:[%s11527_s9 + $0x70] sm:$0xff]  ;;  %v6450_v23 = vld [vmem:[%s11527_s9 + $0x78] sm:$0xff] }
 0xb01   : > { %6389 = vmatmul.mubr.msk.f32.gmra.mrb[46].mxu1 %vm1635_vm9, %v4567_v40  ;;  %v6409_v40 = vld [vmem:[%s11523_s5 + $0x358] sm:$0xff]  ;;  %v7920_v30 = vpack.c.bf16 %v6450_v23, %v6449_v29  ;;  %v6485_v23 = vld [vmem:[%s11527_s9 + $0x170] sm:$0xff] }
 0xb02   : > { %7828 = vmatpush1.bf16.msra.mxu1 %v7827_v35  ;;  %4759 = vmatprep.mubr.f32.mxu1 %v8241_v7  ;;  %v7837_v54 = vpack.c.bf16 %v6409_v40, %v6407_v52  ;;  %v4970_v35 = vld [vmem:[%s11526_s8 + $0x80] sm:$0xff] }
 0xb03   : > { %7830 = vmatprep.subr.bf16.mxu1 %v7829_v43  ;;  %v4971_v43 = vld [vmem:[%s11526_s8 + $0x88] sm:$0xff] }
 0xb04   : > { %v7878_v39 = vpack.c.bf16 %v4971_v43, %v4970_v35  ;;  %v6451_v35 = vld [vmem:[%s11527_s9 + $0x80] sm:$0xff]  ;;  %v6452_v43 = vld [vmem:[%s11527_s9 + $0x88] sm:$0xff] }
 0xb05   : > { %v7923_v53 = vpack.c.bf16 %v6452_v43, %v6451_v35 }
 0xb06   : > { %7832 = vmatpush1.bf16.msra.mxu1 %v7831_v13 }
 0xb07   : > { %7834 = vmatprep.subr.bf16.mxu1 %v7833_v37 }
 0xb0a   : > { %7836 = vmatpush1.bf16.msra.mxu1 %v7835_v51 }
 0xb0b   : > { %7838 = vmatprep.subr.bf16.mxu1 %v7837_v54 }
 0xb0e   : > { %7840 = vmatpush1.bf16.msra.mxu1 %v7839_v38  ;;  %v6427_v38 = vld [vmem:[%s11526_s8 + $0xb8] sm:$0xff] }
 0xb0f   : > { %6412 = vmatprep.subr.msk.mxu1 %vm1060_vm1, %v6411_v57  ;;  %v7887_v57 = vpack.c.bf16 %v6427_v38, %v6426_v56  ;;  %v6458_v56 = vld [vmem:[%s11527_s9 + $0xa8] sm:$0xff] }
 0xb12   : > { %6413 = vmatpush1.msk.msra.mxu1 %vm1060_vm1, %v6410_v26  ;;  %v6428_v26 = vld [vmem:[%s11526_s8 + $0xc0] sm:$0xff] }
 0xb13   : > { %6414 = vmatmul.mubr.msk.f32.vlgmr.msra.gmra.mrb[44].mxu1 %vm1635_vm9, %v10704_v44  ;;  %7928 = vmatprep.subr.bf16.mxu1 %v8242_v49  ;;  %v4785_v44 = vrot.slane %v4776_v34, %v8859_v47  ;;  %v4954_v47 = vld [vmem:[%s11526_s8] sm:$0xff]  ;;  %v6429_v34 = vld [vmem:[%s11526_s8 + $0xc8] sm:$0xff] }
 0xb14   : > { %4765 = vmatprep.mubr.f32.mxu1 %v8241_v7  ;;  %v7854_v36 = vpack.c.bf16 %v4955_v6, %v4954_v47  ;;  %v6441_v47 = vld [vmem:[%s11526_s8 + $0x128] sm:$0xff] }
 0xb17   : > { %6415 = vmatmul.mubr.msk.f32.gmra.mrb[46].mxu1 %vm1635_vm9, %v4683_v33 }
 0xb18   : > { %6904 = vmatprep.mubr.msk.f32.mxu1 %vm8244_vm14, %v8241_v7 }
 0xbe6   : > { %v4761_v59 = vpop.f32.mrb[44].mxu1 }
 0xbe7   : > { %v4763_v60 = vpop.f32.mrb[45].mxu1  ;;  %v4788_v62 = vadd.f32 %v4781_v58, %v4761_v59  ;;  %v6430_v59 = vld [vmem:[%s11526_s8 + $0xd0] sm:$0xff] }
 0xbe8   : > { %v4789_v63 = vadd.f32 %v4785_v44, %v4763_v60 }
 0xbe9   : > { %v4792_v33 = vmax.f32 %v4788_v62, 0.0  ;;  %v6432_v62 = vld [vmem:[%s11526_s8 + $0xe0] sm:$0xff] }
 0xbea   : > { %v4767_v0 = vpop.f32.mrb[46].mxu1  ;;  %v4793_v61 = vmax.f32 %v4789_v63, 0.0  ;;  %v6433_v63 = vld [vmem:[%s11526_s8 + $0xe8] sm:$0xff] }
 0xbeb   : > { %v4790_v1 = vadd.f32 %v4781_v58, %v4767_v0  ;;  %v4769_v28 = vpop.f32.mrb[47].mxu1  ;;  %v7890_v58 = vpack.c.bf16 %v6429_v34, %v6428_v26  ;;  %v7896_v0 = vpack.c.bf16 %v6433_v63, %v6432_v62  ;;  %v6459_v62 = vld [vmem:[%s11527_s9 + $0xb0] sm:$0xff]  ;;  %v6460_v63 = vld [vmem:[%s11527_s9 + $0xb8] sm:$0xff] }
 0xbec   : > { %v4791_v42 = vadd.f32 %v4785_v44, %v4769_v28  ;;  %v6431_v44 = vld [vmem:[%s11526_s8 + $0xd8] sm:$0xff] }
 0xbed   : > { %v4794_v2 = vmax.f32 %v4790_v1, 0.0  ;;  %v7893_v60 = vpack.c.bf16 %v6431_v44, %v6430_v59  ;;  %v6434_v1 = vld [vmem:[%s11526_s8 + $0xf0] sm:$0xff]  ;;  %v6435_v28 = vld [vmem:[%s11526_s8 + $0xf8] sm:$0xff]  ;;  %v6471_v59 = vld [vmem:[%s11527_s9 + $0x108] sm:$0xff] }
 0xbee   : > { %v4795_v3 = vmax.f32 %v4791_v42, 0.0  ;;  %v7899_v42 = vpack.c.bf16 %v6435_v28, %v6434_v1  ;;  %v6472_v1 = vld [vmem:[%s11527_s9 + $0x110] sm:$0xff]  ;;  %v6473_v28 = vld [vmem:[%s11527_s9 + $0x118] sm:$0xff] }
 0xbef   : > { %v7844_v4 = vpack.c.bf16 %v4794_v2, %v4792_v33  ;;  %v6436_v33 = vld [vmem:[%s11526_s8 + $0x100] sm:$0xff]  ;;  %v6437_v2 = vld [vmem:[%s11526_s8 + $0x108] sm:$0xff] }
 0xbf0   : > { %v7841_v5 = vpack.c.bf16 %v4795_v3, %v4793_v61  ;;  %v7902_v61 = vpack.c.bf16 %v6437_v2, %v6436_v33  ;;  %v6438_v3 = vld [vmem:[%s11526_s8 + $0x110] sm:$0xff]  ;;  %v6461_v33 = vld [vmem:[%s11527_s9 + $0xc0] sm:$0xff]  ;;  %v6462_v2 = vld [vmem:[%s11527_s9 + $0xc8] sm:$0xff] }
 0xbf2   : > { %7843 = vmatprep.subr.msk.bf16.mxu0 %vm9510_vm11, %v7841_v5 }
 0xbf3   : > { %7846 = vmatpush1.bf16.msk.msra.mxu0 %vm9510_vm11, %v7844_v4 }
 0xbf4   : > { %7849 = vmatprep.subr.msk.bf16.mxu0 %vm9510_vm11, %v7841_v5 }
 0xbf6   : > { %6418 = vmatmul.mubr.msk.f32.vlgmr.msra.gmra.mrb[30].mxu0 %vm2182_vm12, %v4796_v46  ;;  %v6440_v46 = vld [vmem:[%s11526_s8 + $0x120] sm:$0xff] }
 0xbf7   : > { %7852 = vmatpush1.bf16.msk.msra.mxu0 %vm9510_vm11, %v7844_v4  ;;  %4945 = vmatprep.mubr.f32.mxu0 %v8241_v7  ;;  %v6439_v4 = vld [vmem:[%s11526_s8 + $0x118] sm:$0xff]  ;;  %v7908_v6 = vpack.c.bf16 %v6441_v47, %v6440_v46  ;;  %v6463_v46 = vld [vmem:[%s11527_s9 + $0xd0] sm:$0xff] }
 0xbf8   : > { %7853 = vmatprep.subr.bf16.mxu0 %v8242_v49  ;;  %v7905_v5 = vpack.c.bf16 %v6439_v4, %v6438_v3  ;;  %v6474_v3 = vld [vmem:[%s11527_s9 + $0x120] sm:$0xff]  ;;  %v6475_v4 = vld [vmem:[%s11527_s9 + $0x128] sm:$0xff]  ;;  %v6464_v47 = vld [vmem:[%s11527_s9 + $0xd8] sm:$0xff] }
 0xbfa   : > { %6422 = vmatmul.mubr.msk.f32.vlgmr.msra.gmra.mrb[32].mxu0 %vm2182_vm12, %v6419_v32  ;;  %v6442_v32 = vld [vmem:[%s11526_s8 + $0x130] sm:$0xff] }
 0xbfb   : > { %7855 = vmatpush1.bf16.msra.mxu0 %v7854_v36  ;;  %v6443_v36 = vld [vmem:[%s11526_s8 + $0x138] sm:$0xff] }
 0xbfc   : > { %7856 = vmatprep.subr.bf16.mxu0 %v8242_v49  ;;  %v7911_v8 = vpack.c.bf16 %v6443_v36, %v6442_v32  ;;  %v6476_v32 = vld [vmem:[%s11527_s9 + $0x130] sm:$0xff]  ;;  %v6477_v36 = vld [vmem:[%s11527_s9 + $0x138] sm:$0xff] }
 0xbff   : > { %7858 = vmatpush1.bf16.msra.mxu0 %v7857_v25  ;;  %v5139_v25 = vld [vmem:[%s11527_s9 + $0x8] sm:$0xff] }
 0xc00   : > { %7859 = vmatprep.subr.bf16.mxu0 %v8242_v49  ;;  %v7929_v11 = vpack.c.bf16 %v5139_v25, %v5138_v9  ;;  %v6465_v9 = vld [vmem:[%s11527_s9 + $0xe0] sm:$0xff]  ;;  %v6466_v25 = vld [vmem:[%s11527_s9 + $0xe8] sm:$0xff] }
 0xc02   : > { %7930 = vmatpush3.bf16.msra.mxu1 %v7929_v11  ;;  %v7956_v11 = vpack.c.bf16 %v6466_v25, %v6465_v9  ;;  %v5659_v25 = vld [vmem:[%s11531_s13 + $0x60] sm:$0xff] }
 0xc03   : > { %7861 = vmatpush1.bf16.msra.mxu0 %v7860_v14  ;;  %v6446_v14 = vld [vmem:[%s11527_s9 + $0x58] sm:$0xff]  ;;  %7931 = vmatprep.subr.bf16.mxu1 %v8242_v49 }
 0xc04   : > { %7862 = vmatprep.subr.bf16.mxu0 %v8242_v49 }
 0xc07   : > { %7864 = vmatpush1.bf16.msra.mxu0 %v7863_v18  ;;  %v7914_v18 = vpack.c.bf16 %v6446_v14, %v6445_v10  ;;  %v7971_v10 = vpack.c.bf16 %v6477_v36, %v6476_v32  ;;  %v6479_v14 = vld [vmem:[%s11527_s9 + $0x140] sm:$0xff]  ;;  %v5657_v36 = vld [vmem:[%s11531_s13 + $0x50] sm:$0xff] }
 0xc08   : > { %7865 = vmatprep.subr.bf16.mxu0 %v8242_v49 }
 0xc0b   : > { %7867 = vmatpush1.bf16.msra.mxu0 %v7866_v24  ;;  %v7932_v24 = vpack.c.bf16 %v5141_v16, %v5140_v15  ;;  %v6480_v15 = vld [vmem:[%s11527_s9 + $0x148] sm:$0xff] }
 0xc0c   : > { %7868 = vmatprep.subr.bf16.mxu0 %v8242_v49 }
 0xc0d   : > { %7933 = vmatpush3.bf16.msra.mxu1 %v7932_v24  ;;  %v6482_v24 = vld [vmem:[%s11527_s9 + $0x158] sm:$0xff] }
 0xc0e   : > { %7934 = vmatprep.subr.bf16.mxu1 %v8242_v49 }
 0xc0f   : > { %7870 = vmatpush1.bf16.msra.mxu0 %v7869_v19  ;;  %v5143_v19 = vld [vmem:[%s11527_s9 + $0x28] sm:$0xff] }
 0xc10   : > { %7871 = vmatprep.subr.bf16.mxu0 %v8242_v49 }
 0xc13   : > { %7873 = vmatpush1.bf16.msra.mxu0 %v7872_v21  ;;  %v7935_v21 = vpack.c.bf16 %v5143_v19, %v5142_v27  ;;  %v6483_v27 = vld [vmem:[%s11527_s9 + $0x160] sm:$0xff]  ;;  %v6484_v19 = vld [vmem:[%s11527_s9 + $0x168] sm:$0xff] }
 0xc14   : > { %7874 = vmatprep.subr.bf16.mxu0 %v8242_v49  ;;  %v7980_v29 = vpack.c.bf16 %v6484_v19, %v6483_v27 }
 0xc15   : > { %7936 = vmatpush3.bf16.msra.mxu1 %v7935_v21  ;;  %v6486_v21 = vld [vmem:[%s11527_s9 + $0x178] sm:$0xff] }
 0xc16   : > { %7937 = vmatprep.subr.bf16.mxu1 %v8242_v49 }
 0xc17   : > { %7876 = vmatpush1.bf16.msra.mxu0 %v7875_v48  ;;  %v5145_v48 = vld [vmem:[%s11527_s9 + $0x38] sm:$0xff] }
 0xc18   : > { %7877 = vmatprep.subr.bf16.mxu0 %v8242_v49 }
 0xc1b   : > { %7879 = vmatpush1.bf16.msra.mxu0 %v7878_v39  ;;  %v7938_v39 = vpack.c.bf16 %v5145_v48, %v5144_v31  ;;  %v6487_v31 = vld [vmem:[%s11527_s9 + $0x180] sm:$0xff]  ;;  %v6488_v48 = vld [vmem:[%s11527_s9 + $0x188] sm:$0xff] }
 0xc1c   : > { %7880 = vmatprep.subr.bf16.mxu0 %v8242_v49  ;;  %v7986_v35 = vpack.c.bf16 %v6488_v48, %v6487_v31 }
 0xc1d   : > { %7939 = vmatpush3.bf16.msra.mxu1 %v7938_v39  ;;  %v5559_v39 = vld [vmem:[%s11529_s11] sm:$0xff] }
 0xc1e   : > { %7940 = vmatprep.subr.bf16.mxu1 %v8242_v49 }
 0xc1f   : > { %7882 = vmatpush1.bf16.msra.mxu0 %v7881_v50  ;;  %v5147_v50 = vld [vmem:[%s11527_s9 + $0x48] sm:$0xff] }
 0xc20   : > { %7883 = vmatprep.subr.bf16.mxu0 %v8242_v49 }
 0xcc9   : > { %v4872_v13 = vpop.f32.mrb[30].mxu0 }
 0xcca   : > { %v4874_v37 = vpop.f32.mrb[31].mxu0 }
 0xccd   : > { %v4947_v52 = vpop.f32.mrb[32].mxu0 }
 0xcce   : > { %v4952_v40 = vmax.f32 %v4872_v13, %v4947_v52  ;;  %v4949_v51 = vpop.f32.mrb[33].mxu0  ;;  %v7941_v13 = vpack.c.bf16 %v5147_v50, %v5146_v12  ;;  %v5561_v50 = vld [vmem:[%s11529_s11 + $0x10] sm:$0xff] }
 0xccf   : > { %v4953_v54 = vmax.f32 %v4874_v37, %v4949_v51  ;;  %v6453_v37 = vld [vmem:[%s11527_s9 + $0x90] sm:$0xff] }
 0xcd0   : > { %7942 = vmatpush3.bf16.msra.mxu1 %v7941_v13  ;;  %v7926_v45 = vpack.c.bf16 %v6454_v41, %v6453_v37  ;;  %v6468_v51 = vld [vmem:[%s11527_s9 + $0xf0] sm:$0xff]  ;;  %v5563_v37 = vld [vmem:[%s11529_s11 + $0x20] sm:$0xff]  ;;  %v5564_v41 = vld [vmem:[%s11529_s11 + $0x28] sm:$0xff] }
 0xcd1   : > { %6423 = vmatprep.mubr.msk.f32.mxu0 %vm2362_vm13, %v4953_v54  ;;  %7958 = vmatprep.subr.bf16.mxu1 %v8242_v49 }
 0xcd2   : > { %5042 = vmatmul.mubr.f32.vlgmr.msra.gmra.mrb[34].mxu0 %v4952_v40 }
 0xcd3   : > { %7885 = vmatpush1.bf16.msra.mxu0 %v7884_v55  ;;  %6444 = vmatprep.mubr.msk.f32.mxu0 %vm2362_vm13, %v4953_v54  ;;  %v6469_v54 = vld [vmem:[%s11527_s9 + $0xf8] sm:$0xff]  ;;  %v6457_v55 = vld [vmem:[%s11527_s9 + $0xa0] sm:$0xff] }
 0xcd4   : > { %7886 = vmatprep.subr.bf16.mxu0 %v8242_v49  ;;  %v7944_v44 = vpack.c.bf16 %v6458_v56, %v6457_v55  ;;  %v5568_v55 = vld [vmem:[%s11529_s11 + $0x48] sm:$0xff] }
 0xcd7   : > { %7888 = vmatpush1.bf16.msra.mxu0 %v7887_v57  ;;  %v7959_v57 = vpack.c.bf16 %v6469_v54, %v6468_v51  ;;  %v5567_v54 = vld [vmem:[%s11529_s11 + $0x40] sm:$0xff] }
 0xcd8   : > { %7889 = vmatprep.subr.bf16.mxu0 %v8242_v49  ;;  %v8001_v56 = vpack.c.bf16 %v5568_v55, %v5567_v54 }
 0xcdb   : > { %7891 = vmatpush1.bf16.msra.mxu0 %v7890_v58  ;;  %v6470_v58 = vld [vmem:[%s11527_s9 + $0x100] sm:$0xff] }
 0xcdc   : > { %7892 = vmatprep.subr.bf16.mxu0 %v8242_v49 }
 0xcdf   : > { %7894 = vmatpush1.bf16.msra.mxu0 %v7893_v60 }
 0xce0   : > { %7895 = vmatprep.subr.bf16.mxu0 %v8242_v49 }
 0xce3   : > { %7897 = vmatpush1.bf16.msra.mxu0 %v7896_v0  ;;  %v7962_v0 = vpack.c.bf16 %v6471_v59, %v6470_v58  ;;  %v5572_v58 = vld [vmem:[%s11529_s11 + $0x68] sm:$0xff] }
 0xce4   : > { %7898 = vmatprep.subr.bf16.mxu0 %v8242_v49 }
 0xce7   : > { %7900 = vmatpush1.bf16.msra.mxu0 %v7899_v42  ;;  %v7947_v42 = vpack.c.bf16 %v6460_v63, %v6459_v62  ;;  %v5647_v63 = vld [vmem:[%s11531_s13] sm:$0xff] }
 0xce8   : > { %7901 = vmatprep.subr.bf16.mxu0 %v8242_v49 }
 0xceb   : > { %7903 = vmatpush1.bf16.msra.mxu0 %v7902_v61  ;;  %v7965_v61 = vpack.c.bf16 %v6473_v28, %v6472_v1  ;;  %v5649_v1 = vld [vmem:[%s11531_s13 + $0x10] sm:$0xff] }
 0xcec   : > { %7904 = vmatprep.subr.bf16.mxu0 %v8242_v49 }
 0xcef   : > { %7906 = vmatpush1.bf16.msra.mxu0 %v7905_v5  ;;  %v7950_v5 = vpack.c.bf16 %v6462_v2, %v6461_v33  ;;  %v5651_v2 = vld [vmem:[%s11531_s13 + $0x20] sm:$0xff] }
 0xcf0   : > { %7907 = vmatprep.subr.bf16.mxu0 %v8242_v49 }
 0xcf3   : > { %7909 = vmatpush1.bf16.msra.mxu0 %v7908_v6  ;;  %v7968_v6 = vpack.c.bf16 %v6475_v4, %v6474_v3  ;;  %v5653_v4 = vld [vmem:[%s11531_s13 + $0x30] sm:$0xff] }
 0xcf4   : > { %7910 = vmatprep.subr.bf16.mxu0 %v8242_v49 }
 0xcf7   : > { %7912 = vmatpush1.bf16.msra.mxu0 %v7911_v8  ;;  %v7953_v8 = vpack.c.bf16 %v6464_v47, %v6463_v46  ;;  %v5655_v47 = vld [vmem:[%s11531_s13 + $0x40] sm:$0xff] }
 0xcf8   : > { %7913 = vmatprep.subr.bf16.mxu0 %v8242_v49 }
 0xcfa   : > { %5132 = vmatmul.mubr.f32.vlgmr.msra.gmra.mrb[36].mxu0 %v4952_v40 }
 0xcfb   : > { %6881 = vmatprep.mubr.msk.f32.mxu0 %vm8244_vm14, %v8241_v7  ;;  %7915 = vmatpush3.bf16.msra.mxu0 %v7914_v18  ;;  %v7974_v18 = vpack.c.bf16 %v6480_v15, %v6479_v14 }
 0xcfc   : > { %7916 = vmatprep.subr.bf16.mxu0 %v8242_v49 }
 0xcff   : > { %7918 = vmatpush3.bf16.msra.mxu0 %v7917_v17  ;;  %v7977_v17 = vpack.c.bf16 %v6482_v24, %v6481_v22 }
 0xd00   : > { %7919 = vmatprep.subr.bf16.mxu0 %v8242_v49 }
 0xd03   : > { %7921 = vmatpush3.bf16.msra.mxu0 %v7920_v30  ;;  %v7983_v30 = vpack.c.bf16 %v6486_v21, %v6485_v23  ;;  %v5556_v21 = vld [vmem:[%s11528_s10] sm:$0x1] }
 0xd04   : > { %7922 = vmatprep.subr.bf16.mxu0 %v8242_v49 }
 0xd07   : > { %7924 = vmatpush3.bf16.msra.mxu0 %v7923_v53  ;;  %v5560_v53 = vld [vmem:[%s11529_s11 + $0x8] sm:$0xff] }
 0xd08   : > { %7925 = vmatprep.subr.bf16.mxu0 %v8242_v49  ;;  %v7989_v12 = vpack.c.bf16 %v5560_v53, %v5559_v39  ;;  %v5575_v53 = vld [vmem:[%s11530_s12] sm:$0x1] }
 0xd0b   : > { %7927 = vmatpush3.bf16.msra.mxu0 %v7926_v45  ;;  %v5565_v45 = vld [vmem:[%s11529_s11 + $0x30] sm:$0xff] }
 0xd0c   : > { %7943 = vmatprep.subr.bf16.mxu0 %v8242_v49 }
 0xda5   : > { %v5043_v52 = vpop.f32.mrb[34].mxu0 }
 0xda6   : > { %v5045_v40 = vpop.f32.mrb[35].mxu0 }
 0xda7   : > { %v5566_v40 = vld [vmem:[%s11529_s11 + $0x38] sm:$0xff] }
 0xda8   : > { %v7998_v51 = vpack.c.bf16 %v5566_v40, %v5565_v45 }
 0xdcd   : > { %v5133_v38 = vpop.f32.mrb[36].mxu0 }
 0xdce   : > { %v11230_v26 = vmax.f32 %v5043_v52, %v5133_v38  ;;  %v5135_v34 = vpop.f32.mrb[37].mxu0  ;;  %v7995_v52 = vpack.c.bf16 %v5564_v41, %v5563_v37  ;;  %v5569_v38 = vld [vmem:[%s11529_s11 + $0x50] sm:$0xff]  ;;  %v5663_v37 = vld [vmem:[%s11532_s14] sm:$0x1] }
 0xdcf   : > { %v5571_v34 = vld [vmem:[%s11529_s11 + $0x60] sm:$0xff] }
 0xdd0   : > { %6905 = vmatmul.mubr.msk.f32.vlgmr.msra.gmra.mrb[48].mxu1 %vm2551_vm15, %v11230_v26  ;;  %v5159_v60 = vrot.slane %v11230_v26, 1  ;;  %v5398_v16 = vrot.slane %v11230_v26, 3  ;;  %v5314_v20 = vrot.slane %v11230_v26, 2  ;;  %v5482_v43 = vrot.slane %v11230_v26, 4 }
 0xdd1   : > { %7960 = vmatpush3.bf16.msra.mxu1 %v7959_v57  ;;  %6950 = vmatprep.mubr.msk.f32.mxu1 %vm8244_vm14, %v8241_v7  ;;  %v5570_v57 = vld [vmem:[%s11529_s11 + $0x58] sm:$0xff]  ;;  %v8007_v59 = vpack.c.bf16 %v5572_v58, %v5571_v34 }
 0xdd2   : > { %6882 = vmatmul.mubr.msk.f32.vlgmr.msra.gmra.mrb[38].mxu0 %vm2551_vm15, %v5159_v60  ;;  %7961 = vmatprep.subr.bf16.mxu1 %v8242_v49  ;;  %v8004_v26 = vpack.c.bf16 %v5570_v57, %v5569_v38  ;;  %v5574_v60 = vld [vmem:[%s11529_s11 + $0x78] sm:$0xff] }
 0xdd3   : > { %7945 = vmatpush3.bf16.msra.mxu0 %v7944_v44  ;;  %6927 = vmatprep.mubr.msk.f32.mxu0 %vm8244_vm14, %v8241_v7  ;;  %v5573_v44 = vld [vmem:[%s11529_s11 + $0x70] sm:$0xff] }
 0xdd4   : > { %7946 = vmatprep.subr.bf16.mxu0 %v8242_v49  ;;  %v8010_v62 = vpack.c.bf16 %v5574_v60, %v5573_v44 }
 0xdd5   : > { %7963 = vmatpush3.bf16.msra.mxu1 %v7962_v0  ;;  %v5648_v0 = vld [vmem:[%s11531_s13 + $0x8] sm:$0xff] }
 0xdd6   : > { %7964 = vmatprep.subr.bf16.mxu1 %v8242_v49  ;;  %v8013_v28 = vpack.c.bf16 %v5648_v0, %v5647_v63 }
 0xdd7   : > { %7948 = vmatpush3.bf16.msra.mxu0 %v7947_v42  ;;  %v5650_v42 = vld [vmem:[%s11531_s13 + $0x18] sm:$0xff] }
 0xdd8   : > { %7949 = vmatprep.subr.bf16.mxu0 %v8242_v49  ;;  %v8016_v33 = vpack.c.bf16 %v5650_v42, %v5649_v1 }
 0xdd9   : > { %7966 = vmatpush3.bf16.msra.mxu1 %v7965_v61  ;;  %v5652_v61 = vld [vmem:[%s11531_s13 + $0x28] sm:$0xff] }
 0xdda   : > { %7967 = vmatprep.subr.bf16.mxu1 %v8242_v49  ;;  %v8019_v3 = vpack.c.bf16 %v5652_v61, %v5651_v2 }
 0xddb   : > { %7951 = vmatpush3.bf16.msra.mxu0 %v7950_v5  ;;  %v5654_v5 = vld [vmem:[%s11531_s13 + $0x38] sm:$0xff] }
 0xddc   : > { %7952 = vmatprep.subr.bf16.mxu0 %v8242_v49  ;;  %v8022_v46 = vpack.c.bf16 %v5654_v5, %v5653_v4 }
 0xddd   : > { %7969 = vmatpush3.bf16.msra.mxu1 %v7968_v6  ;;  %v5656_v6 = vld [vmem:[%s11531_s13 + $0x48] sm:$0xff] }
 0xdde   : > { %7970 = vmatprep.subr.bf16.mxu1 %v8242_v49  ;;  %v8025_v32 = vpack.c.bf16 %v5656_v6, %v5655_v47 }
 0xddf   : > { %7954 = vmatpush3.bf16.msra.mxu0 %v7953_v8  ;;  %v5658_v8 = vld [vmem:[%s11531_s13 + $0x58] sm:$0xff] }
 0xde0   : > { %7955 = vmatprep.subr.bf16.mxu0 %v8242_v49  ;;  %v8028_v9 = vpack.c.bf16 %v5658_v8, %v5657_v36 }
 0xde1   : > { %7972 = vmatpush3.bf16.msra.mxu1 %v7971_v10  ;;  %v5660_v10 = vld [vmem:[%s11531_s13 + $0x68] sm:$0xff] }
 0xde2   : > { %7988 = vmatprep.subr.bf16.mxu1 %v8242_v49 }
 0xde3   : > { %7957 = vmatpush3.bf16.msra.mxu0 %v7956_v11  ;;  %v8031_v11 = vpack.c.bf16 %v5660_v10, %v5659_v25 }
 0xde4   : > { %6951 = vmatmul.mubr.msk.f32.vlgmr.msra.gmra.mrb[50].mxu1 %vm2551_vm15, %v5398_v16  ;;  %7973 = vmatprep.subr.bf16.mxu0 %v8242_v49 }
 0xde5   : > { %7008 = vmatprep.mubr.msk.f32.mxu1 %vm8244_vm14, %v8241_v7  ;;  %7990 = vmatpush3.bf16.msra.mxu1 %v7989_v12 }
 0xde6   : > { %6928 = vmatmul.mubr.msk.f32.vlgmr.msra.gmra.mrb[40].mxu0 %vm2551_vm15, %v5314_v20  ;;  %7991 = vmatprep.subr.bf16.mxu1 %v8242_v49 }
 0xde7   : > { %7975 = vmatpush3.bf16.msra.mxu0 %v7974_v18  ;;  %6973 = vmatprep.mubr.msk.f32.mxu0 %vm8244_vm14, %v8241_v7 }
 0xde8   : > { %7976 = vmatprep.subr.bf16.mxu0 %v8242_v49 }
 0xdeb   : > { %7978 = vmatpush3.bf16.msra.mxu0 %v7977_v17 }
 0xdec   : > { %7979 = vmatprep.subr.bf16.mxu0 %v8242_v49 }
 0xdef   : > { %7981 = vmatpush3.bf16.msra.mxu0 %v7980_v29 }
 0xdf0   : > { %7982 = vmatprep.subr.bf16.mxu0 %v8242_v49 }
 0xdf3   : > { %7984 = vmatpush3.bf16.msra.mxu0 %v7983_v30 }
 0xdf4   : > { %7985 = vmatprep.subr.bf16.mxu0 %v8242_v49 }
 0xdf7   : > { %7987 = vmatpush3.bf16.msra.mxu0 %v7986_v35  ;;  %v5661_v35 = vld [vmem:[%s11531_s13 + $0x70] sm:$0xff] }
 0xdf8   : > { %8012 = vmatprep.subr.bf16.mxu0 %v8242_v49 }
 0xdfa   : > { %6974 = vmatmul.mubr.msk.f32.vlgmr.msra.gmra.mrb[42].mxu0 %vm2551_vm15, %v5482_v43  ;;  %v5662_v43 = vld [vmem:[%s11531_s13 + $0x78] sm:$0xff] }
 0xdfb   : > { %7043 = vmatprep.mubr.msk.f32.mxu0 %vm8244_vm14, %v8241_v7  ;;  %v5562_v7 = vld [vmem:[%s11529_s11 + $0x18] sm:$0xff]  ;;  %8014 = vmatpush3.bf16.msra.mxu0 %v8013_v28  ;;  %v8034_v39 = vpack.c.bf16 %v5662_v43, %v5661_v35 }
 0xdfc   : > { %v7992_v13 = vpack.c.bf16 %v5562_v7, %v5561_v50  ;;  %8015 = vmatprep.subr.bf16.mxu0 %v8242_v49 }
 0xdfe   : > { %7993 = vmatpush3.bf16.msra.mxu1 %v7992_v13 }
 0xdff   : > { %7994 = vmatprep.subr.bf16.mxu1 %v8242_v49  ;;  %8017 = vmatpush3.bf16.msra.mxu0 %v8016_v33 }
 0xe00   : > { %8018 = vmatprep.subr.bf16.mxu0 %v8242_v49 }
 0xe02   : > { %7996 = vmatpush3.bf16.msra.mxu1 %v7995_v52 }
 0xe03   : > { %7997 = vmatprep.subr.bf16.mxu1 %v8242_v49  ;;  %8020 = vmatpush3.bf16.msra.mxu0 %v8019_v3 }
 0xe04   : > { %8021 = vmatprep.subr.bf16.mxu0 %v8242_v49 }
 0xe06   : > { %7999 = vmatpush3.bf16.msra.mxu1 %v7998_v51 }
 0xe07   : > { %8000 = vmatprep.subr.bf16.mxu1 %v8242_v49  ;;  %8023 = vmatpush3.bf16.msra.mxu0 %v8022_v46 }
 0xe08   : > { %8024 = vmatprep.subr.bf16.mxu0 %v8242_v49 }
 0xe0a   : > { %8002 = vmatpush3.bf16.msra.mxu1 %v8001_v56 }
 0xe0b   : > { %8003 = vmatprep.subr.bf16.mxu1 %v8242_v49  ;;  %8026 = vmatpush3.bf16.msra.mxu0 %v8025_v32 }
 0xe0c   : > { %8027 = vmatprep.subr.bf16.mxu0 %v8242_v49 }
 0xe0e   : > { %8005 = vmatpush3.bf16.msra.mxu1 %v8004_v26 }
 0xe0f   : > { %8006 = vmatprep.subr.bf16.mxu1 %v8242_v49  ;;  %8029 = vmatpush3.bf16.msra.mxu0 %v8028_v9 }
 0xe10   : > { %8030 = vmatprep.subr.bf16.mxu0 %v8242_v49 }
 0xe12   : > { %8008 = vmatpush3.bf16.msra.mxu1 %v8007_v59 }
 0xe13   : > { %8009 = vmatprep.subr.bf16.mxu1 %v8242_v49  ;;  %8032 = vmatpush3.bf16.msra.mxu0 %v8031_v11 }
 0xe14   : > { %8033 = vmatprep.subr.bf16.mxu0 %v8242_v49 }
 0xe16   : > { %8011 = vmatpush3.bf16.msra.mxu1 %v8010_v62 }
 0xe17   : > { %8035 = vmatpush3.bf16.msra.mxu0 %v8034_v39 }
 0xea3   : > { %v5300_v14 = vpop.f32.mrb[48].mxu1 }
 0xea4   : > { %v6906_v15 = vpop.f32.mrb[49].mxu1 }
 0xea5   : > { %v5228_v16 = vpop.f32.mrb[38].mxu0 }
 0xea6   : > { %v5301_v18 = vadd.f32 %v5300_v14, %v5228_v16  ;;  %v6883_v20 = vpop.f32.mrb[39].mxu0 }
 0xeb7   : > { %v5467_v22 = vpop.f32.mrb[50].mxu1 }
 0xeb8   : > { %v6952_v24 = vpop.f32.mrb[51].mxu1 }
 0xeb9   : > { %v5383_v17 = vpop.f32.mrb[40].mxu0 }
 0xeba   : > { %v5387_v27 = vadd.f32 %v5383_v17, %v5301_v18  ;;  %v6929_v19 = vpop.f32.mrb[41].mxu0 }
 0xebc   : > { %v5471_v29 = vadd.f32 %v5467_v22, %v5387_v27 }
 0xecd   : > { %v5551_v23 = vpop.f32.mrb[42].mxu0 }
 0xece   : > { %v5555_v30 = vadd.f32 %v5551_v23, %v5471_v29  ;;  %v6975_v49 = vpop.f32.mrb[43].mxu0 }
 0xed0   : > { %v5557_v31 = vadd.f32 %v5556_v21, %v5555_v30 }
 0xed2   : > { %v5558_v48 = vmax.f32 %v5557_v31, 0.0 }
 0xed4   : > { %7009 = vmatmul.mubr.f32.vlgmr.msra.gmra.mrb[52].mxu1 %v5558_v48 }
 0xfa7   : > { %v5642_v12 = vpop.f32.mrb[52].mxu1 }
 0xfa8   : > { %v5643_v50 = vadd.f32 %v5642_v12, %v5575_v53  ;;  %v7010_v7 = vpop.f32.mrb[53].mxu1 }
 0xfaa   : > { %v5646_v13 = vmax.f32 %v5643_v50, 0.0 }
 0xfac   : > { %7044 = vmatmul.mubr.f32.vlgmr.msra.gmra.mrb[44].mxu0 %v5646_v13 }
0x107f   : > { %v5730_v41 = vpop.f32.mrb[44].mxu0 }
0x1080   : > { %v5731_v45 = vadd.f32 %v5730_v41, %v5663_v37  ;;  %v7045_v52 = vpop.f32.mrb[45].mxu0 }
0x1082   : > { %6490 = vst.msk [vmem:[%s10490_s15 + $0x1] sm:$0x1] %vm3129_vm3, %v5731_v45 }
0x1083   : > { %8190 = shalt.err (!%p8187_p3)
}
0x1084   : > { %s8191_s18 = scalar_lea.hbm %s11471_s29, 32  ;;  %s8195_s21 = scalar_lea.hbm %s11554_s24, 64 }
0x1085   : > { %p8192_p4 = scmp.ne.s32.totalorder %s11471_s29, %s8191_s18  ;;  %p8196_p9 = scmp.lt.u32.totalorder %s11471_s29, %s11554_s24 }
0x1086   : > { %p8197_p10 = scmp.lt.u32.totalorder %s8195_s21, %s8191_s18  ;;  %p8199_p12 = scmp.lt.u32.totalorder %s8191_s18, %s11471_s29 }
0x1087   : > { %p8193_p7 = pnand %p8192_p4, %p8366_p5 }
0x1088   : > { %p8198_p11 = por %p8197_p10, %p8196_p9 }
0x1089   : > { %p8194_p8 = pneg %p8193_p7 }
0x108a   : > { %p8200_p13 = por %p8199_p12, %p8198_p11 }
0x108c   : > { %p8201_p0 = pnand %p8200_p13, %p8194_p8 }
0x108e   : > { %8204 = shalt.err (!%p8201_p0)
}
0x108f   : > { %s8246_s25 = smov 16   ;;  %s8247_s26 = smov 1  }
0x1090   : > { %8132 = dma.vmem_to_hbm [thread:$0]  (%p8366_p5), %s11466_s30, 32, %s11471_s29, %s11477_s22, %s8246_s25, %s8246_s25, %s8247_s26  }
0x1091 PF: > { %s11555_s27 = sld [smem:[#allocation7_spill]]  ;;  %s11556_s17 = sld [smem:[#allocation5_spill]] }
0x1097   : > { %p8138_p1 = scmp.ge.s32.totalorder %s11555_s27, 2  ;;  %s5765_s16 = sand.u32 1, %s11556_s17  }
0x1098   : > { %s5766_s18 = scalar_lea.sflag [#allocation3], %s5765_s16 }
0x1099   : > { %p8135_p2 = pnand %p8138_p1, %p8370_p6 }
0x109b   : > { %8222 = dma.done.wait (!%p8135_p2), %s5766_s18, 32  }
0x109c   : > { %8224 = vsyncadd (!%p8135_p2), %s5766_s18, 4294967264  ;;  %s11558_s21 = sld [smem:[#allocation8_spill]]  ;;  %s11559_s23 = sld [smem:[#allocation6_spill]] }
0x109d   : > { %s11560_s20 = sld [smem:[#allocation9_spill]]  ;;  %s11561_s18 = smov %s8231_s19 }
0x10a2   : > { %p25_p3 = scmp.ge.s32.totalorder %s11558_s21, 4   ;;  %s11562_s19 = smov %s11559_s23 }
0x10a4   :  { %27 = sbr.rel (!%p25_p3) target bundleno = 5 (0x5), region = 133 }
0x10ab   :  { %5771 = vsyncpa [#allocation3], 1 }
0x10ac   :  { %5773 = vsyncpa [#allocation3 + $0x1], 1 }

</bundles_post_ra>
